<compile_context>
chip_gen: v7x
topology: tpu7x:2x2x1
jax: 0.10.0
libtpu: 0.0.40
codegen_flags: <defaults>
</compile_context>

<pallas_src>
import functools
import math

import jax
import jax.numpy as jnp
import numpy as np
from jax import lax
from jax.experimental import pallas as pl
from jax.experimental.pallas import tpu as pltpu


def _round_up(x, m):
    return ((x + m - 1) // m) * m


# ----------------------------------------------------------------------------
# Static planning: geometry for every pool + conv layer of every discriminator
# ----------------------------------------------------------------------------
def build_plan(cfg, length):
    num_layers = len(cfg["num_features"])
    neg_slope = float(cfg["negative_slope"])
    pk, ps = int(cfg["pool_kernel_size"]), int(cfg["pool_stride"])
    ppad = pk - ps

    plan = []
    comb_count = 0
    chain_len = int(length)
    for di in range(cfg["num_discriminators"]):
        disc = {"pool": None, "layers": []}
        if di > 0:
            lp = chain_len + 2 * ppad
            l_full = lp - (pk - 1)
            l_out = (lp - pk) // ps + 1
            comb_idx = None
            if ps > 1:
                comb_idx = comb_count
                comb_count += 1
            disc["pool"] = dict(pk=pk, ps=ps, pad=ppad, l_in=chain_len,
                                l_full=l_full, l_out=l_out, comb_idx=comb_idx)
            chain_len = l_out

        cur_l = chain_len
        for li in range(num_layers):
            c_in = int(cfg["num_features"][li])
            c_out = 1 if li == num_layers - 1 else int(cfg["num_features"][li + 1])
            K = int(cfg["kernel_size"][li])
            s = int(cfg["stride"][li])
            d = int(cfg["dilation"][li])
            g = int(cfg["groups"][li])
            pad = (K * d - d) // 2
            lp = cur_l + 2 * pad
            l_full = lp - d * (K - 1)                      # stride-1 output length
            l_out = (lp - d * (K - 1) - 1) // s + 1        # true output length
            l_store = max(128, _round_up(l_out, 128))      # lane-dense stored width
            win = l_full if s > 1 else l_store             # conv compute width
            comb_idx = None
            if s > 1:
                comb_idx = comb_count
                comb_count += 1
            neg = None if li == num_layers - 1 else neg_slope
            disc["layers"].append(dict(K=K, s=s, d=d, g=g, pad=pad,
                                       c_in=c_in, c_out=c_out, l_in=cur_l,
                                       l_full=l_full, l_out=l_out,
                                       l_store=l_store, win=win,
                                       neg=neg, comb_idx=comb_idx))
            cur_l = l_out
        plan.append(disc)
    return plan


def build_combs(plan):
    """Host-precomputed 0/1 decimation matrices (bf16 constants)."""
    def make(l_full, l_out, l_store, stride):
        m = np.zeros((l_full, l_store), np.float32)
        j = np.arange(l_out)
        m[stride * j, j] = 1.0
        return jnp.asarray(m, jnp.bfloat16)

    combs = []
    for disc in plan:
        p = disc["pool"]
        if p is not None and p["comb_idx"] is not None:
            combs.append(make(p["l_full"], p["l_out"], p["l_out"], p["ps"]))
        for lay in disc["layers"]:
            if lay["comb_idx"] is not None:
                combs.append(make(lay["l_full"], lay["l_out"], lay["l_store"],
                                  lay["s"]))
    return combs


def prepack_params(params, plan):
    """Pack weights as block-diagonal (K, c_out, c_in) bf16 per-tap slabs and
    biases as (c_out, 1) f32.  Runs once, OUTSIDE the jitted forward."""
    ws, bs = [], []
    for di, disc in enumerate(plan):
        for li, lay in enumerate(disc["layers"]):
            w, b = params[di][li]                       # (c_out, cin_g, K), (c_out,)
            c_out, cin_g, K = w.shape
            g, c_in = lay["g"], lay["c_in"]
            cout_g = c_out // g
            wt = jnp.transpose(w, (2, 0, 1))            # (K, c_out, cin_g)
            if g == 1:
                w_bd = wt
            else:
                w_bd = jnp.zeros((K, c_out, c_in), w.dtype)
                for gi in range(g):
                    w_bd = w_bd.at[:, gi * cout_g:(gi + 1) * cout_g,
                                   gi * cin_g:(gi + 1) * cin_g].set(
                        wt[:, gi * cout_g:(gi + 1) * cout_g, :])
            ws.append(w_bd.astype(jnp.bfloat16))
            bs.append(jnp.reshape(b, (c_out, 1)).astype(jnp.float32))
    return ws, bs


# ----------------------------------------------------------------------------
# Fused kernel: [pool] + 4 conv layers, x3 discriminators, per batch element
# ----------------------------------------------------------------------------
def _msd_kernel(*refs, plan, n_layers, n_combs):
    x_ref = refs[0]
    w_refs = refs[1:1 + n_layers]
    b_refs = refs[1 + n_layers:1 + 2 * n_layers]
    comb_refs = refs[1 + 2 * n_layers:1 + 2 * n_layers + n_combs]
    out_refs = refs[1 + 2 * n_layers + n_combs:-1]
    pad_ref = refs[-1]                                  # (max_c, max_w) f32 scratch

    def write_padded(h, c, l_in, pad, read_w):
        # Zero only the two pad strips, then copy the data (no full-buffer zero).
        if pad > 0:
            pad_ref[:c, :pad] = jnp.zeros((c, pad), jnp.float32)
        pad_ref[:c, pad:pad + l_in] = h
        rz = read_w - (pad + l_in)
        if rz > 0:
            pad_ref[:c, pad + l_in:read_w] = jnp.zeros((c, rz), jnp.float32)

    chain = x_ref[0]                                    # (c0, L) f32, VMEM resident
    li_flat = 0

    for disc in plan:
        # ---------------- AvgPool1d chain input (stays on-chip) --------------
        p = disc["pool"]
        if p is None:
            h = chain
        else:
            pk, ppad = p["pk"], p["pad"]
            c = chain.shape[0]
            write_padded(chain, c, p["l_in"], ppad, p["l_in"] + 2 * ppad)
            acc = pad_ref[:c, 0:p["l_full"]]
            for k in range(1, pk):                      # contiguous shifted windows
                acc = acc + pad_ref[:c, k:k + p["l_full"]]
            acc = acc * (1.0 / pk)
            if p["comb_idx"] is not None:               # exact stride-ps decimation
                acc = jnp.dot(acc.astype(jnp.bfloat16),
                              comb_refs[p["comb_idx"]][...],
                              preferred_element_type=jnp.float32)
            chain = acc                                 # (c0, l_pool) f32
            h = chain

        # ---------------- ConvBlock1d stack ----------------------------------
        for lay in disc["layers"]:
            K, s, d = lay["K"], lay["s"], lay["d"]
            c_in, c_out = lay["c_in"], lay["c_out"]
            pad, win = lay["pad"], lay["win"]
            read_w = d * (K - 1) + win
            write_padded(h, c_in, lay["l_in"], pad, read_w)

            w_all = w_refs[li_flat][...]                # (K, c_out, c_in) bf16
            acc = None
            if c_in == 1:
                # Rank-1 taps: VPU broadcast-FMA (MXU would be mostly idle padding).
                w32 = w_all.astype(jnp.float32)         # (K, c_out, 1)
                for k in range(K):
                    tap = pad_ref[0:1, k * d:k * d + win]          # (1, win) f32
                    contrib = w32[k] * tap                          # (c_out, win)
                    acc = contrib if acc is None else acc + contrib
            else:
                # One block-diagonal (c_out, c_in) bf16 MXU matmul per tap,
                # f32 accumulation (no im2col slab copies, no group loop).
                for k in range(K):
                    tap = pad_ref[:c_in, k * d:k * d + win].astype(jnp.bfloat16)
                    contrib = jnp.dot(w_all[k], tap,
                                      preferred_element_type=jnp.float32)
                    acc = contrib if acc is None else acc + contrib

            if lay["comb_idx"] is not None:
                # Exact stride-s decimation via host-precomputed bf16 0/1 comb
                # (also pads the output to its lane-dense stored width).
                acc = jnp.dot(acc.astype(jnp.bfloat16),
                              comb_refs[lay["comb_idx"]][...],
                              preferred_element_type=jnp.float32)   # (c_out, l_store)

            acc = acc + b_refs[li_flat][...]            # (c_out, 1) f32 bias
            if lay["neg"] is not None:
                acc = jnp.where(acc >= 0, acc, lay["neg"] * acc)

            out_refs[li_flat][0, :, :] = acc            # single lane-dense store
            h = acc[:, :lay["l_out"]]                   # true-length next input
            li_flat += 1


# ----------------------------------------------------------------------------
# Host-side wrapper: ONE fused pallas_call for the whole MSD
# ----------------------------------------------------------------------------
def _const_index_map(ndim):
    return lambda b: (0,) * ndim


def msd_forward(x, ws, bs, combs, *, plan):
    B, c0, L = x.shape
    n_layers = sum(len(d["layers"]) for d in plan)
    n_combs = len(combs)

    in_specs = [pl.BlockSpec((1, c0, L), lambda b: (b, 0, 0))]
    for a in list(ws) + list(bs) + list(combs):
        in_specs.append(pl.BlockSpec(tuple(a.shape), _const_index_map(a.ndim)))

    out_shapes, out_specs = [], []
    flops = 0
    max_c, max_read = c0, L
    for disc in plan:
        p = disc["pool"]
        if p is not None:
            flops += 2 * p["pk"] * p["l_full"] + 2 * p["l_full"] * p["l_out"]
            max_read = max(max_read, p["l_in"] + 2 * p["pad"])
        for lay in disc["layers"]:
            out_shapes.append(jax.ShapeDtypeStruct((B, lay["c_out"], lay["l_store"]),
                                                   jnp.float32))
            out_specs.append(pl.BlockSpec((1, lay["c_out"], lay["l_store"]),
                                          lambda b: (b, 0, 0)))
            flops += 2 * lay["K"] * lay["c_out"] * lay["c_in"] * lay["win"]
            if lay["comb_idx"] is not None:
                flops += 2 * lay["c_out"] * lay["l_full"] * lay["l_store"]
            max_c = max(max_c, lay["c_in"], lay["c_out"])
            max_read = max(max_read, lay["d"] * (lay["K"] - 1) + lay["win"])
    flops *= B

    bytes_accessed = x.size * x.dtype.itemsize
    for a in list(ws) + list(bs) + list(combs):
        bytes_accessed += a.size * a.dtype.itemsize
    for s in out_shapes:
        bytes_accessed += int(np.prod(s.shape)) * 4

    scratch_rows = _round_up(max_c, 8)
    scratch_cols = _round_up(max_read, 128)

    kernel = functools.partial(_msd_kernel, plan=plan,
                               n_layers=n_layers, n_combs=n_combs)

    outs = pl.pallas_call(
        kernel,
        out_shape=tuple(out_shapes),
        grid=(B,),
        in_specs=in_specs,
        out_specs=tuple(out_specs),
        scratch_shapes=[pltpu.VMEM((scratch_rows, scratch_cols), jnp.float32)],
        compiler_params=pltpu.CompilerParams(dimension_semantics=("parallel",)),
        cost_estimate=pl.CostEstimate(flops=int(flops), transcendentals=0,
                                      bytes_accessed=int(bytes_accessed)),
    )(x, *ws, *bs, *combs)

    # Slice lane-dense padded blocks back to true lengths; group per discriminator.
    outputs, feature_maps = [], []
    oi = 0
    for disc in plan:
        fmaps = []
        for lay in disc["layers"]:
            fmaps.append(outs[oi][:, :, :lay["l_out"]])
            oi += 1
        outputs.append(fmaps[-1])
        feature_maps.append(fmaps)
    return outputs, feature_maps


# ----------------------------------------------------------------------------
# Pure-JAX reference (correctness check only)
# ----------------------------------------------------------------------------
def _conv1d_reference(x, w, b, *, stride, dilation, groups, padding, neg_slope):
    out = lax.conv_general_dilated(
        x, w, window_strides=(stride,), padding=[(padding, padding)],
        rhs_dilation=(dilation,), feature_group_count=groups,
        dimension_numbers=("NCH", "OIH", "NCH"))
    out = out + b[None, :, None]
    if neg_slope is not None:
        out = jnp.where(out >= 0, out, neg_slope * out)
    return out


def _avg_pool_reference(x, kernel, stride):
    c = x.shape[1]
    w = jnp.full((c, 1, kernel), 1.0 / kernel, jnp.float32)
    b = jnp.zeros((c,), jnp.float32)
    return _conv1d_reference(x, w, b, stride=stride, dilation=1, groups=c,
                             padding=kernel - stride, neg_slope=None)


def multi_scale_discriminator_reference(x, params, cfg):
    num_layers = len(cfg["num_features"])
    outputs, feature_maps = [], []
    xc = x
    for di in range(cfg["num_discriminators"]):
        if di > 0:
            xc = _avg_pool_reference(xc, cfg["pool_kernel_size"], cfg["pool_stride"])
        h = xc
        fmap = []
        for li in range(num_layers):
            w, b = params[di][li]
            K = cfg["kernel_size"][li]
            d = cfg["dilation"][li]
            neg = None if li == num_layers - 1 else cfg["negative_slope"]
            h = _conv1d_reference(h, w, b, stride=cfg["stride"][li], dilation=d,
                                  groups=cfg["groups"][li],
                                  padding=(K * d - d) // 2, neg_slope=neg)
            fmap.append(h)
        outputs.append(h)
        feature_maps.append(fmap)
    return outputs, feature_maps


# ----------------------------------------------------------------------------
# Deterministic parameter init (PyTorch Conv1d-style uniform bounds)
# ----------------------------------------------------------------------------
def init_params(key, cfg):
    num_features = cfg["num_features"]
    num_layers = len(num_features)
    params = []
    for _ in range(cfg["num_discriminators"]):
        layers = []
        for li in range(num_layers):
            in_ch = num_features[li]
            out_ch = 1 if li == num_layers - 1 else num_features[li + 1]
            K = cfg["kernel_size"][li]
            g = cfg["groups"][li]
            key, k1, k2 = jax.random.split(key, 3)
            fan_in = (in_ch // g) * K
            bound = 1.0 / math.sqrt(fan_in)
            w = jax.random.uniform(k1, (out_ch, in_ch // g, K), jnp.float32,
                                   -bound, bound)
            bvec = jax.random.uniform(k2, (out_ch,), jnp.float32, -bound, bound)
            layers.append((w, bvec))
        params.append(layers)
    return params


# ----------------------------------------------------------------------------
if __name__ == "__main__":
    cfg = dict(
        num_features=[1, 8, 16, 16],
        kernel_size=[5, 7, 5, 3],
        stride=[1, 2, 2, 1],
        dilation=[1, 1, 1, 1],
        groups=[1, 2, 4, 1],
        negative_slope=0.1,
        pool_kernel_size=4,
        pool_stride=2,
        num_discriminators=3,
    )

    key = jax.random.PRNGKey(0)
    key, xkey = jax.random.split(key)
    # (batch, in_channels=num_features[0], length)
    x = jax.random.normal(xkey, (2, 1, 256), jnp.float32)
    params = init_params(key, cfg)

    # Static plan + one-time prepack (weights -> block-diagonal bf16 slabs,
    # decimation combs) outside the jitted per-forward path.
    plan = build_plan(cfg, x.shape[-1])
    combs = build_combs(plan)
    ws, bs = prepack_params(params, plan)

    msd = jax.jit(functools.partial(msd_forward, plan=plan))
    outs, fmaps = msd(x, ws, bs, combs)
    jax.block_until_ready((outs, fmaps))

    # Cross-check against a pure-JAX reference of the same forward pass
    # (bf16 MXU operands with f32 accumulation -> slightly wider tolerance).
    r_outs, r_fmaps = multi_scale_discriminator_reference(x, params, cfg)
    for o, r in zip(outs, r_outs):
        np.testing.assert_allclose(np.asarray(o), np.asarray(r),
                                   rtol=2e-2, atol=2e-2)
    for fm, rfm in zip(fmaps, r_fmaps):
        for a, b in zip(fm, rfm):
            np.testing.assert_allclose(np.asarray(a), np.asarray(b),
                                       rtol=2e-2, atol=2e-2)

    print("KERNEL_OK")
</pallas_src>

<mosaic_0001>
module attributes {stable_mosaic.version = 11 : i64} {
  func.func @_msd_kernel(%arg0: i32, %arg1: memref<1x1x256xf32, #tpu.memory_space<vmem>>, %arg2: memref<5x8x1xbf16, #tpu.memory_space<vmem>>, %arg3: memref<7x16x8xbf16, #tpu.memory_space<vmem>>, %arg4: memref<5x16x16xbf16, #tpu.memory_space<vmem>>, %arg5: memref<3x1x16xbf16, #tpu.memory_space<vmem>>, %arg6: memref<5x8x1xbf16, #tpu.memory_space<vmem>>, %arg7: memref<7x16x8xbf16, #tpu.memory_space<vmem>>, %arg8: memref<5x16x16xbf16, #tpu.memory_space<vmem>>, %arg9: memref<3x1x16xbf16, #tpu.memory_space<vmem>>, %arg10: memref<5x8x1xbf16, #tpu.memory_space<vmem>>, %arg11: memref<7x16x8xbf16, #tpu.memory_space<vmem>>, %arg12: memref<5x16x16xbf16, #tpu.memory_space<vmem>>, %arg13: memref<3x1x16xbf16, #tpu.memory_space<vmem>>, %arg14: memref<8x1xf32, #tpu.memory_space<vmem>>, %arg15: memref<16x1xf32, #tpu.memory_space<vmem>>, %arg16: memref<16x1xf32, #tpu.memory_space<vmem>>, %arg17: memref<1x1xf32, #tpu.memory_space<vmem>>, %arg18: memref<8x1xf32, #tpu.memory_space<vmem>>, %arg19: memref<16x1xf32, #tpu.memory_space<vmem>>, %arg20: memref<16x1xf32, #tpu.memory_space<vmem>>, %arg21: memref<1x1xf32, #tpu.memory_space<vmem>>, %arg22: memref<8x1xf32, #tpu.memory_space<vmem>>, %arg23: memref<16x1xf32, #tpu.memory_space<vmem>>, %arg24: memref<16x1xf32, #tpu.memory_space<vmem>>, %arg25: memref<1x1xf32, #tpu.memory_space<vmem>>, %arg26: memref<256x128xbf16, #tpu.memory_space<vmem>>, %arg27: memref<128x128xbf16, #tpu.memory_space<vmem>>, %arg28: memref<257x129xbf16, #tpu.memory_space<vmem>>, %arg29: memref<129x128xbf16, #tpu.memory_space<vmem>>, %arg30: memref<65x128xbf16, #tpu.memory_space<vmem>>, %arg31: memref<130x65xbf16, #tpu.memory_space<vmem>>, %arg32: memref<65x128xbf16, #tpu.memory_space<vmem>>, %arg33: memref<33x128xbf16, #tpu.memory_space<vmem>>, %arg34: memref<1x8x256xf32, #tpu.memory_space<vmem>>, %arg35: memref<1x16x128xf32, #tpu.memory_space<vmem>>, %arg36: memref<1x16x128xf32, #tpu.memory_space<vmem>>, %arg37: memref<1x1x128xf32, #tpu.memory_space<vmem>>, %arg38: memref<1x8x256xf32, #tpu.memory_space<vmem>>, %arg39: memref<1x16x128xf32, #tpu.memory_space<vmem>>, %arg40: memref<1x16x128xf32, #tpu.memory_space<vmem>>, %arg41: memref<1x1x128xf32, #tpu.memory_space<vmem>>, %arg42: memref<1x8x128xf32, #tpu.memory_space<vmem>>, %arg43: memref<1x16x128xf32, #tpu.memory_space<vmem>>, %arg44: memref<1x16x128xf32, #tpu.memory_space<vmem>>, %arg45: memref<1x1x128xf32, #tpu.memory_space<vmem>>, %arg46: memref<16x384xf32, #tpu.memory_space<vmem>>) attributes {dimension_semantics = [#tpu.dimension_semantics<parallel>], iteration_bounds = array<i64: 2>, scalar_prefetch = 0 : i64, scratch_operands = 1 : i64, tpu.core_type = #tpu.core_type<tc>, window_params = [{transform_indices = @transform_0, window_bounds = array<i64: 1, 1, 256>}, {pipeline_mode = #tpu.pipeline_mode<synchronous>, transform_indices = @transform_1, window_bounds = array<i64: 5, 8, 1>}, {pipeline_mode = #tpu.pipeline_mode<synchronous>, transform_indices = @transform_2, window_bounds = array<i64: 7, 16, 8>}, {pipeline_mode = #tpu.pipeline_mode<synchronous>, transform_indices = @transform_3, window_bounds = array<i64: 5, 16, 16>}, {pipeline_mode = #tpu.pipeline_mode<synchronous>, transform_indices = @transform_4, window_bounds = array<i64: 3, 1, 16>}, {pipeline_mode = #tpu.pipeline_mode<synchronous>, transform_indices = @transform_5, window_bounds = array<i64: 5, 8, 1>}, {pipeline_mode = #tpu.pipeline_mode<synchronous>, transform_indices = @transform_6, window_bounds = array<i64: 7, 16, 8>}, {pipeline_mode = #tpu.pipeline_mode<synchronous>, transform_indices = @transform_7, window_bounds = array<i64: 5, 16, 16>}, {pipeline_mode = #tpu.pipeline_mode<synchronous>, transform_indices = @transform_8, window_bounds = array<i64: 3, 1, 16>}, {pipeline_mode = #tpu.pipeline_mode<synchronous>, transform_indices = @transform_9, window_bounds = array<i64: 5, 8, 1>}, {pipeline_mode = #tpu.pipeline_mode<synchronous>, transform_indices = @transform_10, window_bounds = array<i64: 7, 16, 8>}, {pipeline_mode = #tpu.pipeline_mode<synchronous>, transform_indices = @transform_11, window_bounds = array<i64: 5, 16, 16>}, {pipeline_mode = #tpu.pipeline_mode<synchronous>, transform_indices = @transform_12, window_bounds = array<i64: 3, 1, 16>}, {pipeline_mode = #tpu.pipeline_mode<synchronous>, transform_indices = @transform_13, window_bounds = array<i64: 8, 1>}, {pipeline_mode = #tpu.pipeline_mode<synchronous>, transform_indices = @transform_14, window_bounds = array<i64: 16, 1>}, {pipeline_mode = #tpu.pipeline_mode<synchronous>, transform_indices = @transform_15, window_bounds = array<i64: 16, 1>}, {pipeline_mode = #tpu.pipeline_mode<synchronous>, transform_indices = @transform_16, window_bounds = array<i64: 1, 1>}, {pipeline_mode = #tpu.pipeline_mode<synchronous>, transform_indices = @transform_17, window_bounds = array<i64: 8, 1>}, {pipeline_mode = #tpu.pipeline_mode<synchronous>, transform_indices = @transform_18, window_bounds = array<i64: 16, 1>}, {pipeline_mode = #tpu.pipeline_mode<synchronous>, transform_indices = @transform_19, window_bounds = array<i64: 16, 1>}, {pipeline_mode = #tpu.pipeline_mode<synchronous>, transform_indices = @transform_20, window_bounds = array<i64: 1, 1>}, {pipeline_mode = #tpu.pipeline_mode<synchronous>, transform_indices = @transform_21, window_bounds = array<i64: 8, 1>}, {pipeline_mode = #tpu.pipeline_mode<synchronous>, transform_indices = @transform_22, window_bounds = array<i64: 16, 1>}, {pipeline_mode = #tpu.pipeline_mode<synchronous>, transform_indices = @transform_23, window_bounds = array<i64: 16, 1>}, {pipeline_mode = #tpu.pipeline_mode<synchronous>, transform_indices = @transform_24, window_bounds = array<i64: 1, 1>}, {pipeline_mode = #tpu.pipeline_mode<synchronous>, transform_indices = @transform_25, window_bounds = array<i64: 256, 128>}, {pipeline_mode = #tpu.pipeline_mode<synchronous>, transform_indices = @transform_26, window_bounds = array<i64: 128, 128>}, {pipeline_mode = #tpu.pipeline_mode<synchronous>, transform_indices = @transform_27, window_bounds = array<i64: 257, 129>}, {pipeline_mode = #tpu.pipeline_mode<synchronous>, transform_indices = @transform_28, window_bounds = array<i64: 129, 128>}, {pipeline_mode = #tpu.pipeline_mode<synchronous>, transform_indices = @transform_29, window_bounds = array<i64: 65, 128>}, {pipeline_mode = #tpu.pipeline_mode<synchronous>, transform_indices = @transform_30, window_bounds = array<i64: 130, 65>}, {pipeline_mode = #tpu.pipeline_mode<synchronous>, transform_indices = @transform_31, window_bounds = array<i64: 65, 128>}, {pipeline_mode = #tpu.pipeline_mode<synchronous>, transform_indices = @transform_32, window_bounds = array<i64: 33, 128>}, {transform_indices = @transform_33, window_bounds = array<i64: 1, 8, 256>}, {transform_indices = @transform_34, window_bounds = array<i64: 1, 16, 128>}, {transform_indices = @transform_35, window_bounds = array<i64: 1, 16, 128>}, {transform_indices = @transform_36, window_bounds = array<i64: 1, 1, 128>}, {transform_indices = @transform_37, window_bounds = array<i64: 1, 8, 256>}, {transform_indices = @transform_38, window_bounds = array<i64: 1, 16, 128>}, {transform_indices = @transform_39, window_bounds = array<i64: 1, 16, 128>}, {transform_indices = @transform_40, window_bounds = array<i64: 1, 1, 128>}, {transform_indices = @transform_41, window_bounds = array<i64: 1, 8, 128>}, {transform_indices = @transform_42, window_bounds = array<i64: 1, 16, 128>}, {transform_indices = @transform_43, window_bounds = array<i64: 1, 16, 128>}, {transform_indices = @transform_44, window_bounds = array<i64: 1, 1, 128>}]} {
    %c0 = arith.constant 0 : index
    %c0_0 = arith.constant 0 : index
    %c0_1 = arith.constant 0 : index
    %0 = vector.load %arg1[%c0, %c0_0, %c0_1] : memref<1x1x256xf32, #tpu.memory_space<vmem>>, vector<1x1x256xf32>
    %1 = vector.shape_cast %0 : vector<1x1x256xf32> to vector<1x256xf32>
    %cst = arith.constant 0.000000e+00 : f32
    %2 = vector.broadcast %cst : f32 to vector<1x2xf32>
    %c0_2 = arith.constant 0 : index
    %c0_3 = arith.constant 0 : index
    %3 = vector.load %arg46[%c0_2, %c0_3] : memref<16x384xf32, #tpu.memory_space<vmem>>, vector<1x2xf32>
    tpu.vector_store %arg46[%c0_2, %c0_3], %2 {strides = array<i32>} : memref<16x384xf32, #tpu.memory_space<vmem>>, vector<1x2xf32>,
    %c0_4 = arith.constant 0 : index
    %c2 = arith.constant 2 : index
    %4 = vector.load %arg46[%c0_4, %c2] : memref<16x384xf32, #tpu.memory_space<vmem>>, vector<1x256xf32>
    tpu.vector_store %arg46[%c0_4, %c2], %1 {strides = array<i32>} : memref<16x384xf32, #tpu.memory_space<vmem>>, vector<1x256xf32>,
    %cst_5 = arith.constant 0.000000e+00 : f32
    %5 = vector.broadcast %cst_5 : f32 to vector<1x2xf32>
    %c0_6 = arith.constant 0 : index
    %c258 = arith.constant 258 : index
    %6 = vector.load %arg46[%c0_6, %c258] : memref<16x384xf32, #tpu.memory_space<vmem>>, vector<1x2xf32>
    tpu.vector_store %arg46[%c0_6, %c258], %5 {strides = array<i32>} : memref<16x384xf32, #tpu.memory_space<vmem>>, vector<1x2xf32>,
    %c0_7 = arith.constant 0 : index
    %c0_8 = arith.constant 0 : index
    %c0_9 = arith.constant 0 : index
    %7 = vector.load %arg2[%c0_7, %c0_8, %c0_9] : memref<5x8x1xbf16, #tpu.memory_space<vmem>>, vector<5x8x1xbf16>
    %8 = arith.extf %7 : vector<5x8x1xbf16> to vector<5x8x1xf32>
    %c0_10 = arith.constant 0 : index
    %c0_11 = arith.constant 0 : index
    %9 = vector.load %arg46[%c0_10, %c0_11] : memref<16x384xf32, #tpu.memory_space<vmem>>, vector<1x256xf32>
    %10 = vector.extract_strided_slice %8 {offsets = [0, 0, 0], sizes = [1, 8, 1], strides = [1, 1, 1]} : vector<5x8x1xf32> to vector<1x8x1xf32>
    %11 = vector.shape_cast %10 : vector<1x8x1xf32> to vector<8x1xf32>
    %12 = vector.broadcast %11 : vector<8x1xf32> to vector<8x256xf32>
    %13 = vector.broadcast %9 : vector<1x256xf32> to vector<8x256xf32>
    %14 = arith.mulf %12, %13 : vector<8x256xf32>
    %c0_12 = arith.constant 0 : index
    %c1 = arith.constant 1 : index
    %15 = vector.load %arg46[%c0_12, %c1] : memref<16x384xf32, #tpu.memory_space<vmem>>, vector<1x256xf32>
    %16 = vector.extract_strided_slice %8 {offsets = [1, 0, 0], sizes = [1, 8, 1], strides = [1, 1, 1]} : vector<5x8x1xf32> to vector<1x8x1xf32>
    %17 = vector.shape_cast %16 : vector<1x8x1xf32> to vector<8x1xf32>
    %18 = vector.broadcast %17 : vector<8x1xf32> to vector<8x256xf32>
    %19 = vector.broadcast %15 : vector<1x256xf32> to vector<8x256xf32>
    %20 = arith.mulf %18, %19 : vector<8x256xf32>
    %21 = arith.addf %14, %20 : vector<8x256xf32>
    %c0_13 = arith.constant 0 : index
    %c2_14 = arith.constant 2 : index
    %22 = vector.load %arg46[%c0_13, %c2_14] : memref<16x384xf32, #tpu.memory_space<vmem>>, vector<1x256xf32>
    %23 = vector.extract_strided_slice %8 {offsets = [2, 0, 0], sizes = [1, 8, 1], strides = [1, 1, 1]} : vector<5x8x1xf32> to vector<1x8x1xf32>
    %24 = vector.shape_cast %23 : vector<1x8x1xf32> to vector<8x1xf32>
    %25 = vector.broadcast %24 : vector<8x1xf32> to vector<8x256xf32>
    %26 = vector.broadcast %22 : vector<1x256xf32> to vector<8x256xf32>
    %27 = arith.mulf %25, %26 : vector<8x256xf32>
    %28 = arith.addf %21, %27 : vector<8x256xf32>
    %c0_15 = arith.constant 0 : index
    %c3 = arith.constant 3 : index
    %29 = vector.load %arg46[%c0_15, %c3] : memref<16x384xf32, #tpu.memory_space<vmem>>, vector<1x256xf32>
    %30 = vector.extract_strided_slice %8 {offsets = [3, 0, 0], sizes = [1, 8, 1], strides = [1, 1, 1]} : vector<5x8x1xf32> to vector<1x8x1xf32>
    %31 = vector.shape_cast %30 : vector<1x8x1xf32> to vector<8x1xf32>
    %32 = vector.broadcast %31 : vector<8x1xf32> to vector<8x256xf32>
    %33 = vector.broadcast %29 : vector<1x256xf32> to vector<8x256xf32>
    %34 = arith.mulf %32, %33 : vector<8x256xf32>
    %35 = arith.addf %28, %34 : vector<8x256xf32>
    %c0_16 = arith.constant 0 : index
    %c4 = arith.constant 4 : index
    %36 = vector.load %arg46[%c0_16, %c4] : memref<16x384xf32, #tpu.memory_space<vmem>>, vector<1x256xf32>
    %37 = vector.extract_strided_slice %8 {offsets = [4, 0, 0], sizes = [1, 8, 1], strides = [1, 1, 1]} : vector<5x8x1xf32> to vector<1x8x1xf32>
    %38 = vector.shape_cast %37 : vector<1x8x1xf32> to vector<8x1xf32>
    %39 = vector.broadcast %38 : vector<8x1xf32> to vector<8x256xf32>
    %40 = vector.broadcast %36 : vector<1x256xf32> to vector<8x256xf32>
    %41 = arith.mulf %39, %40 : vector<8x256xf32>
    %42 = arith.addf %35, %41 : vector<8x256xf32>
    %c0_17 = arith.constant 0 : index
    %c0_18 = arith.constant 0 : index
    %43 = vector.load %arg14[%c0_17, %c0_18] : memref<8x1xf32, #tpu.memory_space<vmem>>, vector<8x1xf32>
    %44 = vector.broadcast %43 : vector<8x1xf32> to vector<8x256xf32>
    %45 = arith.addf %42, %44 : vector<8x256xf32>
    %cst_19 = arith.constant 0.000000e+00 : f32
    %46 = vector.broadcast %cst_19 : f32 to vector<8x256xf32>
    %47 = arith.cmpf oge, %45, %46 : vector<8x256xf32>
    %cst_20 = arith.constant 1.000000e-01 : f32
    %48 = vector.broadcast %cst_20 : f32 to vector<8x256xf32>
    %49 = arith.mulf %48, %45 : vector<8x256xf32>
    %50 = arith.select %47, %45, %49 : vector<8x256xi1>, vector<8x256xf32>
    %c0_21 = arith.constant 0 : index
    %c0_22 = arith.constant 0 : index
    %c0_23 = arith.constant 0 : index
    %51 = vector.load %arg34[%c0_21, %c0_22, %c0_23] : memref<1x8x256xf32, #tpu.memory_space<vmem>>, vector<1x8x256xf32>
    %52 = vector.shape_cast %51 : vector<1x8x256xf32> to vector<8x256xf32>
    %53 = vector.shape_cast %50 : vector<8x256xf32> to vector<1x8x256xf32>
    tpu.vector_store %arg34[%c0_21, %c0_22, %c0_23], %53 {strides = array<i32>} : memref<1x8x256xf32, #tpu.memory_space<vmem>>, vector<1x8x256xf32>,
    %cst_24 = arith.constant 0.000000e+00 : f32
    %54 = vector.broadcast %cst_24 : f32 to vector<8x3xf32>
    %c0_25 = arith.constant 0 : index
    %c0_26 = arith.constant 0 : index
    %55 = vector.load %arg46[%c0_25, %c0_26] : memref<16x384xf32, #tpu.memory_space<vmem>>, vector<8x3xf32>
    tpu.vector_store %arg46[%c0_25, %c0_26], %54 {strides = array<i32>} : memref<16x384xf32, #tpu.memory_space<vmem>>, vector<8x3xf32>,
    %c0_27 = arith.constant 0 : index
    %c3_28 = arith.constant 3 : index
    %56 = vector.load %arg46[%c0_27, %c3_28] : memref<16x384xf32, #tpu.memory_space<vmem>>, vector<8x256xf32>
    tpu.vector_store %arg46[%c0_27, %c3_28], %50 {strides = array<i32>} : memref<16x384xf32, #tpu.memory_space<vmem>>, vector<8x256xf32>,
    %cst_29 = arith.constant 0.000000e+00 : f32
    %57 = vector.broadcast %cst_29 : f32 to vector<8x3xf32>
    %c0_30 = arith.constant 0 : index
    %c259 = arith.constant 259 : index
    %58 = vector.load %arg46[%c0_30, %c259] : memref<16x384xf32, #tpu.memory_space<vmem>>, vector<8x3xf32>
    tpu.vector_store %arg46[%c0_30, %c259], %57 {strides = array<i32>} : memref<16x384xf32, #tpu.memory_space<vmem>>, vector<8x3xf32>,
    %c0_31 = arith.constant 0 : index
    %c0_32 = arith.constant 0 : index
    %c0_33 = arith.constant 0 : index
    %59 = vector.load %arg3[%c0_31, %c0_32, %c0_33] : memref<7x16x8xbf16, #tpu.memory_space<vmem>>, vector<7x16x8xbf16>
    %c0_34 = arith.constant 0 : index
    %c0_35 = arith.constant 0 : index
    %60 = vector.load %arg46[%c0_34, %c0_35] : memref<16x384xf32, #tpu.memory_space<vmem>>, vector<8x256xf32>
    %61 = arith.truncf %60 : vector<8x256xf32> to vector<8x256xbf16>
    %62 = vector.extract_strided_slice %59 {offsets = [0, 0, 0], sizes = [1, 16, 8], strides = [1, 1, 1]} : vector<7x16x8xbf16> to vector<1x16x8xbf16>
    %63 = vector.shape_cast %62 : vector<1x16x8xbf16> to vector<16x8xbf16>
    %cst_36 = arith.constant dense<0.000000e+00> : vector<16x256xf32>
    %64 = tpu.matmul %63, %61, %cst_36 {dimension_numbers = #tpu.dot_dimension_numbers<[1], [0], [0], [1], [0, 0, 1, 1], [], []>} : vector<16x8xbf16>, vector<8x256xbf16>, vector<16x256xf32> -> vector<16x256xf32>
    %c0_37 = arith.constant 0 : index
    %c1_38 = arith.constant 1 : index
    %65 = vector.load %arg46[%c0_37, %c1_38] : memref<16x384xf32, #tpu.memory_space<vmem>>, vector<8x256xf32>
    %66 = arith.truncf %65 : vector<8x256xf32> to vector<8x256xbf16>
    %67 = vector.extract_strided_slice %59 {offsets = [1, 0, 0], sizes = [1, 16, 8], strides = [1, 1, 1]} : vector<7x16x8xbf16> to vector<1x16x8xbf16>
    %68 = vector.shape_cast %67 : vector<1x16x8xbf16> to vector<16x8xbf16>
    %cst_39 = arith.constant dense<0.000000e+00> : vector<16x256xf32>
    %69 = tpu.matmul %68, %66, %cst_39 {dimension_numbers = #tpu.dot_dimension_numbers<[1], [0], [0], [1], [0, 0, 1, 1], [], []>} : vector<16x8xbf16>, vector<8x256xbf16>, vector<16x256xf32> -> vector<16x256xf32>
    %70 = arith.addf %64, %69 : vector<16x256xf32>
    %c0_40 = arith.constant 0 : index
    %c2_41 = arith.constant 2 : index
    %71 = vector.load %arg46[%c0_40, %c2_41] : memref<16x384xf32, #tpu.memory_space<vmem>>, vector<8x256xf32>
    %72 = arith.truncf %71 : vector<8x256xf32> to vector<8x256xbf16>
    %73 = vector.extract_strided_slice %59 {offsets = [2, 0, 0], sizes = [1, 16, 8], strides = [1, 1, 1]} : vector<7x16x8xbf16> to vector<1x16x8xbf16>
    %74 = vector.shape_cast %73 : vector<1x16x8xbf16> to vector<16x8xbf16>
    %cst_42 = arith.constant dense<0.000000e+00> : vector<16x256xf32>
    %75 = tpu.matmul %74, %72, %cst_42 {dimension_numbers = #tpu.dot_dimension_numbers<[1], [0], [0], [1], [0, 0, 1, 1], [], []>} : vector<16x8xbf16>, vector<8x256xbf16>, vector<16x256xf32> -> vector<16x256xf32>
    %76 = arith.addf %70, %75 : vector<16x256xf32>
    %c0_43 = arith.constant 0 : index
    %c3_44 = arith.constant 3 : index
    %77 = vector.load %arg46[%c0_43, %c3_44] : memref<16x384xf32, #tpu.memory_space<vmem>>, vector<8x256xf32>
    %78 = arith.truncf %77 : vector<8x256xf32> to vector<8x256xbf16>
    %79 = vector.extract_strided_slice %59 {offsets = [3, 0, 0], sizes = [1, 16, 8], strides = [1, 1, 1]} : vector<7x16x8xbf16> to vector<1x16x8xbf16>
    %80 = vector.shape_cast %79 : vector<1x16x8xbf16> to vector<16x8xbf16>
    %cst_45 = arith.constant dense<0.000000e+00> : vector<16x256xf32>
    %81 = tpu.matmul %80, %78, %cst_45 {dimension_numbers = #tpu.dot_dimension_numbers<[1], [0], [0], [1], [0, 0, 1, 1], [], []>} : vector<16x8xbf16>, vector<8x256xbf16>, vector<16x256xf32> -> vector<16x256xf32>
    %82 = arith.addf %76, %81 : vector<16x256xf32>
    %c0_46 = arith.constant 0 : index
    %c4_47 = arith.constant 4 : index
    %83 = vector.load %arg46[%c0_46, %c4_47] : memref<16x384xf32, #tpu.memory_space<vmem>>, vector<8x256xf32>
    %84 = arith.truncf %83 : vector<8x256xf32> to vector<8x256xbf16>
    %85 = vector.extract_strided_slice %59 {offsets = [4, 0, 0], sizes = [1, 16, 8], strides = [1, 1, 1]} : vector<7x16x8xbf16> to vector<1x16x8xbf16>
    %86 = vector.shape_cast %85 : vector<1x16x8xbf16> to vector<16x8xbf16>
    %cst_48 = arith.constant dense<0.000000e+00> : vector<16x256xf32>
    %87 = tpu.matmul %86, %84, %cst_48 {dimension_numbers = #tpu.dot_dimension_numbers<[1], [0], [0], [1], [0, 0, 1, 1], [], []>} : vector<16x8xbf16>, vector<8x256xbf16>, vector<16x256xf32> -> vector<16x256xf32>
    %88 = arith.addf %82, %87 : vector<16x256xf32>
    %c0_49 = arith.constant 0 : index
    %c5 = arith.constant 5 : index
    %89 = vector.load %arg46[%c0_49, %c5] : memref<16x384xf32, #tpu.memory_space<vmem>>, vector<8x256xf32>
    %90 = arith.truncf %89 : vector<8x256xf32> to vector<8x256xbf16>
    %91 = vector.extract_strided_slice %59 {offsets = [5, 0, 0], sizes = [1, 16, 8], strides = [1, 1, 1]} : vector<7x16x8xbf16> to vector<1x16x8xbf16>
    %92 = vector.shape_cast %91 : vector<1x16x8xbf16> to vector<16x8xbf16>
    %cst_50 = arith.constant dense<0.000000e+00> : vector<16x256xf32>
    %93 = tpu.matmul %92, %90, %cst_50 {dimension_numbers = #tpu.dot_dimension_numbers<[1], [0], [0], [1], [0, 0, 1, 1], [], []>} : vector<16x8xbf16>, vector<8x256xbf16>, vector<16x256xf32> -> vector<16x256xf32>
    %94 = arith.addf %88, %93 : vector<16x256xf32>
    %c0_51 = arith.constant 0 : index
    %c6 = arith.constant 6 : index
    %95 = vector.load %arg46[%c0_51, %c6] : memref<16x384xf32, #tpu.memory_space<vmem>>, vector<8x256xf32>
    %96 = arith.truncf %95 : vector<8x256xf32> to vector<8x256xbf16>
    %97 = vector.extract_strided_slice %59 {offsets = [6, 0, 0], sizes = [1, 16, 8], strides = [1, 1, 1]} : vector<7x16x8xbf16> to vector<1x16x8xbf16>
    %98 = vector.shape_cast %97 : vector<1x16x8xbf16> to vector<16x8xbf16>
    %cst_52 = arith.constant dense<0.000000e+00> : vector<16x256xf32>
    %99 = tpu.matmul %98, %96, %cst_52 {dimension_numbers = #tpu.dot_dimension_numbers<[1], [0], [0], [1], [0, 0, 1, 1], [], []>} : vector<16x8xbf16>, vector<8x256xbf16>, vector<16x256xf32> -> vector<16x256xf32>
    %100 = arith.addf %94, %99 : vector<16x256xf32>
    %101 = arith.truncf %100 : vector<16x256xf32> to vector<16x256xbf16>
    %c0_53 = arith.constant 0 : index
    %c0_54 = arith.constant 0 : index
    %102 = vector.load %arg26[%c0_53, %c0_54] : memref<256x128xbf16, #tpu.memory_space<vmem>>, vector<256x128xbf16>
    %cst_55 = arith.constant dense<0.000000e+00> : vector<16x128xf32>
    %103 = tpu.matmul %101, %102, %cst_55 {dimension_numbers = #tpu.dot_dimension_numbers<[1], [0], [0], [1], [0, 0, 1, 1], [], []>} : vector<16x256xbf16>, vector<256x128xbf16>, vector<16x128xf32> -> vector<16x128xf32>
    %c0_56 = arith.constant 0 : index
    %c0_57 = arith.constant 0 : index
    %104 = vector.load %arg15[%c0_56, %c0_57] : memref<16x1xf32, #tpu.memory_space<vmem>>, vector<16x1xf32>
    %105 = vector.broadcast %104 : vector<16x1xf32> to vector<16x128xf32>
    %106 = arith.addf %103, %105 : vector<16x128xf32>
    %cst_58 = arith.constant 0.000000e+00 : f32
    %107 = vector.broadcast %cst_58 : f32 to vector<16x128xf32>
    %108 = arith.cmpf oge, %106, %107 : vector<16x128xf32>
    %cst_59 = arith.constant 1.000000e-01 : f32
    %109 = vector.broadcast %cst_59 : f32 to vector<16x128xf32>
    %110 = arith.mulf %109, %106 : vector<16x128xf32>
    %111 = arith.select %108, %106, %110 : vector<16x128xi1>, vector<16x128xf32>
    %c0_60 = arith.constant 0 : index
    %c0_61 = arith.constant 0 : index
    %c0_62 = arith.constant 0 : index
    %112 = vector.load %arg35[%c0_60, %c0_61, %c0_62] : memref<1x16x128xf32, #tpu.memory_space<vmem>>, vector<1x16x128xf32>
    %113 = vector.shape_cast %112 : vector<1x16x128xf32> to vector<16x128xf32>
    %114 = vector.shape_cast %111 : vector<16x128xf32> to vector<1x16x128xf32>
    tpu.vector_store %arg35[%c0_60, %c0_61, %c0_62], %114 {strides = array<i32>} : memref<1x16x128xf32, #tpu.memory_space<vmem>>, vector<1x16x128xf32>,
    %cst_63 = arith.constant 0.000000e+00 : f32
    %115 = vector.broadcast %cst_63 : f32 to vector<16x2xf32>
    %c0_64 = arith.constant 0 : index
    %c0_65 = arith.constant 0 : index
    %116 = vector.load %arg46[%c0_64, %c0_65] : memref<16x384xf32, #tpu.memory_space<vmem>>, vector<16x2xf32>
    tpu.vector_store %arg46[%c0_64, %c0_65], %115 {strides = array<i32>} : memref<16x384xf32, #tpu.memory_space<vmem>>, vector<16x2xf32>,
    %c0_66 = arith.constant 0 : index
    %c2_67 = arith.constant 2 : index
    %117 = vector.load %arg46[%c0_66, %c2_67] : memref<16x384xf32, #tpu.memory_space<vmem>>, vector<16x128xf32>
    tpu.vector_store %arg46[%c0_66, %c2_67], %111 {strides = array<i32>} : memref<16x384xf32, #tpu.memory_space<vmem>>, vector<16x128xf32>,
    %cst_68 = arith.constant 0.000000e+00 : f32
    %118 = vector.broadcast %cst_68 : f32 to vector<16x2xf32>
    %c0_69 = arith.constant 0 : index
    %c130 = arith.constant 130 : index
    %119 = vector.load %arg46[%c0_69, %c130] : memref<16x384xf32, #tpu.memory_space<vmem>>, vector<16x2xf32>
    tpu.vector_store %arg46[%c0_69, %c130], %118 {strides = array<i32>} : memref<16x384xf32, #tpu.memory_space<vmem>>, vector<16x2xf32>,
    %c0_70 = arith.constant 0 : index
    %c0_71 = arith.constant 0 : index
    %c0_72 = arith.constant 0 : index
    %120 = vector.load %arg4[%c0_70, %c0_71, %c0_72] : memref<5x16x16xbf16, #tpu.memory_space<vmem>>, vector<5x16x16xbf16>
    %c0_73 = arith.constant 0 : index
    %c0_74 = arith.constant 0 : index
    %121 = vector.load %arg46[%c0_73, %c0_74] : memref<16x384xf32, #tpu.memory_space<vmem>>, vector<16x128xf32>
    %122 = arith.truncf %121 : vector<16x128xf32> to vector<16x128xbf16>
    %123 = vector.extract_strided_slice %120 {offsets = [0, 0, 0], sizes = [1, 16, 16], strides = [1, 1, 1]} : vector<5x16x16xbf16> to vector<1x16x16xbf16>
    %124 = vector.shape_cast %123 : vector<1x16x16xbf16> to vector<16x16xbf16>
    %cst_75 = arith.constant dense<0.000000e+00> : vector<16x128xf32>
    %125 = tpu.matmul %124, %122, %cst_75 {dimension_numbers = #tpu.dot_dimension_numbers<[1], [0], [0], [1], [0, 0, 1, 1], [], []>} : vector<16x16xbf16>, vector<16x128xbf16>, vector<16x128xf32> -> vector<16x128xf32>
    %c0_76 = arith.constant 0 : index
    %c1_77 = arith.constant 1 : index
    %126 = vector.load %arg46[%c0_76, %c1_77] : memref<16x384xf32, #tpu.memory_space<vmem>>, vector<16x128xf32>
    %127 = arith.truncf %126 : vector<16x128xf32> to vector<16x128xbf16>
    %128 = vector.extract_strided_slice %120 {offsets = [1, 0, 0], sizes = [1, 16, 16], strides = [1, 1, 1]} : vector<5x16x16xbf16> to vector<1x16x16xbf16>
    %129 = vector.shape_cast %128 : vector<1x16x16xbf16> to vector<16x16xbf16>
    %cst_78 = arith.constant dense<0.000000e+00> : vector<16x128xf32>
    %130 = tpu.matmul %129, %127, %cst_78 {dimension_numbers = #tpu.dot_dimension_numbers<[1], [0], [0], [1], [0, 0, 1, 1], [], []>} : vector<16x16xbf16>, vector<16x128xbf16>, vector<16x128xf32> -> vector<16x128xf32>
    %131 = arith.addf %125, %130 : vector<16x128xf32>
    %c0_79 = arith.constant 0 : index
    %c2_80 = arith.constant 2 : index
    %132 = vector.load %arg46[%c0_79, %c2_80] : memref<16x384xf32, #tpu.memory_space<vmem>>, vector<16x128xf32>
    %133 = arith.truncf %132 : vector<16x128xf32> to vector<16x128xbf16>
    %134 = vector.extract_strided_slice %120 {offsets = [2, 0, 0], sizes = [1, 16, 16], strides = [1, 1, 1]} : vector<5x16x16xbf16> to vector<1x16x16xbf16>
    %135 = vector.shape_cast %134 : vector<1x16x16xbf16> to vector<16x16xbf16>
    %cst_81 = arith.constant dense<0.000000e+00> : vector<16x128xf32>
    %136 = tpu.matmul %135, %133, %cst_81 {dimension_numbers = #tpu.dot_dimension_numbers<[1], [0], [0], [1], [0, 0, 1, 1], [], []>} : vector<16x16xbf16>, vector<16x128xbf16>, vector<16x128xf32> -> vector<16x128xf32>
    %137 = arith.addf %131, %136 : vector<16x128xf32>
    %c0_82 = arith.constant 0 : index
    %c3_83 = arith.constant 3 : index
    %138 = vector.load %arg46[%c0_82, %c3_83] : memref<16x384xf32, #tpu.memory_space<vmem>>, vector<16x128xf32>
    %139 = arith.truncf %138 : vector<16x128xf32> to vector<16x128xbf16>
    %140 = vector.extract_strided_slice %120 {offsets = [3, 0, 0], sizes = [1, 16, 16], strides = [1, 1, 1]} : vector<5x16x16xbf16> to vector<1x16x16xbf16>
    %141 = vector.shape_cast %140 : vector<1x16x16xbf16> to vector<16x16xbf16>
    %cst_84 = arith.constant dense<0.000000e+00> : vector<16x128xf32>
    %142 = tpu.matmul %141, %139, %cst_84 {dimension_numbers = #tpu.dot_dimension_numbers<[1], [0], [0], [1], [0, 0, 1, 1], [], []>} : vector<16x16xbf16>, vector<16x128xbf16>, vector<16x128xf32> -> vector<16x128xf32>
    %143 = arith.addf %137, %142 : vector<16x128xf32>
    %c0_85 = arith.constant 0 : index
    %c4_86 = arith.constant 4 : index
    %144 = vector.load %arg46[%c0_85, %c4_86] : memref<16x384xf32, #tpu.memory_space<vmem>>, vector<16x128xf32>
    %145 = arith.truncf %144 : vector<16x128xf32> to vector<16x128xbf16>
    %146 = vector.extract_strided_slice %120 {offsets = [4, 0, 0], sizes = [1, 16, 16], strides = [1, 1, 1]} : vector<5x16x16xbf16> to vector<1x16x16xbf16>
    %147 = vector.shape_cast %146 : vector<1x16x16xbf16> to vector<16x16xbf16>
    %cst_87 = arith.constant dense<0.000000e+00> : vector<16x128xf32>
    %148 = tpu.matmul %147, %145, %cst_87 {dimension_numbers = #tpu.dot_dimension_numbers<[1], [0], [0], [1], [0, 0, 1, 1], [], []>} : vector<16x16xbf16>, vector<16x128xbf16>, vector<16x128xf32> -> vector<16x128xf32>
    %149 = arith.addf %143, %148 : vector<16x128xf32>
    %150 = arith.truncf %149 : vector<16x128xf32> to vector<16x128xbf16>
    %c0_88 = arith.constant 0 : index
    %c0_89 = arith.constant 0 : index
    %151 = vector.load %arg27[%c0_88, %c0_89] : memref<128x128xbf16, #tpu.memory_space<vmem>>, vector<128x128xbf16>
    %cst_90 = arith.constant dense<0.000000e+00> : vector<16x128xf32>
    %152 = tpu.matmul %150, %151, %cst_90 {dimension_numbers = #tpu.dot_dimension_numbers<[1], [0], [0], [1], [0, 0, 1, 1], [], []>} : vector<16x128xbf16>, vector<128x128xbf16>, vector<16x128xf32> -> vector<16x128xf32>
    %c0_91 = arith.constant 0 : index
    %c0_92 = arith.constant 0 : index
    %153 = vector.load %arg16[%c0_91, %c0_92] : memref<16x1xf32, #tpu.memory_space<vmem>>, vector<16x1xf32>
    %154 = vector.broadcast %153 : vector<16x1xf32> to vector<16x128xf32>
    %155 = arith.addf %152, %154 : vector<16x128xf32>
    %cst_93 = arith.constant 0.000000e+00 : f32
    %156 = vector.broadcast %cst_93 : f32 to vector<16x128xf32>
    %157 = arith.cmpf oge, %155, %156 : vector<16x128xf32>
    %cst_94 = arith.constant 1.000000e-01 : f32
    %158 = vector.broadcast %cst_94 : f32 to vector<16x128xf32>
    %159 = arith.mulf %158, %155 : vector<16x128xf32>
    %160 = arith.select %157, %155, %159 : vector<16x128xi1>, vector<16x128xf32>
    %c0_95 = arith.constant 0 : index
    %c0_96 = arith.constant 0 : index
    %c0_97 = arith.constant 0 : index
    %161 = vector.load %arg36[%c0_95, %c0_96, %c0_97] : memref<1x16x128xf32, #tpu.memory_space<vmem>>, vector<1x16x128xf32>
    %162 = vector.shape_cast %161 : vector<1x16x128xf32> to vector<16x128xf32>
    %163 = vector.shape_cast %160 : vector<16x128xf32> to vector<1x16x128xf32>
    tpu.vector_store %arg36[%c0_95, %c0_96, %c0_97], %163 {strides = array<i32>} : memref<1x16x128xf32, #tpu.memory_space<vmem>>, vector<1x16x128xf32>,
    %164 = vector.extract_strided_slice %160 {offsets = [0, 0], sizes = [16, 64], strides = [1, 1]} : vector<16x128xf32> to vector<16x64xf32>
    %cst_98 = arith.constant 0.000000e+00 : f32
    %165 = vector.broadcast %cst_98 : f32 to vector<16x1xf32>
    %c0_99 = arith.constant 0 : index
    %c0_100 = arith.constant 0 : index
    %166 = vector.load %arg46[%c0_99, %c0_100] : memref<16x384xf32, #tpu.memory_space<vmem>>, vector<16x1xf32>
    tpu.vector_store %arg46[%c0_99, %c0_100], %165 {strides = array<i32>} : memref<16x384xf32, #tpu.memory_space<vmem>>, vector<16x1xf32>,
    %c0_101 = arith.constant 0 : index
    %c1_102 = arith.constant 1 : index
    %167 = vector.load %arg46[%c0_101, %c1_102] : memref<16x384xf32, #tpu.memory_space<vmem>>, vector<16x64xf32>
    tpu.vector_store %arg46[%c0_101, %c1_102], %164 {strides = array<i32>} : memref<16x384xf32, #tpu.memory_space<vmem>>, vector<16x64xf32>,
    %cst_103 = arith.constant 0.000000e+00 : f32
    %168 = vector.broadcast %cst_103 : f32 to vector<16x65xf32>
    %c0_104 = arith.constant 0 : index
    %c65 = arith.constant 65 : index
    %169 = vector.load %arg46[%c0_104, %c65] : memref<16x384xf32, #tpu.memory_space<vmem>>, vector<16x65xf32>
    tpu.vector_store %arg46[%c0_104, %c65], %168 {strides = array<i32>} : memref<16x384xf32, #tpu.memory_space<vmem>>, vector<16x65xf32>,
    %c0_105 = arith.constant 0 : index
    %c0_106 = arith.constant 0 : index
    %c0_107 = arith.constant 0 : index
    %170 = vector.load %arg5[%c0_105, %c0_106, %c0_107] : memref<3x1x16xbf16, #tpu.memory_space<vmem>>, vector<3x1x16xbf16>
    %c0_108 = arith.constant 0 : index
    %c0_109 = arith.constant 0 : index
    %171 = vector.load %arg46[%c0_108, %c0_109] : memref<16x384xf32, #tpu.memory_space<vmem>>, vector<16x128xf32>
    %172 = arith.truncf %171 : vector<16x128xf32> to vector<16x128xbf16>
    %173 = vector.extract_strided_slice %170 {offsets = [0, 0, 0], sizes = [1, 1, 16], strides = [1, 1, 1]} : vector<3x1x16xbf16> to vector<1x1x16xbf16>
    %174 = vector.shape_cast %173 : vector<1x1x16xbf16> to vector<1x16xbf16>
    %cst_110 = arith.constant dense<0.000000e+00> : vector<1x128xf32>
    %175 = tpu.matmul %174, %172, %cst_110 {dimension_numbers = #tpu.dot_dimension_numbers<[1], [0], [0], [1], [0, 0, 1, 1], [], []>} : vector<1x16xbf16>, vector<16x128xbf16>, vector<1x128xf32> -> vector<1x128xf32>
    %c0_111 = arith.constant 0 : index
    %c1_112 = arith.constant 1 : index
    %176 = vector.load %arg46[%c0_111, %c1_112] : memref<16x384xf32, #tpu.memory_space<vmem>>, vector<16x128xf32>
    %177 = arith.truncf %176 : vector<16x128xf32> to vector<16x128xbf16>
    %178 = vector.extract_strided_slice %170 {offsets = [1, 0, 0], sizes = [1, 1, 16], strides = [1, 1, 1]} : vector<3x1x16xbf16> to vector<1x1x16xbf16>
    %179 = vector.shape_cast %178 : vector<1x1x16xbf16> to vector<1x16xbf16>
    %cst_113 = arith.constant dense<0.000000e+00> : vector<1x128xf32>
    %180 = tpu.matmul %179, %177, %cst_113 {dimension_numbers = #tpu.dot_dimension_numbers<[1], [0], [0], [1], [0, 0, 1, 1], [], []>} : vector<1x16xbf16>, vector<16x128xbf16>, vector<1x128xf32> -> vector<1x128xf32>
    %181 = arith.addf %175, %180 : vector<1x128xf32>
    %c0_114 = arith.constant 0 : index
    %c2_115 = arith.constant 2 : index
    %182 = vector.load %arg46[%c0_114, %c2_115] : memref<16x384xf32, #tpu.memory_space<vmem>>, vector<16x128xf32>
    %183 = arith.truncf %182 : vector<16x128xf32> to vector<16x128xbf16>
    %184 = vector.extract_strided_slice %170 {offsets = [2, 0, 0], sizes = [1, 1, 16], strides = [1, 1, 1]} : vector<3x1x16xbf16> to vector<1x1x16xbf16>
    %185 = vector.shape_cast %184 : vector<1x1x16xbf16> to vector<1x16xbf16>
    %cst_116 = arith.constant dense<0.000000e+00> : vector<1x128xf32>
    %186 = tpu.matmul %185, %183, %cst_116 {dimension_numbers = #tpu.dot_dimension_numbers<[1], [0], [0], [1], [0, 0, 1, 1], [], []>} : vector<1x16xbf16>, vector<16x128xbf16>, vector<1x128xf32> -> vector<1x128xf32>
    %187 = arith.addf %181, %186 : vector<1x128xf32>
    %c0_117 = arith.constant 0 : index
    %c0_118 = arith.constant 0 : index
    %188 = vector.load %arg17[%c0_117, %c0_118] : memref<1x1xf32, #tpu.memory_space<vmem>>, vector<1x1xf32>
    %189 = vector.broadcast %188 : vector<1x1xf32> to vector<1x128xf32>
    %190 = arith.addf %187, %189 : vector<1x128xf32>
    %c0_119 = arith.constant 0 : index
    %c0_120 = arith.constant 0 : index
    %c0_121 = arith.constant 0 : index
    %191 = vector.load %arg37[%c0_119, %c0_120, %c0_121] : memref<1x1x128xf32, #tpu.memory_space<vmem>>, vector<1x1x128xf32>
    %192 = vector.shape_cast %191 : vector<1x1x128xf32> to vector<1x128xf32>
    %193 = vector.shape_cast %190 : vector<1x128xf32> to vector<1x1x128xf32>
    tpu.vector_store %arg37[%c0_119, %c0_120, %c0_121], %193 {strides = array<i32>} : memref<1x1x128xf32, #tpu.memory_space<vmem>>, vector<1x1x128xf32>,
    %cst_122 = arith.constant 0.000000e+00 : f32
    %194 = vector.broadcast %cst_122 : f32 to vector<1x2xf32>
    %c0_123 = arith.constant 0 : index
    %c0_124 = arith.constant 0 : index
    %195 = vector.load %arg46[%c0_123, %c0_124] : memref<16x384xf32, #tpu.memory_space<vmem>>, vector<1x2xf32>
    tpu.vector_store %arg46[%c0_123, %c0_124], %194 {strides = array<i32>} : memref<16x384xf32, #tpu.memory_space<vmem>>, vector<1x2xf32>,
    %c0_125 = arith.constant 0 : index
    %c2_126 = arith.constant 2 : index
    %196 = vector.load %arg46[%c0_125, %c2_126] : memref<16x384xf32, #tpu.memory_space<vmem>>, vector<1x256xf32>
    tpu.vector_store %arg46[%c0_125, %c2_126], %1 {strides = array<i32>} : memref<16x384xf32, #tpu.memory_space<vmem>>, vector<1x256xf32>,
    %cst_127 = arith.constant 0.000000e+00 : f32
    %197 = vector.broadcast %cst_127 : f32 to vector<1x2xf32>
    %c0_128 = arith.constant 0 : index
    %c258_129 = arith.constant 258 : index
    %198 = vector.load %arg46[%c0_128, %c258_129] : memref<16x384xf32, #tpu.memory_space<vmem>>, vector<1x2xf32>
    tpu.vector_store %arg46[%c0_128, %c258_129], %197 {strides = array<i32>} : memref<16x384xf32, #tpu.memory_space<vmem>>, vector<1x2xf32>,
    %c0_130 = arith.constant 0 : index
    %c0_131 = arith.constant 0 : index
    %199 = vector.load %arg46[%c0_130, %c0_131] : memref<16x384xf32, #tpu.memory_space<vmem>>, vector<1x257xf32>
    %c0_132 = arith.constant 0 : index
    %c1_133 = arith.constant 1 : index
    %200 = vector.load %arg46[%c0_132, %c1_133] : memref<16x384xf32, #tpu.memory_space<vmem>>, vector<1x257xf32>
    %201 = arith.addf %199, %200 : vector<1x257xf32>
    %c0_134 = arith.constant 0 : index
    %c2_135 = arith.constant 2 : index
    %202 = vector.load %arg46[%c0_134, %c2_135] : memref<16x384xf32, #tpu.memory_space<vmem>>, vector<1x257xf32>
    %203 = arith.addf %201, %202 : vector<1x257xf32>
    %c0_136 = arith.constant 0 : index
    %c3_137 = arith.constant 3 : index
    %204 = vector.load %arg46[%c0_136, %c3_137] : memref<16x384xf32, #tpu.memory_space<vmem>>, vector<1x257xf32>
    %205 = arith.addf %203, %204 : vector<1x257xf32>
    %cst_138 = arith.constant 2.500000e-01 : f32
    %206 = vector.broadcast %cst_138 : f32 to vector<1x257xf32>
    %207 = arith.mulf %205, %206 : vector<1x257xf32>
    %208 = arith.truncf %207 : vector<1x257xf32> to vector<1x257xbf16>
    %c0_139 = arith.constant 0 : index
    %c0_140 = arith.constant 0 : index
    %209 = vector.load %arg28[%c0_139, %c0_140] : memref<257x129xbf16, #tpu.memory_space<vmem>>, vector<257x129xbf16>
    %cst_141 = arith.constant dense<0.000000e+00> : vector<1x129xf32>
    %210 = tpu.matmul %208, %209, %cst_141 {dimension_numbers = #tpu.dot_dimension_numbers<[1], [0], [0], [1], [0, 0, 1, 1], [], []>} : vector<1x257xbf16>, vector<257x129xbf16>, vector<1x129xf32> -> vector<1x129xf32>
    %cst_142 = arith.constant 0.000000e+00 : f32
    %211 = vector.broadcast %cst_142 : f32 to vector<1x2xf32>
    %c0_143 = arith.constant 0 : index
    %c0_144 = arith.constant 0 : index
    %212 = vector.load %arg46[%c0_143, %c0_144] : memref<16x384xf32, #tpu.memory_space<vmem>>, vector<1x2xf32>
    tpu.vector_store %arg46[%c0_143, %c0_144], %211 {strides = array<i32>} : memref<16x384xf32, #tpu.memory_space<vmem>>, vector<1x2xf32>,
    %c0_145 = arith.constant 0 : index
    %c2_146 = arith.constant 2 : index
    %213 = vector.load %arg46[%c0_145, %c2_146] : memref<16x384xf32, #tpu.memory_space<vmem>>, vector<1x129xf32>
    tpu.vector_store %arg46[%c0_145, %c2_146], %210 {strides = array<i32>} : memref<16x384xf32, #tpu.memory_space<vmem>>, vector<1x129xf32>,
    %cst_147 = arith.constant 0.000000e+00 : f32
    %214 = vector.broadcast %cst_147 : f32 to vector<1x129xf32>
    %c0_148 = arith.constant 0 : index
    %c131 = arith.constant 131 : index
    %215 = vector.load %arg46[%c0_148, %c131] : memref<16x384xf32, #tpu.memory_space<vmem>>, vector<1x129xf32>
    tpu.vector_store %arg46[%c0_148, %c131], %214 {strides = array<i32>} : memref<16x384xf32, #tpu.memory_space<vmem>>, vector<1x129xf32>,
    %c0_149 = arith.constant 0 : index
    %c0_150 = arith.constant 0 : index
    %c0_151 = arith.constant 0 : index
    %216 = vector.load %arg6[%c0_149, %c0_150, %c0_151] : memref<5x8x1xbf16, #tpu.memory_space<vmem>>, vector<5x8x1xbf16>
    %217 = arith.extf %216 : vector<5x8x1xbf16> to vector<5x8x1xf32>
    %c0_152 = arith.constant 0 : index
    %c0_153 = arith.constant 0 : index
    %218 = vector.load %arg46[%c0_152, %c0_153] : memref<16x384xf32, #tpu.memory_space<vmem>>, vector<1x256xf32>
    %219 = vector.extract_strided_slice %217 {offsets = [0, 0, 0], sizes = [1, 8, 1], strides = [1, 1, 1]} : vector<5x8x1xf32> to vector<1x8x1xf32>
    %220 = vector.shape_cast %219 : vector<1x8x1xf32> to vector<8x1xf32>
    %221 = vector.broadcast %220 : vector<8x1xf32> to vector<8x256xf32>
    %222 = vector.broadcast %218 : vector<1x256xf32> to vector<8x256xf32>
    %223 = arith.mulf %221, %222 : vector<8x256xf32>
    %c0_154 = arith.constant 0 : index
    %c1_155 = arith.constant 1 : index
    %224 = vector.load %arg46[%c0_154, %c1_155] : memref<16x384xf32, #tpu.memory_space<vmem>>, vector<1x256xf32>
    %225 = vector.extract_strided_slice %217 {offsets = [1, 0, 0], sizes = [1, 8, 1], strides = [1, 1, 1]} : vector<5x8x1xf32> to vector<1x8x1xf32>
    %226 = vector.shape_cast %225 : vector<1x8x1xf32> to vector<8x1xf32>
    %227 = vector.broadcast %226 : vector<8x1xf32> to vector<8x256xf32>
    %228 = vector.broadcast %224 : vector<1x256xf32> to vector<8x256xf32>
    %229 = arith.mulf %227, %228 : vector<8x256xf32>
    %230 = arith.addf %223, %229 : vector<8x256xf32>
    %c0_156 = arith.constant 0 : index
    %c2_157 = arith.constant 2 : index
    %231 = vector.load %arg46[%c0_156, %c2_157] : memref<16x384xf32, #tpu.memory_space<vmem>>, vector<1x256xf32>
    %232 = vector.extract_strided_slice %217 {offsets = [2, 0, 0], sizes = [1, 8, 1], strides = [1, 1, 1]} : vector<5x8x1xf32> to vector<1x8x1xf32>
    %233 = vector.shape_cast %232 : vector<1x8x1xf32> to vector<8x1xf32>
    %234 = vector.broadcast %233 : vector<8x1xf32> to vector<8x256xf32>
    %235 = vector.broadcast %231 : vector<1x256xf32> to vector<8x256xf32>
    %236 = arith.mulf %234, %235 : vector<8x256xf32>
    %237 = arith.addf %230, %236 : vector<8x256xf32>
    %c0_158 = arith.constant 0 : index
    %c3_159 = arith.constant 3 : index
    %238 = vector.load %arg46[%c0_158, %c3_159] : memref<16x384xf32, #tpu.memory_space<vmem>>, vector<1x256xf32>
    %239 = vector.extract_strided_slice %217 {offsets = [3, 0, 0], sizes = [1, 8, 1], strides = [1, 1, 1]} : vector<5x8x1xf32> to vector<1x8x1xf32>
    %240 = vector.shape_cast %239 : vector<1x8x1xf32> to vector<8x1xf32>
    %241 = vector.broadcast %240 : vector<8x1xf32> to vector<8x256xf32>
    %242 = vector.broadcast %238 : vector<1x256xf32> to vector<8x256xf32>
    %243 = arith.mulf %241, %242 : vector<8x256xf32>
    %244 = arith.addf %237, %243 : vector<8x256xf32>
    %c0_160 = arith.constant 0 : index
    %c4_161 = arith.constant 4 : index
    %245 = vector.load %arg46[%c0_160, %c4_161] : memref<16x384xf32, #tpu.memory_space<vmem>>, vector<1x256xf32>
    %246 = vector.extract_strided_slice %217 {offsets = [4, 0, 0], sizes = [1, 8, 1], strides = [1, 1, 1]} : vector<5x8x1xf32> to vector<1x8x1xf32>
    %247 = vector.shape_cast %246 : vector<1x8x1xf32> to vector<8x1xf32>
    %248 = vector.broadcast %247 : vector<8x1xf32> to vector<8x256xf32>
    %249 = vector.broadcast %245 : vector<1x256xf32> to vector<8x256xf32>
    %250 = arith.mulf %248, %249 : vector<8x256xf32>
    %251 = arith.addf %244, %250 : vector<8x256xf32>
    %c0_162 = arith.constant 0 : index
    %c0_163 = arith.constant 0 : index
    %252 = vector.load %arg18[%c0_162, %c0_163] : memref<8x1xf32, #tpu.memory_space<vmem>>, vector<8x1xf32>
    %253 = vector.broadcast %252 : vector<8x1xf32> to vector<8x256xf32>
    %254 = arith.addf %251, %253 : vector<8x256xf32>
    %cst_164 = arith.constant 0.000000e+00 : f32
    %255 = vector.broadcast %cst_164 : f32 to vector<8x256xf32>
    %256 = arith.cmpf oge, %254, %255 : vector<8x256xf32>
    %cst_165 = arith.constant 1.000000e-01 : f32
    %257 = vector.broadcast %cst_165 : f32 to vector<8x256xf32>
    %258 = arith.mulf %257, %254 : vector<8x256xf32>
    %259 = arith.select %256, %254, %258 : vector<8x256xi1>, vector<8x256xf32>
    %c0_166 = arith.constant 0 : index
    %c0_167 = arith.constant 0 : index
    %c0_168 = arith.constant 0 : index
    %260 = vector.load %arg38[%c0_166, %c0_167, %c0_168] : memref<1x8x256xf32, #tpu.memory_space<vmem>>, vector<1x8x256xf32>
    %261 = vector.shape_cast %260 : vector<1x8x256xf32> to vector<8x256xf32>
    %262 = vector.shape_cast %259 : vector<8x256xf32> to vector<1x8x256xf32>
    tpu.vector_store %arg38[%c0_166, %c0_167, %c0_168], %262 {strides = array<i32>} : memref<1x8x256xf32, #tpu.memory_space<vmem>>, vector<1x8x256xf32>,
    %263 = vector.extract_strided_slice %259 {offsets = [0, 0], sizes = [8, 129], strides = [1, 1]} : vector<8x256xf32> to vector<8x129xf32>
    %cst_169 = arith.constant 0.000000e+00 : f32
    %264 = vector.broadcast %cst_169 : f32 to vector<8x3xf32>
    %c0_170 = arith.constant 0 : index
    %c0_171 = arith.constant 0 : index
    %265 = vector.load %arg46[%c0_170, %c0_171] : memref<16x384xf32, #tpu.memory_space<vmem>>, vector<8x3xf32>
    tpu.vector_store %arg46[%c0_170, %c0_171], %264 {strides = array<i32>} : memref<16x384xf32, #tpu.memory_space<vmem>>, vector<8x3xf32>,
    %c0_172 = arith.constant 0 : index
    %c3_173 = arith.constant 3 : index
    %266 = vector.load %arg46[%c0_172, %c3_173] : memref<16x384xf32, #tpu.memory_space<vmem>>, vector<8x129xf32>
    tpu.vector_store %arg46[%c0_172, %c3_173], %263 {strides = array<i32>} : memref<16x384xf32, #tpu.memory_space<vmem>>, vector<8x129xf32>,
    %cst_174 = arith.constant 0.000000e+00 : f32
    %267 = vector.broadcast %cst_174 : f32 to vector<8x3xf32>
    %c0_175 = arith.constant 0 : index
    %c132 = arith.constant 132 : index
    %268 = vector.load %arg46[%c0_175, %c132] : memref<16x384xf32, #tpu.memory_space<vmem>>, vector<8x3xf32>
    tpu.vector_store %arg46[%c0_175, %c132], %267 {strides = array<i32>} : memref<16x384xf32, #tpu.memory_space<vmem>>, vector<8x3xf32>,
    %c0_176 = arith.constant 0 : index
    %c0_177 = arith.constant 0 : index
    %c0_178 = arith.constant 0 : index
    %269 = vector.load %arg7[%c0_176, %c0_177, %c0_178] : memref<7x16x8xbf16, #tpu.memory_space<vmem>>, vector<7x16x8xbf16>
    %c0_179 = arith.constant 0 : index
    %c0_180 = arith.constant 0 : index
    %270 = vector.load %arg46[%c0_179, %c0_180] : memref<16x384xf32, #tpu.memory_space<vmem>>, vector<8x129xf32>
    %271 = arith.truncf %270 : vector<8x129xf32> to vector<8x129xbf16>
    %272 = vector.extract_strided_slice %269 {offsets = [0, 0, 0], sizes = [1, 16, 8], strides = [1, 1, 1]} : vector<7x16x8xbf16> to vector<1x16x8xbf16>
    %273 = vector.shape_cast %272 : vector<1x16x8xbf16> to vector<16x8xbf16>
    %cst_181 = arith.constant dense<0.000000e+00> : vector<16x129xf32>
    %274 = tpu.matmul %273, %271, %cst_181 {dimension_numbers = #tpu.dot_dimension_numbers<[1], [0], [0], [1], [0, 0, 1, 1], [], []>} : vector<16x8xbf16>, vector<8x129xbf16>, vector<16x129xf32> -> vector<16x129xf32>
    %c0_182 = arith.constant 0 : index
    %c1_183 = arith.constant 1 : index
    %275 = vector.load %arg46[%c0_182, %c1_183] : memref<16x384xf32, #tpu.memory_space<vmem>>, vector<8x129xf32>
    %276 = arith.truncf %275 : vector<8x129xf32> to vector<8x129xbf16>
    %277 = vector.extract_strided_slice %269 {offsets = [1, 0, 0], sizes = [1, 16, 8], strides = [1, 1, 1]} : vector<7x16x8xbf16> to vector<1x16x8xbf16>
    %278 = vector.shape_cast %277 : vector<1x16x8xbf16> to vector<16x8xbf16>
    %cst_184 = arith.constant dense<0.000000e+00> : vector<16x129xf32>
    %279 = tpu.matmul %278, %276, %cst_184 {dimension_numbers = #tpu.dot_dimension_numbers<[1], [0], [0], [1], [0, 0, 1, 1], [], []>} : vector<16x8xbf16>, vector<8x129xbf16>, vector<16x129xf32> -> vector<16x129xf32>
    %280 = arith.addf %274, %279 : vector<16x129xf32>
    %c0_185 = arith.constant 0 : index
    %c2_186 = arith.constant 2 : index
    %281 = vector.load %arg46[%c0_185, %c2_186] : memref<16x384xf32, #tpu.memory_space<vmem>>, vector<8x129xf32>
    %282 = arith.truncf %281 : vector<8x129xf32> to vector<8x129xbf16>
    %283 = vector.extract_strided_slice %269 {offsets = [2, 0, 0], sizes = [1, 16, 8], strides = [1, 1, 1]} : vector<7x16x8xbf16> to vector<1x16x8xbf16>
    %284 = vector.shape_cast %283 : vector<1x16x8xbf16> to vector<16x8xbf16>
    %cst_187 = arith.constant dense<0.000000e+00> : vector<16x129xf32>
    %285 = tpu.matmul %284, %282, %cst_187 {dimension_numbers = #tpu.dot_dimension_numbers<[1], [0], [0], [1], [0, 0, 1, 1], [], []>} : vector<16x8xbf16>, vector<8x129xbf16>, vector<16x129xf32> -> vector<16x129xf32>
    %286 = arith.addf %280, %285 : vector<16x129xf32>
    %c0_188 = arith.constant 0 : index
    %c3_189 = arith.constant 3 : index
    %287 = vector.load %arg46[%c0_188, %c3_189] : memref<16x384xf32, #tpu.memory_space<vmem>>, vector<8x129xf32>
    %288 = arith.truncf %287 : vector<8x129xf32> to vector<8x129xbf16>
    %289 = vector.extract_strided_slice %269 {offsets = [3, 0, 0], sizes = [1, 16, 8], strides = [1, 1, 1]} : vector<7x16x8xbf16> to vector<1x16x8xbf16>
    %290 = vector.shape_cast %289 : vector<1x16x8xbf16> to vector<16x8xbf16>
    %cst_190 = arith.constant dense<0.000000e+00> : vector<16x129xf32>
    %291 = tpu.matmul %290, %288, %cst_190 {dimension_numbers = #tpu.dot_dimension_numbers<[1], [0], [0], [1], [0, 0, 1, 1], [], []>} : vector<16x8xbf16>, vector<8x129xbf16>, vector<16x129xf32> -> vector<16x129xf32>
    %292 = arith.addf %286, %291 : vector<16x129xf32>
    %c0_191 = arith.constant 0 : index
    %c4_192 = arith.constant 4 : index
    %293 = vector.load %arg46[%c0_191, %c4_192] : memref<16x384xf32, #tpu.memory_space<vmem>>, vector<8x129xf32>
    %294 = arith.truncf %293 : vector<8x129xf32> to vector<8x129xbf16>
    %295 = vector.extract_strided_slice %269 {offsets = [4, 0, 0], sizes = [1, 16, 8], strides = [1, 1, 1]} : vector<7x16x8xbf16> to vector<1x16x8xbf16>
    %296 = vector.shape_cast %295 : vector<1x16x8xbf16> to vector<16x8xbf16>
    %cst_193 = arith.constant dense<0.000000e+00> : vector<16x129xf32>
    %297 = tpu.matmul %296, %294, %cst_193 {dimension_numbers = #tpu.dot_dimension_numbers<[1], [0], [0], [1], [0, 0, 1, 1], [], []>} : vector<16x8xbf16>, vector<8x129xbf16>, vector<16x129xf32> -> vector<16x129xf32>
    %298 = arith.addf %292, %297 : vector<16x129xf32>
    %c0_194 = arith.constant 0 : index
    %c5_195 = arith.constant 5 : index
    %299 = vector.load %arg46[%c0_194, %c5_195] : memref<16x384xf32, #tpu.memory_space<vmem>>, vector<8x129xf32>
    %300 = arith.truncf %299 : vector<8x129xf32> to vector<8x129xbf16>
    %301 = vector.extract_strided_slice %269 {offsets = [5, 0, 0], sizes = [1, 16, 8], strides = [1, 1, 1]} : vector<7x16x8xbf16> to vector<1x16x8xbf16>
    %302 = vector.shape_cast %301 : vector<1x16x8xbf16> to vector<16x8xbf16>
    %cst_196 = arith.constant dense<0.000000e+00> : vector<16x129xf32>
    %303 = tpu.matmul %302, %300, %cst_196 {dimension_numbers = #tpu.dot_dimension_numbers<[1], [0], [0], [1], [0, 0, 1, 1], [], []>} : vector<16x8xbf16>, vector<8x129xbf16>, vector<16x129xf32> -> vector<16x129xf32>
    %304 = arith.addf %298, %303 : vector<16x129xf32>
    %c0_197 = arith.constant 0 : index
    %c6_198 = arith.constant 6 : index
    %305 = vector.load %arg46[%c0_197, %c6_198] : memref<16x384xf32, #tpu.memory_space<vmem>>, vector<8x129xf32>
    %306 = arith.truncf %305 : vector<8x129xf32> to vector<8x129xbf16>
    %307 = vector.extract_strided_slice %269 {offsets = [6, 0, 0], sizes = [1, 16, 8], strides = [1, 1, 1]} : vector<7x16x8xbf16> to vector<1x16x8xbf16>
    %308 = vector.shape_cast %307 : vector<1x16x8xbf16> to vector<16x8xbf16>
    %cst_199 = arith.constant dense<0.000000e+00> : vector<16x129xf32>
    %309 = tpu.matmul %308, %306, %cst_199 {dimension_numbers = #tpu.dot_dimension_numbers<[1], [0], [0], [1], [0, 0, 1, 1], [], []>} : vector<16x8xbf16>, vector<8x129xbf16>, vector<16x129xf32> -> vector<16x129xf32>
    %310 = arith.addf %304, %309 : vector<16x129xf32>
    %311 = arith.truncf %310 : vector<16x129xf32> to vector<16x129xbf16>
    %c0_200 = arith.constant 0 : index
    %c0_201 = arith.constant 0 : index
    %312 = vector.load %arg29[%c0_200, %c0_201] : memref<129x128xbf16, #tpu.memory_space<vmem>>, vector<129x128xbf16>
    %cst_202 = arith.constant dense<0.000000e+00> : vector<16x128xf32>
    %313 = tpu.matmul %311, %312, %cst_202 {dimension_numbers = #tpu.dot_dimension_numbers<[1], [0], [0], [1], [0, 0, 1, 1], [], []>} : vector<16x129xbf16>, vector<129x128xbf16>, vector<16x128xf32> -> vector<16x128xf32>
    %c0_203 = arith.constant 0 : index
    %c0_204 = arith.constant 0 : index
    %314 = vector.load %arg19[%c0_203, %c0_204] : memref<16x1xf32, #tpu.memory_space<vmem>>, vector<16x1xf32>
    %315 = vector.broadcast %314 : vector<16x1xf32> to vector<16x128xf32>
    %316 = arith.addf %313, %315 : vector<16x128xf32>
    %cst_205 = arith.constant 0.000000e+00 : f32
    %317 = vector.broadcast %cst_205 : f32 to vector<16x128xf32>
    %318 = arith.cmpf oge, %316, %317 : vector<16x128xf32>
    %cst_206 = arith.constant 1.000000e-01 : f32
    %319 = vector.broadcast %cst_206 : f32 to vector<16x128xf32>
    %320 = arith.mulf %319, %316 : vector<16x128xf32>
    %321 = arith.select %318, %316, %320 : vector<16x128xi1>, vector<16x128xf32>
    %c0_207 = arith.constant 0 : index
    %c0_208 = arith.constant 0 : index
    %c0_209 = arith.constant 0 : index
    %322 = vector.load %arg39[%c0_207, %c0_208, %c0_209] : memref<1x16x128xf32, #tpu.memory_space<vmem>>, vector<1x16x128xf32>
    %323 = vector.shape_cast %322 : vector<1x16x128xf32> to vector<16x128xf32>
    %324 = vector.shape_cast %321 : vector<16x128xf32> to vector<1x16x128xf32>
    tpu.vector_store %arg39[%c0_207, %c0_208, %c0_209], %324 {strides = array<i32>} : memref<1x16x128xf32, #tpu.memory_space<vmem>>, vector<1x16x128xf32>,
    %325 = vector.extract_strided_slice %321 {offsets = [0, 0], sizes = [16, 65], strides = [1, 1]} : vector<16x128xf32> to vector<16x65xf32>
    %cst_210 = arith.constant 0.000000e+00 : f32
    %326 = vector.broadcast %cst_210 : f32 to vector<16x2xf32>
    %c0_211 = arith.constant 0 : index
    %c0_212 = arith.constant 0 : index
    %327 = vector.load %arg46[%c0_211, %c0_212] : memref<16x384xf32, #tpu.memory_space<vmem>>, vector<16x2xf32>
    tpu.vector_store %arg46[%c0_211, %c0_212], %326 {strides = array<i32>} : memref<16x384xf32, #tpu.memory_space<vmem>>, vector<16x2xf32>,
    %c0_213 = arith.constant 0 : index
    %c2_214 = arith.constant 2 : index
    %328 = vector.load %arg46[%c0_213, %c2_214] : memref<16x384xf32, #tpu.memory_space<vmem>>, vector<16x65xf32>
    tpu.vector_store %arg46[%c0_213, %c2_214], %325 {strides = array<i32>} : memref<16x384xf32, #tpu.memory_space<vmem>>, vector<16x65xf32>,
    %cst_215 = arith.constant 0.000000e+00 : f32
    %329 = vector.broadcast %cst_215 : f32 to vector<16x2xf32>
    %c0_216 = arith.constant 0 : index
    %c67 = arith.constant 67 : index
    %330 = vector.load %arg46[%c0_216, %c67] : memref<16x384xf32, #tpu.memory_space<vmem>>, vector<16x2xf32>
    tpu.vector_store %arg46[%c0_216, %c67], %329 {strides = array<i32>} : memref<16x384xf32, #tpu.memory_space<vmem>>, vector<16x2xf32>,
    %c0_217 = arith.constant 0 : index
    %c0_218 = arith.constant 0 : index
    %c0_219 = arith.constant 0 : index
    %331 = vector.load %arg8[%c0_217, %c0_218, %c0_219] : memref<5x16x16xbf16, #tpu.memory_space<vmem>>, vector<5x16x16xbf16>
    %c0_220 = arith.constant 0 : index
    %c0_221 = arith.constant 0 : index
    %332 = vector.load %arg46[%c0_220, %c0_221] : memref<16x384xf32, #tpu.memory_space<vmem>>, vector<16x65xf32>
    %333 = arith.truncf %332 : vector<16x65xf32> to vector<16x65xbf16>
    %334 = vector.extract_strided_slice %331 {offsets = [0, 0, 0], sizes = [1, 16, 16], strides = [1, 1, 1]} : vector<5x16x16xbf16> to vector<1x16x16xbf16>
    %335 = vector.shape_cast %334 : vector<1x16x16xbf16> to vector<16x16xbf16>
    %cst_222 = arith.constant dense<0.000000e+00> : vector<16x65xf32>
    %336 = tpu.matmul %335, %333, %cst_222 {dimension_numbers = #tpu.dot_dimension_numbers<[1], [0], [0], [1], [0, 0, 1, 1], [], []>} : vector<16x16xbf16>, vector<16x65xbf16>, vector<16x65xf32> -> vector<16x65xf32>
    %c0_223 = arith.constant 0 : index
    %c1_224 = arith.constant 1 : index
    %337 = vector.load %arg46[%c0_223, %c1_224] : memref<16x384xf32, #tpu.memory_space<vmem>>, vector<16x65xf32>
    %338 = arith.truncf %337 : vector<16x65xf32> to vector<16x65xbf16>
    %339 = vector.extract_strided_slice %331 {offsets = [1, 0, 0], sizes = [1, 16, 16], strides = [1, 1, 1]} : vector<5x16x16xbf16> to vector<1x16x16xbf16>
    %340 = vector.shape_cast %339 : vector<1x16x16xbf16> to vector<16x16xbf16>
    %cst_225 = arith.constant dense<0.000000e+00> : vector<16x65xf32>
    %341 = tpu.matmul %340, %338, %cst_225 {dimension_numbers = #tpu.dot_dimension_numbers<[1], [0], [0], [1], [0, 0, 1, 1], [], []>} : vector<16x16xbf16>, vector<16x65xbf16>, vector<16x65xf32> -> vector<16x65xf32>
    %342 = arith.addf %336, %341 : vector<16x65xf32>
    %c0_226 = arith.constant 0 : index
    %c2_227 = arith.constant 2 : index
    %343 = vector.load %arg46[%c0_226, %c2_227] : memref<16x384xf32, #tpu.memory_space<vmem>>, vector<16x65xf32>
    %344 = arith.truncf %343 : vector<16x65xf32> to vector<16x65xbf16>
    %345 = vector.extract_strided_slice %331 {offsets = [2, 0, 0], sizes = [1, 16, 16], strides = [1, 1, 1]} : vector<5x16x16xbf16> to vector<1x16x16xbf16>
    %346 = vector.shape_cast %345 : vector<1x16x16xbf16> to vector<16x16xbf16>
    %cst_228 = arith.constant dense<0.000000e+00> : vector<16x65xf32>
    %347 = tpu.matmul %346, %344, %cst_228 {dimension_numbers = #tpu.dot_dimension_numbers<[1], [0], [0], [1], [0, 0, 1, 1], [], []>} : vector<16x16xbf16>, vector<16x65xbf16>, vector<16x65xf32> -> vector<16x65xf32>
    %348 = arith.addf %342, %347 : vector<16x65xf32>
    %c0_229 = arith.constant 0 : index
    %c3_230 = arith.constant 3 : index
    %349 = vector.load %arg46[%c0_229, %c3_230] : memref<16x384xf32, #tpu.memory_space<vmem>>, vector<16x65xf32>
    %350 = arith.truncf %349 : vector<16x65xf32> to vector<16x65xbf16>
    %351 = vector.extract_strided_slice %331 {offsets = [3, 0, 0], sizes = [1, 16, 16], strides = [1, 1, 1]} : vector<5x16x16xbf16> to vector<1x16x16xbf16>
    %352 = vector.shape_cast %351 : vector<1x16x16xbf16> to vector<16x16xbf16>
    %cst_231 = arith.constant dense<0.000000e+00> : vector<16x65xf32>
    %353 = tpu.matmul %352, %350, %cst_231 {dimension_numbers = #tpu.dot_dimension_numbers<[1], [0], [0], [1], [0, 0, 1, 1], [], []>} : vector<16x16xbf16>, vector<16x65xbf16>, vector<16x65xf32> -> vector<16x65xf32>
    %354 = arith.addf %348, %353 : vector<16x65xf32>
    %c0_232 = arith.constant 0 : index
    %c4_233 = arith.constant 4 : index
    %355 = vector.load %arg46[%c0_232, %c4_233] : memref<16x384xf32, #tpu.memory_space<vmem>>, vector<16x65xf32>
    %356 = arith.truncf %355 : vector<16x65xf32> to vector<16x65xbf16>
    %357 = vector.extract_strided_slice %331 {offsets = [4, 0, 0], sizes = [1, 16, 16], strides = [1, 1, 1]} : vector<5x16x16xbf16> to vector<1x16x16xbf16>
    %358 = vector.shape_cast %357 : vector<1x16x16xbf16> to vector<16x16xbf16>
    %cst_234 = arith.constant dense<0.000000e+00> : vector<16x65xf32>
    %359 = tpu.matmul %358, %356, %cst_234 {dimension_numbers = #tpu.dot_dimension_numbers<[1], [0], [0], [1], [0, 0, 1, 1], [], []>} : vector<16x16xbf16>, vector<16x65xbf16>, vector<16x65xf32> -> vector<16x65xf32>
    %360 = arith.addf %354, %359 : vector<16x65xf32>
    %361 = arith.truncf %360 : vector<16x65xf32> to vector<16x65xbf16>
    %c0_235 = arith.constant 0 : index
    %c0_236 = arith.constant 0 : index
    %362 = vector.load %arg30[%c0_235, %c0_236] : memref<65x128xbf16, #tpu.memory_space<vmem>>, vector<65x128xbf16>
    %cst_237 = arith.constant dense<0.000000e+00> : vector<16x128xf32>
    %363 = tpu.matmul %361, %362, %cst_237 {dimension_numbers = #tpu.dot_dimension_numbers<[1], [0], [0], [1], [0, 0, 1, 1], [], []>} : vector<16x65xbf16>, vector<65x128xbf16>, vector<16x128xf32> -> vector<16x128xf32>
    %c0_238 = arith.constant 0 : index
    %c0_239 = arith.constant 0 : index
    %364 = vector.load %arg20[%c0_238, %c0_239] : memref<16x1xf32, #tpu.memory_space<vmem>>, vector<16x1xf32>
    %365 = vector.broadcast %364 : vector<16x1xf32> to vector<16x128xf32>
    %366 = arith.addf %363, %365 : vector<16x128xf32>
    %cst_240 = arith.constant 0.000000e+00 : f32
    %367 = vector.broadcast %cst_240 : f32 to vector<16x128xf32>
    %368 = arith.cmpf oge, %366, %367 : vector<16x128xf32>
    %cst_241 = arith.constant 1.000000e-01 : f32
    %369 = vector.broadcast %cst_241 : f32 to vector<16x128xf32>
    %370 = arith.mulf %369, %366 : vector<16x128xf32>
    %371 = arith.select %368, %366, %370 : vector<16x128xi1>, vector<16x128xf32>
    %c0_242 = arith.constant 0 : index
    %c0_243 = arith.constant 0 : index
    %c0_244 = arith.constant 0 : index
    %372 = vector.load %arg40[%c0_242, %c0_243, %c0_244] : memref<1x16x128xf32, #tpu.memory_space<vmem>>, vector<1x16x128xf32>
    %373 = vector.shape_cast %372 : vector<1x16x128xf32> to vector<16x128xf32>
    %374 = vector.shape_cast %371 : vector<16x128xf32> to vector<1x16x128xf32>
    tpu.vector_store %arg40[%c0_242, %c0_243, %c0_244], %374 {strides = array<i32>} : memref<1x16x128xf32, #tpu.memory_space<vmem>>, vector<1x16x128xf32>,
    %375 = vector.extract_strided_slice %371 {offsets = [0, 0], sizes = [16, 33], strides = [1, 1]} : vector<16x128xf32> to vector<16x33xf32>
    %cst_245 = arith.constant 0.000000e+00 : f32
    %376 = vector.broadcast %cst_245 : f32 to vector<16x1xf32>
    %c0_246 = arith.constant 0 : index
    %c0_247 = arith.constant 0 : index
    %377 = vector.load %arg46[%c0_246, %c0_247] : memref<16x384xf32, #tpu.memory_space<vmem>>, vector<16x1xf32>
    tpu.vector_store %arg46[%c0_246, %c0_247], %376 {strides = array<i32>} : memref<16x384xf32, #tpu.memory_space<vmem>>, vector<16x1xf32>,
    %c0_248 = arith.constant 0 : index
    %c1_249 = arith.constant 1 : index
    %378 = vector.load %arg46[%c0_248, %c1_249] : memref<16x384xf32, #tpu.memory_space<vmem>>, vector<16x33xf32>
    tpu.vector_store %arg46[%c0_248, %c1_249], %375 {strides = array<i32>} : memref<16x384xf32, #tpu.memory_space<vmem>>, vector<16x33xf32>,
    %cst_250 = arith.constant 0.000000e+00 : f32
    %379 = vector.broadcast %cst_250 : f32 to vector<16x96xf32>
    %c0_251 = arith.constant 0 : index
    %c34 = arith.constant 34 : index
    %380 = vector.load %arg46[%c0_251, %c34] : memref<16x384xf32, #tpu.memory_space<vmem>>, vector<16x96xf32>
    tpu.vector_store %arg46[%c0_251, %c34], %379 {strides = array<i32>} : memref<16x384xf32, #tpu.memory_space<vmem>>, vector<16x96xf32>,
    %c0_252 = arith.constant 0 : index
    %c0_253 = arith.constant 0 : index
    %c0_254 = arith.constant 0 : index
    %381 = vector.load %arg9[%c0_252, %c0_253, %c0_254] : memref<3x1x16xbf16, #tpu.memory_space<vmem>>, vector<3x1x16xbf16>
    %c0_255 = arith.constant 0 : index
    %c0_256 = arith.constant 0 : index
    %382 = vector.load %arg46[%c0_255, %c0_256] : memref<16x384xf32, #tpu.memory_space<vmem>>, vector<16x128xf32>
    %383 = arith.truncf %382 : vector<16x128xf32> to vector<16x128xbf16>
    %384 = vector.extract_strided_slice %381 {offsets = [0, 0, 0], sizes = [1, 1, 16], strides = [1, 1, 1]} : vector<3x1x16xbf16> to vector<1x1x16xbf16>
    %385 = vector.shape_cast %384 : vector<1x1x16xbf16> to vector<1x16xbf16>
    %cst_257 = arith.constant dense<0.000000e+00> : vector<1x128xf32>
    %386 = tpu.matmul %385, %383, %cst_257 {dimension_numbers = #tpu.dot_dimension_numbers<[1], [0], [0], [1], [0, 0, 1, 1], [], []>} : vector<1x16xbf16>, vector<16x128xbf16>, vector<1x128xf32> -> vector<1x128xf32>
    %c0_258 = arith.constant 0 : index
    %c1_259 = arith.constant 1 : index
    %387 = vector.load %arg46[%c0_258, %c1_259] : memref<16x384xf32, #tpu.memory_space<vmem>>, vector<16x128xf32>
    %388 = arith.truncf %387 : vector<16x128xf32> to vector<16x128xbf16>
    %389 = vector.extract_strided_slice %381 {offsets = [1, 0, 0], sizes = [1, 1, 16], strides = [1, 1, 1]} : vector<3x1x16xbf16> to vector<1x1x16xbf16>
    %390 = vector.shape_cast %389 : vector<1x1x16xbf16> to vector<1x16xbf16>
    %cst_260 = arith.constant dense<0.000000e+00> : vector<1x128xf32>
    %391 = tpu.matmul %390, %388, %cst_260 {dimension_numbers = #tpu.dot_dimension_numbers<[1], [0], [0], [1], [0, 0, 1, 1], [], []>} : vector<1x16xbf16>, vector<16x128xbf16>, vector<1x128xf32> -> vector<1x128xf32>
    %392 = arith.addf %386, %391 : vector<1x128xf32>
    %c0_261 = arith.constant 0 : index
    %c2_262 = arith.constant 2 : index
    %393 = vector.load %arg46[%c0_261, %c2_262] : memref<16x384xf32, #tpu.memory_space<vmem>>, vector<16x128xf32>
    %394 = arith.truncf %393 : vector<16x128xf32> to vector<16x128xbf16>
    %395 = vector.extract_strided_slice %381 {offsets = [2, 0, 0], sizes = [1, 1, 16], strides = [1, 1, 1]} : vector<3x1x16xbf16> to vector<1x1x16xbf16>
    %396 = vector.shape_cast %395 : vector<1x1x16xbf16> to vector<1x16xbf16>
    %cst_263 = arith.constant dense<0.000000e+00> : vector<1x128xf32>
    %397 = tpu.matmul %396, %394, %cst_263 {dimension_numbers = #tpu.dot_dimension_numbers<[1], [0], [0], [1], [0, 0, 1, 1], [], []>} : vector<1x16xbf16>, vector<16x128xbf16>, vector<1x128xf32> -> vector<1x128xf32>
    %398 = arith.addf %392, %397 : vector<1x128xf32>
    %c0_264 = arith.constant 0 : index
    %c0_265 = arith.constant 0 : index
    %399 = vector.load %arg21[%c0_264, %c0_265] : memref<1x1xf32, #tpu.memory_space<vmem>>, vector<1x1xf32>
    %400 = vector.broadcast %399 : vector<1x1xf32> to vector<1x128xf32>
    %401 = arith.addf %398, %400 : vector<1x128xf32>
    %c0_266 = arith.constant 0 : index
    %c0_267 = arith.constant 0 : index
    %c0_268 = arith.constant 0 : index
    %402 = vector.load %arg41[%c0_266, %c0_267, %c0_268] : memref<1x1x128xf32, #tpu.memory_space<vmem>>, vector<1x1x128xf32>
    %403 = vector.shape_cast %402 : vector<1x1x128xf32> to vector<1x128xf32>
    %404 = vector.shape_cast %401 : vector<1x128xf32> to vector<1x1x128xf32>
    tpu.vector_store %arg41[%c0_266, %c0_267, %c0_268], %404 {strides = array<i32>} : memref<1x1x128xf32, #tpu.memory_space<vmem>>, vector<1x1x128xf32>,
    %cst_269 = arith.constant 0.000000e+00 : f32
    %405 = vector.broadcast %cst_269 : f32 to vector<1x2xf32>
    %c0_270 = arith.constant 0 : index
    %c0_271 = arith.constant 0 : index
    %406 = vector.load %arg46[%c0_270, %c0_271] : memref<16x384xf32, #tpu.memory_space<vmem>>, vector<1x2xf32>
    tpu.vector_store %arg46[%c0_270, %c0_271], %405 {strides = array<i32>} : memref<16x384xf32, #tpu.memory_space<vmem>>, vector<1x2xf32>,
    %c0_272 = arith.constant 0 : index
    %c2_273 = arith.constant 2 : index
    %407 = vector.load %arg46[%c0_272, %c2_273] : memref<16x384xf32, #tpu.memory_space<vmem>>, vector<1x129xf32>
    tpu.vector_store %arg46[%c0_272, %c2_273], %210 {strides = array<i32>} : memref<16x384xf32, #tpu.memory_space<vmem>>, vector<1x129xf32>,
    %cst_274 = arith.constant 0.000000e+00 : f32
    %408 = vector.broadcast %cst_274 : f32 to vector<1x2xf32>
    %c0_275 = arith.constant 0 : index
    %c131_276 = arith.constant 131 : index
    %409 = vector.load %arg46[%c0_275, %c131_276] : memref<16x384xf32, #tpu.memory_space<vmem>>, vector<1x2xf32>
    tpu.vector_store %arg46[%c0_275, %c131_276], %408 {strides = array<i32>} : memref<16x384xf32, #tpu.memory_space<vmem>>, vector<1x2xf32>,
    %c0_277 = arith.constant 0 : index
    %c0_278 = arith.constant 0 : index
    %410 = vector.load %arg46[%c0_277, %c0_278] : memref<16x384xf32, #tpu.memory_space<vmem>>, vector<1x130xf32>
    %c0_279 = arith.constant 0 : index
    %c1_280 = arith.constant 1 : index
    %411 = vector.load %arg46[%c0_279, %c1_280] : memref<16x384xf32, #tpu.memory_space<vmem>>, vector<1x130xf32>
    %412 = arith.addf %410, %411 : vector<1x130xf32>
    %c0_281 = arith.constant 0 : index
    %c2_282 = arith.constant 2 : index
    %413 = vector.load %arg46[%c0_281, %c2_282] : memref<16x384xf32, #tpu.memory_space<vmem>>, vector<1x130xf32>
    %414 = arith.addf %412, %413 : vector<1x130xf32>
    %c0_283 = arith.constant 0 : index
    %c3_284 = arith.constant 3 : index
    %415 = vector.load %arg46[%c0_283, %c3_284] : memref<16x384xf32, #tpu.memory_space<vmem>>, vector<1x130xf32>
    %416 = arith.addf %414, %415 : vector<1x130xf32>
    %cst_285 = arith.constant 2.500000e-01 : f32
    %417 = vector.broadcast %cst_285 : f32 to vector<1x130xf32>
    %418 = arith.mulf %416, %417 : vector<1x130xf32>
    %419 = arith.truncf %418 : vector<1x130xf32> to vector<1x130xbf16>
    %c0_286 = arith.constant 0 : index
    %c0_287 = arith.constant 0 : index
    %420 = vector.load %arg31[%c0_286, %c0_287] : memref<130x65xbf16, #tpu.memory_space<vmem>>, vector<130x65xbf16>
    %cst_288 = arith.constant dense<0.000000e+00> : vector<1x65xf32>
    %421 = tpu.matmul %419, %420, %cst_288 {dimension_numbers = #tpu.dot_dimension_numbers<[1], [0], [0], [1], [0, 0, 1, 1], [], []>} : vector<1x130xbf16>, vector<130x65xbf16>, vector<1x65xf32> -> vector<1x65xf32>
    %cst_289 = arith.constant 0.000000e+00 : f32
    %422 = vector.broadcast %cst_289 : f32 to vector<1x2xf32>
    %c0_290 = arith.constant 0 : index
    %c0_291 = arith.constant 0 : index
    %423 = vector.load %arg46[%c0_290, %c0_291] : memref<16x384xf32, #tpu.memory_space<vmem>>, vector<1x2xf32>
    tpu.vector_store %arg46[%c0_290, %c0_291], %422 {strides = array<i32>} : memref<16x384xf32, #tpu.memory_space<vmem>>, vector<1x2xf32>,
    %c0_292 = arith.constant 0 : index
    %c2_293 = arith.constant 2 : index
    %424 = vector.load %arg46[%c0_292, %c2_293] : memref<16x384xf32, #tpu.memory_space<vmem>>, vector<1x65xf32>
    tpu.vector_store %arg46[%c0_292, %c2_293], %421 {strides = array<i32>} : memref<16x384xf32, #tpu.memory_space<vmem>>, vector<1x65xf32>,
    %cst_294 = arith.constant 0.000000e+00 : f32
    %425 = vector.broadcast %cst_294 : f32 to vector<1x65xf32>
    %c0_295 = arith.constant 0 : index
    %c67_296 = arith.constant 67 : index
    %426 = vector.load %arg46[%c0_295, %c67_296] : memref<16x384xf32, #tpu.memory_space<vmem>>, vector<1x65xf32>
    tpu.vector_store %arg46[%c0_295, %c67_296], %425 {strides = array<i32>} : memref<16x384xf32, #tpu.memory_space<vmem>>, vector<1x65xf32>,
    %c0_297 = arith.constant 0 : index
    %c0_298 = arith.constant 0 : index
    %c0_299 = arith.constant 0 : index
    %427 = vector.load %arg10[%c0_297, %c0_298, %c0_299] : memref<5x8x1xbf16, #tpu.memory_space<vmem>>, vector<5x8x1xbf16>
    %428 = arith.extf %427 : vector<5x8x1xbf16> to vector<5x8x1xf32>
    %c0_300 = arith.constant 0 : index
    %c0_301 = arith.constant 0 : index
    %429 = vector.load %arg46[%c0_300, %c0_301] : memref<16x384xf32, #tpu.memory_space<vmem>>, vector<1x128xf32>
    %430 = vector.extract_strided_slice %428 {offsets = [0, 0, 0], sizes = [1, 8, 1], strides = [1, 1, 1]} : vector<5x8x1xf32> to vector<1x8x1xf32>
    %431 = vector.shape_cast %430 : vector<1x8x1xf32> to vector<8x1xf32>
    %432 = vector.broadcast %431 : vector<8x1xf32> to vector<8x128xf32>
    %433 = vector.broadcast %429 : vector<1x128xf32> to vector<8x128xf32>
    %434 = arith.mulf %432, %433 : vector<8x128xf32>
    %c0_302 = arith.constant 0 : index
    %c1_303 = arith.constant 1 : index
    %435 = vector.load %arg46[%c0_302, %c1_303] : memref<16x384xf32, #tpu.memory_space<vmem>>, vector<1x128xf32>
    %436 = vector.extract_strided_slice %428 {offsets = [1, 0, 0], sizes = [1, 8, 1], strides = [1, 1, 1]} : vector<5x8x1xf32> to vector<1x8x1xf32>
    %437 = vector.shape_cast %436 : vector<1x8x1xf32> to vector<8x1xf32>
    %438 = vector.broadcast %437 : vector<8x1xf32> to vector<8x128xf32>
    %439 = vector.broadcast %435 : vector<1x128xf32> to vector<8x128xf32>
    %440 = arith.mulf %438, %439 : vector<8x128xf32>
    %441 = arith.addf %434, %440 : vector<8x128xf32>
    %c0_304 = arith.constant 0 : index
    %c2_305 = arith.constant 2 : index
    %442 = vector.load %arg46[%c0_304, %c2_305] : memref<16x384xf32, #tpu.memory_space<vmem>>, vector<1x128xf32>
    %443 = vector.extract_strided_slice %428 {offsets = [2, 0, 0], sizes = [1, 8, 1], strides = [1, 1, 1]} : vector<5x8x1xf32> to vector<1x8x1xf32>
    %444 = vector.shape_cast %443 : vector<1x8x1xf32> to vector<8x1xf32>
    %445 = vector.broadcast %444 : vector<8x1xf32> to vector<8x128xf32>
    %446 = vector.broadcast %442 : vector<1x128xf32> to vector<8x128xf32>
    %447 = arith.mulf %445, %446 : vector<8x128xf32>
    %448 = arith.addf %441, %447 : vector<8x128xf32>
    %c0_306 = arith.constant 0 : index
    %c3_307 = arith.constant 3 : index
    %449 = vector.load %arg46[%c0_306, %c3_307] : memref<16x384xf32, #tpu.memory_space<vmem>>, vector<1x128xf32>
    %450 = vector.extract_strided_slice %428 {offsets = [3, 0, 0], sizes = [1, 8, 1], strides = [1, 1, 1]} : vector<5x8x1xf32> to vector<1x8x1xf32>
    %451 = vector.shape_cast %450 : vector<1x8x1xf32> to vector<8x1xf32>
    %452 = vector.broadcast %451 : vector<8x1xf32> to vector<8x128xf32>
    %453 = vector.broadcast %449 : vector<1x128xf32> to vector<8x128xf32>
    %454 = arith.mulf %452, %453 : vector<8x128xf32>
    %455 = arith.addf %448, %454 : vector<8x128xf32>
    %c0_308 = arith.constant 0 : index
    %c4_309 = arith.constant 4 : index
    %456 = vector.load %arg46[%c0_308, %c4_309] : memref<16x384xf32, #tpu.memory_space<vmem>>, vector<1x128xf32>
    %457 = vector.extract_strided_slice %428 {offsets = [4, 0, 0], sizes = [1, 8, 1], strides = [1, 1, 1]} : vector<5x8x1xf32> to vector<1x8x1xf32>
    %458 = vector.shape_cast %457 : vector<1x8x1xf32> to vector<8x1xf32>
    %459 = vector.broadcast %458 : vector<8x1xf32> to vector<8x128xf32>
    %460 = vector.broadcast %456 : vector<1x128xf32> to vector<8x128xf32>
    %461 = arith.mulf %459, %460 : vector<8x128xf32>
    %462 = arith.addf %455, %461 : vector<8x128xf32>
    %c0_310 = arith.constant 0 : index
    %c0_311 = arith.constant 0 : index
    %463 = vector.load %arg22[%c0_310, %c0_311] : memref<8x1xf32, #tpu.memory_space<vmem>>, vector<8x1xf32>
    %464 = vector.broadcast %463 : vector<8x1xf32> to vector<8x128xf32>
    %465 = arith.addf %462, %464 : vector<8x128xf32>
    %cst_312 = arith.constant 0.000000e+00 : f32
    %466 = vector.broadcast %cst_312 : f32 to vector<8x128xf32>
    %467 = arith.cmpf oge, %465, %466 : vector<8x128xf32>
    %cst_313 = arith.constant 1.000000e-01 : f32
    %468 = vector.broadcast %cst_313 : f32 to vector<8x128xf32>
    %469 = arith.mulf %468, %465 : vector<8x128xf32>
    %470 = arith.select %467, %465, %469 : vector<8x128xi1>, vector<8x128xf32>
    %c0_314 = arith.constant 0 : index
    %c0_315 = arith.constant 0 : index
    %c0_316 = arith.constant 0 : index
    %471 = vector.load %arg42[%c0_314, %c0_315, %c0_316] : memref<1x8x128xf32, #tpu.memory_space<vmem>>, vector<1x8x128xf32>
    %472 = vector.shape_cast %471 : vector<1x8x128xf32> to vector<8x128xf32>
    %473 = vector.shape_cast %470 : vector<8x128xf32> to vector<1x8x128xf32>
    tpu.vector_store %arg42[%c0_314, %c0_315, %c0_316], %473 {strides = array<i32>} : memref<1x8x128xf32, #tpu.memory_space<vmem>>, vector<1x8x128xf32>,
    %474 = vector.extract_strided_slice %470 {offsets = [0, 0], sizes = [8, 65], strides = [1, 1]} : vector<8x128xf32> to vector<8x65xf32>
    %cst_317 = arith.constant 0.000000e+00 : f32
    %475 = vector.broadcast %cst_317 : f32 to vector<8x3xf32>
    %c0_318 = arith.constant 0 : index
    %c0_319 = arith.constant 0 : index
    %476 = vector.load %arg46[%c0_318, %c0_319] : memref<16x384xf32, #tpu.memory_space<vmem>>, vector<8x3xf32>
    tpu.vector_store %arg46[%c0_318, %c0_319], %475 {strides = array<i32>} : memref<16x384xf32, #tpu.memory_space<vmem>>, vector<8x3xf32>,
    %c0_320 = arith.constant 0 : index
    %c3_321 = arith.constant 3 : index
    %477 = vector.load %arg46[%c0_320, %c3_321] : memref<16x384xf32, #tpu.memory_space<vmem>>, vector<8x65xf32>
    tpu.vector_store %arg46[%c0_320, %c3_321], %474 {strides = array<i32>} : memref<16x384xf32, #tpu.memory_space<vmem>>, vector<8x65xf32>,
    %cst_322 = arith.constant 0.000000e+00 : f32
    %478 = vector.broadcast %cst_322 : f32 to vector<8x3xf32>
    %c0_323 = arith.constant 0 : index
    %c68 = arith.constant 68 : index
    %479 = vector.load %arg46[%c0_323, %c68] : memref<16x384xf32, #tpu.memory_space<vmem>>, vector<8x3xf32>
    tpu.vector_store %arg46[%c0_323, %c68], %478 {strides = array<i32>} : memref<16x384xf32, #tpu.memory_space<vmem>>, vector<8x3xf32>,
    %c0_324 = arith.constant 0 : index
    %c0_325 = arith.constant 0 : index
    %c0_326 = arith.constant 0 : index
    %480 = vector.load %arg11[%c0_324, %c0_325, %c0_326] : memref<7x16x8xbf16, #tpu.memory_space<vmem>>, vector<7x16x8xbf16>
    %c0_327 = arith.constant 0 : index
    %c0_328 = arith.constant 0 : index
    %481 = vector.load %arg46[%c0_327, %c0_328] : memref<16x384xf32, #tpu.memory_space<vmem>>, vector<8x65xf32>
    %482 = arith.truncf %481 : vector<8x65xf32> to vector<8x65xbf16>
    %483 = vector.extract_strided_slice %480 {offsets = [0, 0, 0], sizes = [1, 16, 8], strides = [1, 1, 1]} : vector<7x16x8xbf16> to vector<1x16x8xbf16>
    %484 = vector.shape_cast %483 : vector<1x16x8xbf16> to vector<16x8xbf16>
    %cst_329 = arith.constant dense<0.000000e+00> : vector<16x65xf32>
    %485 = tpu.matmul %484, %482, %cst_329 {dimension_numbers = #tpu.dot_dimension_numbers<[1], [0], [0], [1], [0, 0, 1, 1], [], []>} : vector<16x8xbf16>, vector<8x65xbf16>, vector<16x65xf32> -> vector<16x65xf32>
    %c0_330 = arith.constant 0 : index
    %c1_331 = arith.constant 1 : index
    %486 = vector.load %arg46[%c0_330, %c1_331] : memref<16x384xf32, #tpu.memory_space<vmem>>, vector<8x65xf32>
    %487 = arith.truncf %486 : vector<8x65xf32> to vector<8x65xbf16>
    %488 = vector.extract_strided_slice %480 {offsets = [1, 0, 0], sizes = [1, 16, 8], strides = [1, 1, 1]} : vector<7x16x8xbf16> to vector<1x16x8xbf16>
    %489 = vector.shape_cast %488 : vector<1x16x8xbf16> to vector<16x8xbf16>
    %cst_332 = arith.constant dense<0.000000e+00> : vector<16x65xf32>
    %490 = tpu.matmul %489, %487, %cst_332 {dimension_numbers = #tpu.dot_dimension_numbers<[1], [0], [0], [1], [0, 0, 1, 1], [], []>} : vector<16x8xbf16>, vector<8x65xbf16>, vector<16x65xf32> -> vector<16x65xf32>
    %491 = arith.addf %485, %490 : vector<16x65xf32>
    %c0_333 = arith.constant 0 : index
    %c2_334 = arith.constant 2 : index
    %492 = vector.load %arg46[%c0_333, %c2_334] : memref<16x384xf32, #tpu.memory_space<vmem>>, vector<8x65xf32>
    %493 = arith.truncf %492 : vector<8x65xf32> to vector<8x65xbf16>
    %494 = vector.extract_strided_slice %480 {offsets = [2, 0, 0], sizes = [1, 16, 8], strides = [1, 1, 1]} : vector<7x16x8xbf16> to vector<1x16x8xbf16>
    %495 = vector.shape_cast %494 : vector<1x16x8xbf16> to vector<16x8xbf16>
    %cst_335 = arith.constant dense<0.000000e+00> : vector<16x65xf32>
    %496 = tpu.matmul %495, %493, %cst_335 {dimension_numbers = #tpu.dot_dimension_numbers<[1], [0], [0], [1], [0, 0, 1, 1], [], []>} : vector<16x8xbf16>, vector<8x65xbf16>, vector<16x65xf32> -> vector<16x65xf32>
    %497 = arith.addf %491, %496 : vector<16x65xf32>
    %c0_336 = arith.constant 0 : index
    %c3_337 = arith.constant 3 : index
    %498 = vector.load %arg46[%c0_336, %c3_337] : memref<16x384xf32, #tpu.memory_space<vmem>>, vector<8x65xf32>
    %499 = arith.truncf %498 : vector<8x65xf32> to vector<8x65xbf16>
    %500 = vector.extract_strided_slice %480 {offsets = [3, 0, 0], sizes = [1, 16, 8], strides = [1, 1, 1]} : vector<7x16x8xbf16> to vector<1x16x8xbf16>
    %501 = vector.shape_cast %500 : vector<1x16x8xbf16> to vector<16x8xbf16>
    %cst_338 = arith.constant dense<0.000000e+00> : vector<16x65xf32>
    %502 = tpu.matmul %501, %499, %cst_338 {dimension_numbers = #tpu.dot_dimension_numbers<[1], [0], [0], [1], [0, 0, 1, 1], [], []>} : vector<16x8xbf16>, vector<8x65xbf16>, vector<16x65xf32> -> vector<16x65xf32>
    %503 = arith.addf %497, %502 : vector<16x65xf32>
    %c0_339 = arith.constant 0 : index
    %c4_340 = arith.constant 4 : index
    %504 = vector.load %arg46[%c0_339, %c4_340] : memref<16x384xf32, #tpu.memory_space<vmem>>, vector<8x65xf32>
    %505 = arith.truncf %504 : vector<8x65xf32> to vector<8x65xbf16>
    %506 = vector.extract_strided_slice %480 {offsets = [4, 0, 0], sizes = [1, 16, 8], strides = [1, 1, 1]} : vector<7x16x8xbf16> to vector<1x16x8xbf16>
    %507 = vector.shape_cast %506 : vector<1x16x8xbf16> to vector<16x8xbf16>
    %cst_341 = arith.constant dense<0.000000e+00> : vector<16x65xf32>
    %508 = tpu.matmul %507, %505, %cst_341 {dimension_numbers = #tpu.dot_dimension_numbers<[1], [0], [0], [1], [0, 0, 1, 1], [], []>} : vector<16x8xbf16>, vector<8x65xbf16>, vector<16x65xf32> -> vector<16x65xf32>
    %509 = arith.addf %503, %508 : vector<16x65xf32>
    %c0_342 = arith.constant 0 : index
    %c5_343 = arith.constant 5 : index
    %510 = vector.load %arg46[%c0_342, %c5_343] : memref<16x384xf32, #tpu.memory_space<vmem>>, vector<8x65xf32>
    %511 = arith.truncf %510 : vector<8x65xf32> to vector<8x65xbf16>
    %512 = vector.extract_strided_slice %480 {offsets = [5, 0, 0], sizes = [1, 16, 8], strides = [1, 1, 1]} : vector<7x16x8xbf16> to vector<1x16x8xbf16>
    %513 = vector.shape_cast %512 : vector<1x16x8xbf16> to vector<16x8xbf16>
    %cst_344 = arith.constant dense<0.000000e+00> : vector<16x65xf32>
    %514 = tpu.matmul %513, %511, %cst_344 {dimension_numbers = #tpu.dot_dimension_numbers<[1], [0], [0], [1], [0, 0, 1, 1], [], []>} : vector<16x8xbf16>, vector<8x65xbf16>, vector<16x65xf32> -> vector<16x65xf32>
    %515 = arith.addf %509, %514 : vector<16x65xf32>
    %c0_345 = arith.constant 0 : index
    %c6_346 = arith.constant 6 : index
    %516 = vector.load %arg46[%c0_345, %c6_346] : memref<16x384xf32, #tpu.memory_space<vmem>>, vector<8x65xf32>
    %517 = arith.truncf %516 : vector<8x65xf32> to vector<8x65xbf16>
    %518 = vector.extract_strided_slice %480 {offsets = [6, 0, 0], sizes = [1, 16, 8], strides = [1, 1, 1]} : vector<7x16x8xbf16> to vector<1x16x8xbf16>
    %519 = vector.shape_cast %518 : vector<1x16x8xbf16> to vector<16x8xbf16>
    %cst_347 = arith.constant dense<0.000000e+00> : vector<16x65xf32>
    %520 = tpu.matmul %519, %517, %cst_347 {dimension_numbers = #tpu.dot_dimension_numbers<[1], [0], [0], [1], [0, 0, 1, 1], [], []>} : vector<16x8xbf16>, vector<8x65xbf16>, vector<16x65xf32> -> vector<16x65xf32>
    %521 = arith.addf %515, %520 : vector<16x65xf32>
    %522 = arith.truncf %521 : vector<16x65xf32> to vector<16x65xbf16>
    %c0_348 = arith.constant 0 : index
    %c0_349 = arith.constant 0 : index
    %523 = vector.load %arg32[%c0_348, %c0_349] : memref<65x128xbf16, #tpu.memory_space<vmem>>, vector<65x128xbf16>
    %cst_350 = arith.constant dense<0.000000e+00> : vector<16x128xf32>
    %524 = tpu.matmul %522, %523, %cst_350 {dimension_numbers = #tpu.dot_dimension_numbers<[1], [0], [0], [1], [0, 0, 1, 1], [], []>} : vector<16x65xbf16>, vector<65x128xbf16>, vector<16x128xf32> -> vector<16x128xf32>
    %c0_351 = arith.constant 0 : index
    %c0_352 = arith.constant 0 : index
    %525 = vector.load %arg23[%c0_351, %c0_352] : memref<16x1xf32, #tpu.memory_space<vmem>>, vector<16x1xf32>
    %526 = vector.broadcast %525 : vector<16x1xf32> to vector<16x128xf32>
    %527 = arith.addf %524, %526 : vector<16x128xf32>
    %cst_353 = arith.constant 0.000000e+00 : f32
    %528 = vector.broadcast %cst_353 : f32 to vector<16x128xf32>
    %529 = arith.cmpf oge, %527, %528 : vector<16x128xf32>
    %cst_354 = arith.constant 1.000000e-01 : f32
    %530 = vector.broadcast %cst_354 : f32 to vector<16x128xf32>
    %531 = arith.mulf %530, %527 : vector<16x128xf32>
    %532 = arith.select %529, %527, %531 : vector<16x128xi1>, vector<16x128xf32>
    %c0_355 = arith.constant 0 : index
    %c0_356 = arith.constant 0 : index
    %c0_357 = arith.constant 0 : index
    %533 = vector.load %arg43[%c0_355, %c0_356, %c0_357] : memref<1x16x128xf32, #tpu.memory_space<vmem>>, vector<1x16x128xf32>
    %534 = vector.shape_cast %533 : vector<1x16x128xf32> to vector<16x128xf32>
    %535 = vector.shape_cast %532 : vector<16x128xf32> to vector<1x16x128xf32>
    tpu.vector_store %arg43[%c0_355, %c0_356, %c0_357], %535 {strides = array<i32>} : memref<1x16x128xf32, #tpu.memory_space<vmem>>, vector<1x16x128xf32>,
    %536 = vector.extract_strided_slice %532 {offsets = [0, 0], sizes = [16, 33], strides = [1, 1]} : vector<16x128xf32> to vector<16x33xf32>
    %cst_358 = arith.constant 0.000000e+00 : f32
    %537 = vector.broadcast %cst_358 : f32 to vector<16x2xf32>
    %c0_359 = arith.constant 0 : index
    %c0_360 = arith.constant 0 : index
    %538 = vector.load %arg46[%c0_359, %c0_360] : memref<16x384xf32, #tpu.memory_space<vmem>>, vector<16x2xf32>
    tpu.vector_store %arg46[%c0_359, %c0_360], %537 {strides = array<i32>} : memref<16x384xf32, #tpu.memory_space<vmem>>, vector<16x2xf32>,
    %c0_361 = arith.constant 0 : index
    %c2_362 = arith.constant 2 : index
    %539 = vector.load %arg46[%c0_361, %c2_362] : memref<16x384xf32, #tpu.memory_space<vmem>>, vector<16x33xf32>
    tpu.vector_store %arg46[%c0_361, %c2_362], %536 {strides = array<i32>} : memref<16x384xf32, #tpu.memory_space<vmem>>, vector<16x33xf32>,
    %cst_363 = arith.constant 0.000000e+00 : f32
    %540 = vector.broadcast %cst_363 : f32 to vector<16x2xf32>
    %c0_364 = arith.constant 0 : index
    %c35 = arith.constant 35 : index
    %541 = vector.load %arg46[%c0_364, %c35] : memref<16x384xf32, #tpu.memory_space<vmem>>, vector<16x2xf32>
    tpu.vector_store %arg46[%c0_364, %c35], %540 {strides = array<i32>} : memref<16x384xf32, #tpu.memory_space<vmem>>, vector<16x2xf32>,
    %c0_365 = arith.constant 0 : index
    %c0_366 = arith.constant 0 : index
    %c0_367 = arith.constant 0 : index
    %542 = vector.load %arg12[%c0_365, %c0_366, %c0_367] : memref<5x16x16xbf16, #tpu.memory_space<vmem>>, vector<5x16x16xbf16>
    %c0_368 = arith.constant 0 : index
    %c0_369 = arith.constant 0 : index
    %543 = vector.load %arg46[%c0_368, %c0_369] : memref<16x384xf32, #tpu.memory_space<vmem>>, vector<16x33xf32>
    %544 = arith.truncf %543 : vector<16x33xf32> to vector<16x33xbf16>
    %545 = vector.extract_strided_slice %542 {offsets = [0, 0, 0], sizes = [1, 16, 16], strides = [1, 1, 1]} : vector<5x16x16xbf16> to vector<1x16x16xbf16>
    %546 = vector.shape_cast %545 : vector<1x16x16xbf16> to vector<16x16xbf16>
    %cst_370 = arith.constant dense<0.000000e+00> : vector<16x33xf32>
    %547 = tpu.matmul %546, %544, %cst_370 {dimension_numbers = #tpu.dot_dimension_numbers<[1], [0], [0], [1], [0, 0, 1, 1], [], []>} : vector<16x16xbf16>, vector<16x33xbf16>, vector<16x33xf32> -> vector<16x33xf32>
    %c0_371 = arith.constant 0 : index
    %c1_372 = arith.constant 1 : index
    %548 = vector.load %arg46[%c0_371, %c1_372] : memref<16x384xf32, #tpu.memory_space<vmem>>, vector<16x33xf32>
    %549 = arith.truncf %548 : vector<16x33xf32> to vector<16x33xbf16>
    %550 = vector.extract_strided_slice %542 {offsets = [1, 0, 0], sizes = [1, 16, 16], strides = [1, 1, 1]} : vector<5x16x16xbf16> to vector<1x16x16xbf16>
    %551 = vector.shape_cast %550 : vector<1x16x16xbf16> to vector<16x16xbf16>
    %cst_373 = arith.constant dense<0.000000e+00> : vector<16x33xf32>
    %552 = tpu.matmul %551, %549, %cst_373 {dimension_numbers = #tpu.dot_dimension_numbers<[1], [0], [0], [1], [0, 0, 1, 1], [], []>} : vector<16x16xbf16>, vector<16x33xbf16>, vector<16x33xf32> -> vector<16x33xf32>
    %553 = arith.addf %547, %552 : vector<16x33xf32>
    %c0_374 = arith.constant 0 : index
    %c2_375 = arith.constant 2 : index
    %554 = vector.load %arg46[%c0_374, %c2_375] : memref<16x384xf32, #tpu.memory_space<vmem>>, vector<16x33xf32>
    %555 = arith.truncf %554 : vector<16x33xf32> to vector<16x33xbf16>
    %556 = vector.extract_strided_slice %542 {offsets = [2, 0, 0], sizes = [1, 16, 16], strides = [1, 1, 1]} : vector<5x16x16xbf16> to vector<1x16x16xbf16>
    %557 = vector.shape_cast %556 : vector<1x16x16xbf16> to vector<16x16xbf16>
    %cst_376 = arith.constant dense<0.000000e+00> : vector<16x33xf32>
    %558 = tpu.matmul %557, %555, %cst_376 {dimension_numbers = #tpu.dot_dimension_numbers<[1], [0], [0], [1], [0, 0, 1, 1], [], []>} : vector<16x16xbf16>, vector<16x33xbf16>, vector<16x33xf32> -> vector<16x33xf32>
    %559 = arith.addf %553, %558 : vector<16x33xf32>
    %c0_377 = arith.constant 0 : index
    %c3_378 = arith.constant 3 : index
    %560 = vector.load %arg46[%c0_377, %c3_378] : memref<16x384xf32, #tpu.memory_space<vmem>>, vector<16x33xf32>
    %561 = arith.truncf %560 : vector<16x33xf32> to vector<16x33xbf16>
    %562 = vector.extract_strided_slice %542 {offsets = [3, 0, 0], sizes = [1, 16, 16], strides = [1, 1, 1]} : vector<5x16x16xbf16> to vector<1x16x16xbf16>
    %563 = vector.shape_cast %562 : vector<1x16x16xbf16> to vector<16x16xbf16>
    %cst_379 = arith.constant dense<0.000000e+00> : vector<16x33xf32>
    %564 = tpu.matmul %563, %561, %cst_379 {dimension_numbers = #tpu.dot_dimension_numbers<[1], [0], [0], [1], [0, 0, 1, 1], [], []>} : vector<16x16xbf16>, vector<16x33xbf16>, vector<16x33xf32> -> vector<16x33xf32>
    %565 = arith.addf %559, %564 : vector<16x33xf32>
    %c0_380 = arith.constant 0 : index
    %c4_381 = arith.constant 4 : index
    %566 = vector.load %arg46[%c0_380, %c4_381] : memref<16x384xf32, #tpu.memory_space<vmem>>, vector<16x33xf32>
    %567 = arith.truncf %566 : vector<16x33xf32> to vector<16x33xbf16>
    %568 = vector.extract_strided_slice %542 {offsets = [4, 0, 0], sizes = [1, 16, 16], strides = [1, 1, 1]} : vector<5x16x16xbf16> to vector<1x16x16xbf16>
    %569 = vector.shape_cast %568 : vector<1x16x16xbf16> to vector<16x16xbf16>
    %cst_382 = arith.constant dense<0.000000e+00> : vector<16x33xf32>
    %570 = tpu.matmul %569, %567, %cst_382 {dimension_numbers = #tpu.dot_dimension_numbers<[1], [0], [0], [1], [0, 0, 1, 1], [], []>} : vector<16x16xbf16>, vector<16x33xbf16>, vector<16x33xf32> -> vector<16x33xf32>
    %571 = arith.addf %565, %570 : vector<16x33xf32>
    %572 = arith.truncf %571 : vector<16x33xf32> to vector<16x33xbf16>
    %c0_383 = arith.constant 0 : index
    %c0_384 = arith.constant 0 : index
    %573 = vector.load %arg33[%c0_383, %c0_384] : memref<33x128xbf16, #tpu.memory_space<vmem>>, vector<33x128xbf16>
    %cst_385 = arith.constant dense<0.000000e+00> : vector<16x128xf32>
    %574 = tpu.matmul %572, %573, %cst_385 {dimension_numbers = #tpu.dot_dimension_numbers<[1], [0], [0], [1], [0, 0, 1, 1], [], []>} : vector<16x33xbf16>, vector<33x128xbf16>, vector<16x128xf32> -> vector<16x128xf32>
    %c0_386 = arith.constant 0 : index
    %c0_387 = arith.constant 0 : index
    %575 = vector.load %arg24[%c0_386, %c0_387] : memref<16x1xf32, #tpu.memory_space<vmem>>, vector<16x1xf32>
    %576 = vector.broadcast %575 : vector<16x1xf32> to vector<16x128xf32>
    %577 = arith.addf %574, %576 : vector<16x128xf32>
    %cst_388 = arith.constant 0.000000e+00 : f32
    %578 = vector.broadcast %cst_388 : f32 to vector<16x128xf32>
    %579 = arith.cmpf oge, %577, %578 : vector<16x128xf32>
    %cst_389 = arith.constant 1.000000e-01 : f32
    %580 = vector.broadcast %cst_389 : f32 to vector<16x128xf32>
    %581 = arith.mulf %580, %577 : vector<16x128xf32>
    %582 = arith.select %579, %577, %581 : vector<16x128xi1>, vector<16x128xf32>
    %c0_390 = arith.constant 0 : index
    %c0_391 = arith.constant 0 : index
    %c0_392 = arith.constant 0 : index
    %583 = vector.load %arg44[%c0_390, %c0_391, %c0_392] : memref<1x16x128xf32, #tpu.memory_space<vmem>>, vector<1x16x128xf32>
    %584 = vector.shape_cast %583 : vector<1x16x128xf32> to vector<16x128xf32>
    %585 = vector.shape_cast %582 : vector<16x128xf32> to vector<1x16x128xf32>
    tpu.vector_store %arg44[%c0_390, %c0_391, %c0_392], %585 {strides = array<i32>} : memref<1x16x128xf32, #tpu.memory_space<vmem>>, vector<1x16x128xf32>,
    %586 = vector.extract_strided_slice %582 {offsets = [0, 0], sizes = [16, 17], strides = [1, 1]} : vector<16x128xf32> to vector<16x17xf32>
    %cst_393 = arith.constant 0.000000e+00 : f32
    %587 = vector.broadcast %cst_393 : f32 to vector<16x1xf32>
    %c0_394 = arith.constant 0 : index
    %c0_395 = arith.constant 0 : index
    %588 = vector.load %arg46[%c0_394, %c0_395] : memref<16x384xf32, #tpu.memory_space<vmem>>, vector<16x1xf32>
    tpu.vector_store %arg46[%c0_394, %c0_395], %587 {strides = array<i32>} : memref<16x384xf32, #tpu.memory_space<vmem>>, vector<16x1xf32>,
    %c0_396 = arith.constant 0 : index
    %c1_397 = arith.constant 1 : index
    %589 = vector.load %arg46[%c0_396, %c1_397] : memref<16x384xf32, #tpu.memory_space<vmem>>, vector<16x17xf32>
    tpu.vector_store %arg46[%c0_396, %c1_397], %586 {strides = array<i32>} : memref<16x384xf32, #tpu.memory_space<vmem>>, vector<16x17xf32>,
    %cst_398 = arith.constant 0.000000e+00 : f32
    %590 = vector.broadcast %cst_398 : f32 to vector<16x112xf32>
    %c0_399 = arith.constant 0 : index
    %c18 = arith.constant 18 : index
    %591 = vector.load %arg46[%c0_399, %c18] : memref<16x384xf32, #tpu.memory_space<vmem>>, vector<16x112xf32>
    tpu.vector_store %arg46[%c0_399, %c18], %590 {strides = array<i32>} : memref<16x384xf32, #tpu.memory_space<vmem>>, vector<16x112xf32>,
    %c0_400 = arith.constant 0 : index
    %c0_401 = arith.constant 0 : index
    %c0_402 = arith.constant 0 : index
    %592 = vector.load %arg13[%c0_400, %c0_401, %c0_402] : memref<3x1x16xbf16, #tpu.memory_space<vmem>>, vector<3x1x16xbf16>
    %c0_403 = arith.constant 0 : index
    %c0_404 = arith.constant 0 : index
    %593 = vector.load %arg46[%c0_403, %c0_404] : memref<16x384xf32, #tpu.memory_space<vmem>>, vector<16x128xf32>
    %594 = arith.truncf %593 : vector<16x128xf32> to vector<16x128xbf16>
    %595 = vector.extract_strided_slice %592 {offsets = [0, 0, 0], sizes = [1, 1, 16], strides = [1, 1, 1]} : vector<3x1x16xbf16> to vector<1x1x16xbf16>
    %596 = vector.shape_cast %595 : vector<1x1x16xbf16> to vector<1x16xbf16>
    %cst_405 = arith.constant dense<0.000000e+00> : vector<1x128xf32>
    %597 = tpu.matmul %596, %594, %cst_405 {dimension_numbers = #tpu.dot_dimension_numbers<[1], [0], [0], [1], [0, 0, 1, 1], [], []>} : vector<1x16xbf16>, vector<16x128xbf16>, vector<1x128xf32> -> vector<1x128xf32>
    %c0_406 = arith.constant 0 : index
    %c1_407 = arith.constant 1 : index
    %598 = vector.load %arg46[%c0_406, %c1_407] : memref<16x384xf32, #tpu.memory_space<vmem>>, vector<16x128xf32>
    %599 = arith.truncf %598 : vector<16x128xf32> to vector<16x128xbf16>
    %600 = vector.extract_strided_slice %592 {offsets = [1, 0, 0], sizes = [1, 1, 16], strides = [1, 1, 1]} : vector<3x1x16xbf16> to vector<1x1x16xbf16>
    %601 = vector.shape_cast %600 : vector<1x1x16xbf16> to vector<1x16xbf16>
    %cst_408 = arith.constant dense<0.000000e+00> : vector<1x128xf32>
    %602 = tpu.matmul %601, %599, %cst_408 {dimension_numbers = #tpu.dot_dimension_numbers<[1], [0], [0], [1], [0, 0, 1, 1], [], []>} : vector<1x16xbf16>, vector<16x128xbf16>, vector<1x128xf32> -> vector<1x128xf32>
    %603 = arith.addf %597, %602 : vector<1x128xf32>
    %c0_409 = arith.constant 0 : index
    %c2_410 = arith.constant 2 : index
    %604 = vector.load %arg46[%c0_409, %c2_410] : memref<16x384xf32, #tpu.memory_space<vmem>>, vector<16x128xf32>
    %605 = arith.truncf %604 : vector<16x128xf32> to vector<16x128xbf16>
    %606 = vector.extract_strided_slice %592 {offsets = [2, 0, 0], sizes = [1, 1, 16], strides = [1, 1, 1]} : vector<3x1x16xbf16> to vector<1x1x16xbf16>
    %607 = vector.shape_cast %606 : vector<1x1x16xbf16> to vector<1x16xbf16>
    %cst_411 = arith.constant dense<0.000000e+00> : vector<1x128xf32>
    %608 = tpu.matmul %607, %605, %cst_411 {dimension_numbers = #tpu.dot_dimension_numbers<[1], [0], [0], [1], [0, 0, 1, 1], [], []>} : vector<1x16xbf16>, vector<16x128xbf16>, vector<1x128xf32> -> vector<1x128xf32>
    %609 = arith.addf %603, %608 : vector<1x128xf32>
    %c0_412 = arith.constant 0 : index
    %c0_413 = arith.constant 0 : index
    %610 = vector.load %arg25[%c0_412, %c0_413] : memref<1x1xf32, #tpu.memory_space<vmem>>, vector<1x1xf32>
    %611 = vector.broadcast %610 : vector<1x1xf32> to vector<1x128xf32>
    %612 = arith.addf %609, %611 : vector<1x128xf32>
    %c0_414 = arith.constant 0 : index
    %c0_415 = arith.constant 0 : index
    %c0_416 = arith.constant 0 : index
    %613 = vector.load %arg45[%c0_414, %c0_415, %c0_416] : memref<1x1x128xf32, #tpu.memory_space<vmem>>, vector<1x1x128xf32>
    %614 = vector.shape_cast %613 : vector<1x1x128xf32> to vector<1x128xf32>
    %615 = vector.shape_cast %612 : vector<1x128xf32> to vector<1x1x128xf32>
    tpu.vector_store %arg45[%c0_414, %c0_415, %c0_416], %615 {strides = array<i32>} : memref<1x1x128xf32, #tpu.memory_space<vmem>>, vector<1x1x128xf32>,
    return
  }
  func.func @transform_0(%arg0: i32) -> (i32, i32, i32) {
    %c0_i32 = arith.constant 0 : i32
    %c0_i32_0 = arith.constant 0 : i32
    %c0_i32_1 = arith.constant 0 : i32
    return %arg0, %c0_i32, %c0_i32_0 : i32, i32, i32
  }
  func.func @transform_1(%arg0: i32) -> (i32, i32, i32) {
    %c0_i32 = arith.constant 0 : i32
    %c0_i32_0 = arith.constant 0 : i32
    %c0_i32_1 = arith.constant 0 : i32
    %c0_i32_2 = arith.constant 0 : i32
    return %c0_i32, %c0_i32_0, %c0_i32_1 : i32, i32, i32
  }
  func.func @transform_2(%arg0: i32) -> (i32, i32, i32) {
    %c0_i32 = arith.constant 0 : i32
    %c0_i32_0 = arith.constant 0 : i32
    %c0_i32_1 = arith.constant 0 : i32
    %c0_i32_2 = arith.constant 0 : i32
    return %c0_i32, %c0_i32_0, %c0_i32_1 : i32, i32, i32
  }
  func.func @transform_3(%arg0: i32) -> (i32, i32, i32) {
    %c0_i32 = arith.constant 0 : i32
    %c0_i32_0 = arith.constant 0 : i32
    %c0_i32_1 = arith.constant 0 : i32
    %c0_i32_2 = arith.constant 0 : i32
    return %c0_i32, %c0_i32_0, %c0_i32_1 : i32, i32, i32
  }
  func.func @transform_4(%arg0: i32) -> (i32, i32, i32) {
    %c0_i32 = arith.constant 0 : i32
    %c0_i32_0 = arith.constant 0 : i32
    %c0_i32_1 = arith.constant 0 : i32
    %c0_i32_2 = arith.constant 0 : i32
    return %c0_i32, %c0_i32_0, %c0_i32_1 : i32, i32, i32
  }
  func.func @transform_5(%arg0: i32) -> (i32, i32, i32) {
    %c0_i32 = arith.constant 0 : i32
    %c0_i32_0 = arith.constant 0 : i32
    %c0_i32_1 = arith.constant 0 : i32
    %c0_i32_2 = arith.constant 0 : i32
    return %c0_i32, %c0_i32_0, %c0_i32_1 : i32, i32, i32
  }
  func.func @transform_6(%arg0: i32) -> (i32, i32, i32) {
    %c0_i32 = arith.constant 0 : i32
    %c0_i32_0 = arith.constant 0 : i32
    %c0_i32_1 = arith.constant 0 : i32
    %c0_i32_2 = arith.constant 0 : i32
    return %c0_i32, %c0_i32_0, %c0_i32_1 : i32, i32, i32
  }
  func.func @transform_7(%arg0: i32) -> (i32, i32, i32) {
    %c0_i32 = arith.constant 0 : i32
    %c0_i32_0 = arith.constant 0 : i32
    %c0_i32_1 = arith.constant 0 : i32
    %c0_i32_2 = arith.constant 0 : i32
    return %c0_i32, %c0_i32_0, %c0_i32_1 : i32, i32, i32
  }
  func.func @transform_8(%arg0: i32) -> (i32, i32, i32) {
    %c0_i32 = arith.constant 0 : i32
    %c0_i32_0 = arith.constant 0 : i32
    %c0_i32_1 = arith.constant 0 : i32
    %c0_i32_2 = arith.constant 0 : i32
    return %c0_i32, %c0_i32_0, %c0_i32_1 : i32, i32, i32
  }
  func.func @transform_9(%arg0: i32) -> (i32, i32, i32) {
    %c0_i32 = arith.constant 0 : i32
    %c0_i32_0 = arith.constant 0 : i32
    %c0_i32_1 = arith.constant 0 : i32
    %c0_i32_2 = arith.constant 0 : i32
    return %c0_i32, %c0_i32_0, %c0_i32_1 : i32, i32, i32
  }
  func.func @transform_10(%arg0: i32) -> (i32, i32, i32) {
    %c0_i32 = arith.constant 0 : i32
    %c0_i32_0 = arith.constant 0 : i32
    %c0_i32_1 = arith.constant 0 : i32
    %c0_i32_2 = arith.constant 0 : i32
    return %c0_i32, %c0_i32_0, %c0_i32_1 : i32, i32, i32
  }
  func.func @transform_11(%arg0: i32) -> (i32, i32, i32) {
    %c0_i32 = arith.constant 0 : i32
    %c0_i32_0 = arith.constant 0 : i32
    %c0_i32_1 = arith.constant 0 : i32
    %c0_i32_2 = arith.constant 0 : i32
    return %c0_i32, %c0_i32_0, %c0_i32_1 : i32, i32, i32
  }
  func.func @transform_12(%arg0: i32) -> (i32, i32, i32) {
    %c0_i32 = arith.constant 0 : i32
    %c0_i32_0 = arith.constant 0 : i32
    %c0_i32_1 = arith.constant 0 : i32
    %c0_i32_2 = arith.constant 0 : i32
    return %c0_i32, %c0_i32_0, %c0_i32_1 : i32, i32, i32
  }
  func.func @transform_13(%arg0: i32) -> (i32, i32) {
    %c0_i32 = arith.constant 0 : i32
    %c0_i32_0 = arith.constant 0 : i32
    %c0_i32_1 = arith.constant 0 : i32
    return %c0_i32, %c0_i32_0 : i32, i32
  }
  func.func @transform_14(%arg0: i32) -> (i32, i32) {
    %c0_i32 = arith.constant 0 : i32
    %c0_i32_0 = arith.constant 0 : i32
    %c0_i32_1 = arith.constant 0 : i32
    return %c0_i32, %c0_i32_0 : i32, i32
  }
  func.func @transform_15(%arg0: i32) -> (i32, i32) {
    %c0_i32 = arith.constant 0 : i32
    %c0_i32_0 = arith.constant 0 : i32
    %c0_i32_1 = arith.constant 0 : i32
    return %c0_i32, %c0_i32_0 : i32, i32
  }
  func.func @transform_16(%arg0: i32) -> (i32, i32) {
    %c0_i32 = arith.constant 0 : i32
    %c0_i32_0 = arith.constant 0 : i32
    %c0_i32_1 = arith.constant 0 : i32
    return %c0_i32, %c0_i32_0 : i32, i32
  }
  func.func @transform_17(%arg0: i32) -> (i32, i32) {
    %c0_i32 = arith.constant 0 : i32
    %c0_i32_0 = arith.constant 0 : i32
    %c0_i32_1 = arith.constant 0 : i32
    return %c0_i32, %c0_i32_0 : i32, i32
  }
  func.func @transform_18(%arg0: i32) -> (i32, i32) {
    %c0_i32 = arith.constant 0 : i32
    %c0_i32_0 = arith.constant 0 : i32
    %c0_i32_1 = arith.constant 0 : i32
    return %c0_i32, %c0_i32_0 : i32, i32
  }
  func.func @transform_19(%arg0: i32) -> (i32, i32) {
    %c0_i32 = arith.constant 0 : i32
    %c0_i32_0 = arith.constant 0 : i32
    %c0_i32_1 = arith.constant 0 : i32
    return %c0_i32, %c0_i32_0 : i32, i32
  }
  func.func @transform_20(%arg0: i32) -> (i32, i32) {
    %c0_i32 = arith.constant 0 : i32
    %c0_i32_0 = arith.constant 0 : i32
    %c0_i32_1 = arith.constant 0 : i32
    return %c0_i32, %c0_i32_0 : i32, i32
  }
  func.func @transform_21(%arg0: i32) -> (i32, i32) {
    %c0_i32 = arith.constant 0 : i32
    %c0_i32_0 = arith.constant 0 : i32
    %c0_i32_1 = arith.constant 0 : i32
    return %c0_i32, %c0_i32_0 : i32, i32
  }
  func.func @transform_22(%arg0: i32) -> (i32, i32) {
    %c0_i32 = arith.constant 0 : i32
    %c0_i32_0 = arith.constant 0 : i32
    %c0_i32_1 = arith.constant 0 : i32
    return %c0_i32, %c0_i32_0 : i32, i32
  }
  func.func @transform_23(%arg0: i32) -> (i32, i32) {
    %c0_i32 = arith.constant 0 : i32
    %c0_i32_0 = arith.constant 0 : i32
    %c0_i32_1 = arith.constant 0 : i32
    return %c0_i32, %c0_i32_0 : i32, i32
  }
  func.func @transform_24(%arg0: i32) -> (i32, i32) {
    %c0_i32 = arith.constant 0 : i32
    %c0_i32_0 = arith.constant 0 : i32
    %c0_i32_1 = arith.constant 0 : i32
    return %c0_i32, %c0_i32_0 : i32, i32
  }
  func.func @transform_25(%arg0: i32) -> (i32, i32) {
    %c0_i32 = arith.constant 0 : i32
    %c0_i32_0 = arith.constant 0 : i32
    %c0_i32_1 = arith.constant 0 : i32
    return %c0_i32, %c0_i32_0 : i32, i32
  }
  func.func @transform_26(%arg0: i32) -> (i32, i32) {
    %c0_i32 = arith.constant 0 : i32
    %c0_i32_0 = arith.constant 0 : i32
    %c0_i32_1 = arith.constant 0 : i32
    return %c0_i32, %c0_i32_0 : i32, i32
  }
  func.func @transform_27(%arg0: i32) -> (i32, i32) {
    %c0_i32 = arith.constant 0 : i32
    %c0_i32_0 = arith.constant 0 : i32
    %c0_i32_1 = arith.constant 0 : i32
    return %c0_i32, %c0_i32_0 : i32, i32
  }
  func.func @transform_28(%arg0: i32) -> (i32, i32) {
    %c0_i32 = arith.constant 0 : i32
    %c0_i32_0 = arith.constant 0 : i32
    %c0_i32_1 = arith.constant 0 : i32
    return %c0_i32, %c0_i32_0 : i32, i32
  }
  func.func @transform_29(%arg0: i32) -> (i32, i32) {
    %c0_i32 = arith.constant 0 : i32
    %c0_i32_0 = arith.constant 0 : i32
    %c0_i32_1 = arith.constant 0 : i32
    return %c0_i32, %c0_i32_0 : i32, i32
  }
  func.func @transform_30(%arg0: i32) -> (i32, i32) {
    %c0_i32 = arith.constant 0 : i32
    %c0_i32_0 = arith.constant 0 : i32
    %c0_i32_1 = arith.constant 0 : i32
    return %c0_i32, %c0_i32_0 : i32, i32
  }
  func.func @transform_31(%arg0: i32) -> (i32, i32) {
    %c0_i32 = arith.constant 0 : i32
    %c0_i32_0 = arith.constant 0 : i32
    %c0_i32_1 = arith.constant 0 : i32
    return %c0_i32, %c0_i32_0 : i32, i32
  }
  func.func @transform_32(%arg0: i32) -> (i32, i32) {
    %c0_i32 = arith.constant 0 : i32
    %c0_i32_0 = arith.constant 0 : i32
    %c0_i32_1 = arith.constant 0 : i32
    return %c0_i32, %c0_i32_0 : i32, i32
  }
  func.func @transform_33(%arg0: i32) -> (i32, i32, i32) {
    %c0_i32 = arith.constant 0 : i32
    %c0_i32_0 = arith.constant 0 : i32
    %c0_i32_1 = arith.constant 0 : i32
    return %arg0, %c0_i32, %c0_i32_0 : i32, i32, i32
  }
  func.func @transform_34(%arg0: i32) -> (i32, i32, i32) {
    %c0_i32 = arith.constant 0 : i32
    %c0_i32_0 = arith.constant 0 : i32
    %c0_i32_1 = arith.constant 0 : i32
    return %arg0, %c0_i32, %c0_i32_0 : i32, i32, i32
  }
  func.func @transform_35(%arg0: i32) -> (i32, i32, i32) {
    %c0_i32 = arith.constant 0 : i32
    %c0_i32_0 = arith.constant 0 : i32
    %c0_i32_1 = arith.constant 0 : i32
    return %arg0, %c0_i32, %c0_i32_0 : i32, i32, i32
  }
  func.func @transform_36(%arg0: i32) -> (i32, i32, i32) {
    %c0_i32 = arith.constant 0 : i32
    %c0_i32_0 = arith.constant 0 : i32
    %c0_i32_1 = arith.constant 0 : i32
    return %arg0, %c0_i32, %c0_i32_0 : i32, i32, i32
  }
  func.func @transform_37(%arg0: i32) -> (i32, i32, i32) {
    %c0_i32 = arith.constant 0 : i32
    %c0_i32_0 = arith.constant 0 : i32
    %c0_i32_1 = arith.constant 0 : i32
    return %arg0, %c0_i32, %c0_i32_0 : i32, i32, i32
  }
  func.func @transform_38(%arg0: i32) -> (i32, i32, i32) {
    %c0_i32 = arith.constant 0 : i32
    %c0_i32_0 = arith.constant 0 : i32
    %c0_i32_1 = arith.constant 0 : i32
    return %arg0, %c0_i32, %c0_i32_0 : i32, i32, i32
  }
  func.func @transform_39(%arg0: i32) -> (i32, i32, i32) {
    %c0_i32 = arith.constant 0 : i32
    %c0_i32_0 = arith.constant 0 : i32
    %c0_i32_1 = arith.constant 0 : i32
    return %arg0, %c0_i32, %c0_i32_0 : i32, i32, i32
  }
  func.func @transform_40(%arg0: i32) -> (i32, i32, i32) {
    %c0_i32 = arith.constant 0 : i32
    %c0_i32_0 = arith.constant 0 : i32
    %c0_i32_1 = arith.constant 0 : i32
    return %arg0, %c0_i32, %c0_i32_0 : i32, i32, i32
  }
  func.func @transform_41(%arg0: i32) -> (i32, i32, i32) {
    %c0_i32 = arith.constant 0 : i32
    %c0_i32_0 = arith.constant 0 : i32
    %c0_i32_1 = arith.constant 0 : i32
    return %arg0, %c0_i32, %c0_i32_0 : i32, i32, i32
  }
  func.func @transform_42(%arg0: i32) -> (i32, i32, i32) {
    %c0_i32 = arith.constant 0 : i32
    %c0_i32_0 = arith.constant 0 : i32
    %c0_i32_1 = arith.constant 0 : i32
    return %arg0, %c0_i32, %c0_i32_0 : i32, i32, i32
  }
  func.func @transform_43(%arg0: i32) -> (i32, i32, i32) {
    %c0_i32 = arith.constant 0 : i32
    %c0_i32_0 = arith.constant 0 : i32
    %c0_i32_1 = arith.constant 0 : i32
    return %arg0, %c0_i32, %c0_i32_0 : i32, i32, i32
  }
  func.func @transform_44(%arg0: i32) -> (i32, i32, i32) {
    %c0_i32 = arith.constant 0 : i32
    %c0_i32_0 = arith.constant 0 : i32
    %c0_i32_1 = arith.constant 0 : i32
    return %arg0, %c0_i32, %c0_i32_0 : i32, i32, i32
  }
}

</mosaic_0001>

<bundles_post_ra>
// kernel: msd_forward.1
= control target key start
LH: loop header
LB: loop body
LE: loop exit
PB: predicated region body
PF: predicated region fallthrough
CT: control target
= control target key end

     0   :  { %s7916_s6 = smov 1   ;;  %s7917_s10 = smov 2   ;;  %s9431_s0 = inlined_call_operand.smem [shape: u32[45], index: -1, kind: input, shape index: {}] }
   0x1   :  { %s7992_s5 = sld [smem:[%s9431_s0]]   ;;  %s7918_s14 = smov 3  }
   0x2   :  { %s7997_s9 = sld [smem:[%s9431_s0 + %s7916_s6]]   ;;  %s7919_s18 = smov 4  }
   0x3   :  { %s8002_s13 = sld [smem:[%s9431_s0 + %s7917_s10]]   ;;  %s7920_s22 = smov 5  }
   0x4   :  { %s8007_s17 = sld [smem:[%s9431_s0 + %s7918_s14]]   ;;  %s7921_s26 = smov 6  }
   0x5   :  { %s8012_s21 = sld [smem:[%s9431_s0 + %s7919_s18]]   ;;  %s7922_s30 = smov 7  }
   0x6   :  { %s8017_s25 = sld [smem:[%s9431_s0 + %s7920_s22]]   ;;  %s7923_s4 = smov 8  }
   0x7   :  { %9520 = sst [smem:[#allocation25_spill]] %s7992_s5  ;;  %s7924_s10 = smov 9  }
   0x8   :  { %9521 = sst [smem:[#allocation26_spill]] %s7997_s9  ;;  %s7925_s15 = smov 10  }
   0x9   :  { %9522 = sst [smem:[#allocation27_spill]] %s8002_s13  ;;  %s7926_s20 = smov 11  }
   0xa   :  { %9523 = sst [smem:[#allocation28_spill]] %s8007_s17  ;;  %s7928_s1 = smov 13  }
   0xb   :  { %9524 = sst [smem:[#allocation29_spill]] %s8012_s21  ;;  %s7929_s7 = smov 14  }
   0xc   :  { %9525 = sst [smem:[#allocation30_spill]] %s8017_s25  ;;  %s7931_s22 = smov 16  }
   0xd   :  { %s8022_s29 = sld [smem:[%s9431_s0 + %s7921_s26]]   ;;  %s7927_s26 = smov 12  }
   0xe   :  { %s8027_s3 = sld [smem:[%s9431_s0 + %s7922_s30]]   ;;  %s7932_s28 = smov 17  }
   0xf   :  { %s8032_s8 = sld [smem:[%s9431_s0 + %s7923_s4]]   ;;  %s7934_s16 = smov 19  }
  0x10   :  { %s8037_s14 = sld [smem:[%s9431_s0 + %s7924_s10]]   ;;  %s7933_s10 = smov 18  }
  0x11   :  { %s8042_s19 = sld [smem:[%s9431_s0 + %s7925_s15]]   ;;  %s7930_s15 = smov 15  }
  0x12   :  { %s8047_s24 = sld [smem:[%s9431_s0 + %s7926_s20]]   ;;  %s7935_s23 = smov 21  }
  0x13   :  { %9526 = sst [smem:[#allocation31_spill]] %s8022_s29 }
  0x14   :  { %9527 = sst [smem:[#allocation32_spill]] %s8027_s3 }
  0x15   :  { %9528 = sst [smem:[#allocation33_spill]] %s8032_s8 }
  0x16   :  { %9529 = sst [smem:[#allocation34_spill]] %s8037_s14 }
  0x17   :  { %9530 = sst [smem:[#allocation35_spill]] %s8042_s19 }
  0x18   :  { %9531 = sst [smem:[#allocation36_spill]] %s8047_s24 }
  0x19   :  { %s8052_s30 = sld [smem:[%s9431_s0 + %s7927_s26]]  }
  0x1a   :  { %s8057_s6 = sld [smem:[%s9431_s0 + %s7928_s1]]   ;;  %s7940_s1 = smov 27  }
  0x1b   :  { %s8062_s12 = sld [smem:[%s9431_s0 + %s7929_s7]]  }
  0x1c   :  { %s8067_s20 = sld [smem:[%s9431_s0 + %s7930_s15]]  }
  0x1d   :  { %s6557_s27 = sld [smem:[%s9431_s0 + %s7931_s22]]  }
  0x1e   :  { %s8075_s4 = sld [smem:[%s9431_s0 + %s7932_s28]]   ;;  %s7936_s28 = smov 22  }
  0x1f   :  { %9532 = sst [smem:[#allocation37_spill]] %s8052_s30 }
  0x20   :  { %9533 = sst [smem:[#allocation38_spill]] %s8057_s6 }
  0x21   :  { %9534 = sst [smem:[#allocation39_spill]] %s8062_s12 }
  0x22   :  { %9535 = sst [smem:[#allocation40_spill]] %s8067_s20 }
  0x23   :  { %s8080_s30 = sld [smem:[%s9431_s0 + %s7933_s10]]   ;;  %s7937_s10 = smov 23   ;;  %v95_v0 = vstv %s6557_s27 }
  0x24   :  { %9536 = sst [smem:[#allocation41_spill]] %s8075_s4  ;;  %96 = vst [vmem:[#allocation3] sm:$0x1] %v95_v0  ;;  %s7941_s27 = smov 28  }
  0x25   :  { %s8085_s24 = sld [smem:[%s9431_s0 + %s7934_s16]]   ;;  %s7938_s16 = smov 25  }
  0x26   :  { %s8090_s19 = sld [smem:[%s9431_s0 + %s7935_s23]]   ;;  %s7939_s23 = smov 26  }
  0x27   :  { %s8095_s14 = sld [smem:[%s9431_s0 + %s7936_s28]]  }
  0x28   :  { %s8100_s8 = sld [smem:[%s9431_s0 + %s7937_s10]]  }
  0x29   :  { %9537 = sst [smem:[#allocation42_spill]] %s8080_s30 }
  0x2a   :  { %s8105_s22 = sld [smem:[%s9431_s0 + %s7938_s16]]   ;;  %s7942_s16 = smov 29  }
  0x2b   :  { %9538 = sst [smem:[#allocation43_spill]] %s8085_s24 }
  0x2c   :  { %9539 = sst [smem:[#allocation44_spill]] %s8090_s19  ;;  %s7943_s19 = smov 30  }
  0x2d   :  { %9540 = sst [smem:[#allocation45_spill]] %s8095_s14  ;;  %s7944_s14 = smov 31  }
  0x2e   :  { %9541 = sst [smem:[#allocation46_spill]] %s8100_s8  ;;  %s7946_s8 = smov 33  }
  0x2f   :  { %s8110_s28 = sld [smem:[%s9431_s0 + %s7939_s23]]   ;;  %s7959_s23 = smov 24  }
  0x30   :  { %9542 = sst [smem:[#allocation47_spill]] %s8105_s22 }
  0x31   :  { %s8115_s10 = sld [smem:[%s9431_s0 + %s7940_s1]]  }
  0x32   :  { %s8120_s15 = sld [smem:[%s9431_s0 + %s7941_s27]]   ;;  %s7945_s27 = smov 32  }
  0x33   :  { %s8125_s3 = sld [smem:[%s9431_s0 + %s7942_s16]]  }
  0x34   :  { %s8130_s24 = sld [smem:[%s9431_s0 + %s7943_s19]]   ;;  %s7947_s19 = smov 34  }
  0x35   :  { %9543 = sst [smem:[#allocation48_spill]] %s8110_s28 }
  0x36   :  { %s8135_s29 = sld [smem:[%s9431_s0 + %s7944_s14]]   ;;  %s7948_s14 = smov 35  }
  0x37   :  { %9544 = sst [smem:[#allocation49_spill]] %s8115_s10 }
  0x38   :  { %9545 = sst [smem:[#allocation50_spill]] %s8120_s15 }
  0x39   :  { %9546 = sst [smem:[#allocation51_spill]] %s8125_s3 }
  0x3a   :  { %9547 = sst [smem:[#allocation52_spill]] %s8130_s24 }
  0x3b   :  { %s8140_s15 = sld [smem:[%s9431_s0 + %s7945_s27]]   ;;  %s7949_s27 = smov 36  }
  0x3c   :  { %9548 = sst [smem:[#allocation53_spill]] %s8135_s29 }
  0x3d   :  { %s8145_s3 = sld [smem:[%s9431_s0 + %s7946_s8]]   ;;  %s7950_s8 = smov 37  }
  0x3e   :  { %s8150_s24 = sld [smem:[%s9431_s0 + %s7947_s19]]   ;;  %s7951_s19 = smov 38  }
  0x3f   :  { %s8155_s29 = sld [smem:[%s9431_s0 + %s7948_s14]]   ;;  %s7952_s14 = smov 39  }
  0x41   :  { %9549 = sst [smem:[#allocation54_spill]] %s8140_s15 }
  0x42   :  { %s8160_s15 = sld [smem:[%s9431_s0 + %s7949_s27]]   ;;  %s7953_s27 = smov 40  }
  0x43   :  { %9550 = sst [smem:[#allocation55_spill]] %s8145_s3 }
  0x44   :  { %9551 = sst [smem:[#allocation56_spill]] %s8150_s24 }
  0x45   :  { %9552 = sst [smem:[#allocation57_spill]] %s8155_s29 }
  0x46   :  { %s8165_s3 = sld [smem:[%s9431_s0 + %s7950_s8]]   ;;  %s7954_s8 = smov 41  }
  0x47   :  { %s8170_s24 = sld [smem:[%s9431_s0 + %s7951_s19]]   ;;  %s7955_s19 = smov 42  }
  0x48   :  { %9553 = sst [smem:[#allocation58_spill]] %s8160_s15 }
  0x49   :  { %s8175_s29 = sld [smem:[%s9431_s0 + %s7952_s14]]   ;;  %s7956_s14 = smov 43  }
  0x4a   :  { %s8180_s15 = sld [smem:[%s9431_s0 + %s7953_s27]]   ;;  %s7957_s27 = smov 44  }
  0x4c   :  { %9554 = sst [smem:[#allocation59_spill]] %s8165_s3 }
  0x4d   :  { %9555 = sst [smem:[#allocation60_spill]] %s8170_s24 }
  0x4e   :  { %s8185_s3 = sld [smem:[%s9431_s0 + %s7954_s8]]   ;;  %s7958_s8 = smov 20  }
  0x4f   :  { %9556 = sst [smem:[#allocation61_spill]] %s8175_s29 }
  0x50   :  { %9557 = sst [smem:[#allocation62_spill]] %s8180_s15 }
  0x51   :  { %s8190_s24 = sld [smem:[%s9431_s0 + %s7955_s19]]  }
  0x52   :  { %s8195_s29 = sld [smem:[%s9431_s0 + %s7956_s14]]  }
  0x53   :  { %s8200_s15 = sld [smem:[%s9431_s0 + %s7957_s27]]  }
  0x54   :  { %9558 = sst [smem:[#allocation63_spill]] %s8185_s3 }
  0x55   :  { %s6561_s3 = sld [smem:[%s9431_s0 + %s7958_s8]]  }
  0x57   :  { %9559 = sst [smem:[#allocation64_spill]] %s8190_s24 }
  0x58   :  { %s6565_s24 = sld [smem:[%s9431_s0 + %s7959_s23]]  }
  0x5b   :  { %v97_v1 = vstv %s6561_s3 }
  0x5c   :  { %98 = vst [vmem:[#allocation4] sm:$0x1] %v97_v1 }
  0x5e   :  { %v99_v2 = vstv %s6565_s24 }
  0x5f   :  { %100 = vst [vmem:[#allocation5] sm:$0x1] %v99_v2 }
  0x60   :  { %101 = vsyncpa [#allocation7], 0 }
  0x61   :  { %103 = vsyncpa [#allocation7 + $0x1], 0 }
  0x62   :  { %104 = vsyncpa [#allocation9], 0 }
  0x63   :  { %106 = vsyncpa [#allocation9 + $0x1], 0 }
  0x64   :  { %107 = vsyncpa [#allocation12], 0 }
  0x65   :  { %109 = vsyncpa [#allocation12 + $0x1], 0 }
  0x66   :  { %110 = vsyncpa [#allocation15], 0 }
  0x67   :  { %112 = vsyncpa [#allocation15 + $0x1], 0 }
  0x68   :  { %113 = vsyncpa [#allocation18], 0 }
  0x69   :  { %115 = vsyncpa [#allocation18 + $0x1], 0  ;;  %s8208_s14 = smov 0   ;;  %s8210_s1 = smov 0  }
  0x6a   :  { %s8212_s2 = smov 0   ;;  %s8214_s0 = smov 0  }
  0x6b LB: > { %s9560_s30 = sld [smem:[#allocation42_spill]]  ;;  %s9561_s28 = sld [smem:[#allocation48_spill]]  ;;  %s7910_s2 = sphi %s8212_s2, %s9686_s2   ;;  %s7906_s1 = sphi %s8210_s1, %s9685_s1   ;;  %s7902_s14 = sphi %s8208_s14, %s9684_s14   ;;  %s7914_s0 = sphi %s8214_s0, %s9683_s0  }
  0x6c   : > { %s9562_s25 = sld [smem:[#allocation30_spill]]  ;;  %s9563_s22 = sld [smem:[#allocation47_spill]] }
  0x6d   : > { %s9564_s21 = sld [smem:[#allocation29_spill]]  ;;  %s9565_s20 = sld [smem:[#allocation40_spill]] }
  0x6e   : > { %s9566_s10 = sld [smem:[#allocation49_spill]]  ;;  %s9567_s17 = sld [smem:[#allocation28_spill]] }
  0x6f   : > { %s9568_s13 = sld [smem:[#allocation27_spill]]  ;;  %s9569_s12 = sld [smem:[#allocation39_spill]] }
  0x70   : > { %s9570_s9 = sld [smem:[#allocation26_spill]]  ;;  %9571 = sst [smem:[#allocation65_spill]] %s7902_s14 }
  0x71   : > { %9572 = sst [smem:[#allocation66_spill]] %s7906_s1  ;;  %s8229_s3 = sadd.s32 4294967295, %s7914_s0  }
  0x72   : > { %9573 = sst [smem:[#allocation67_spill]] %s7910_s2  ;;  %s9455_s24 = sadd.s32 4294967294, %s7914_s0  }
  0x73   : > { %s8233_s27 = sadd.s32 1, %s7914_s0   ;;  %s826_s7 = sadd.s32 1, %s7910_s2 }
  0x74   : > { %9574 = sst [smem:[#allocation68_spill]] %s8233_s27  ;;  %s823_s11 = ssub.s32 %s7914_s0, %s8233_s27 }
  0x75   : > { %p836_p0 = scmp.ne.s32.totalorder %s7910_s2, %s7906_s1  ;;  %p824_p1 = scmp.eq.s32.totalorder %s823_s11, 0 }
  0x76   : > { %p837_p2 = scmp.eq.s32.totalorder %s8229_s3, 1  ;;  %p842_p3 = scmp.ne.s32.totalorder %s7906_s1, %s7902_s14 }
  0x77   : > { %p843_p4 = scmp.eq.s32.totalorder %s9455_s24, 1  ;;  %p6590_p7 = scmp.ge.s32.totalorder %s7914_s0, 1 }
  0x78   : > { %s8246_s8 = scalar_select %p824_p1, %s7910_s2, %s826_s7  }
  0x79   : > { %p8248_p5 = por %p837_p2, %p836_p0  ;;  %p8252_p6 = por %p843_p4, %p842_p3 }
  0x7a   : > { %9575 = sst [smem:[#allocation69_spill]] %s8246_s8  ;;  %p1250_p8 = scmp.lt.s32.totalorder %s7914_s0, 3 }
  0x7b   : > { %s9577_s18 = scalar_select %p8252_p6, 1, 0 }
  0x7c   : > { %p1251_p9 = pnand %p6590_p7, %p1250_p8 }
  0x7d   : > { %9578 = sst [smem:[#allocation70_spill]] %s9577_s18  ;;  %v6851_v3 = vld [vmem:[%s9570_s9 + $0x8] sm:$0xff] (!%p1251_p9)   ;;  %p1404_p10 = scmp.lt.s32.totalorder (!%p1251_p9), %s8229_s3, 1  ;;  %v7960_v4 = vmov (!%p1251_p9), 0   ;;  %vm1419_vm0 = vcmask (!%p1251_p9), 8192   ;;  %vm9489_vm1 = vcmask (!%p1251_p9), 15360   ;;  %v1428_v15 = vlaneseq (!%p1251_p9) }
  0x7e   : > { %1254 = sbr.rel (%p1251_p9) target bundleno = 6923 (0x1b0b), region = 152  ;;  %s9579_s5 = sld [smem:[#allocation25_spill]] (!%p1251_p9)  ;;  %7470 = vset.pattern.permute.xlu1 (!%p1251_p9), %v7960_v4  ;;  %v6833_v5 = vunpack.c.l.bf16 (!%p1251_p9), %v6851_v3  ;;  %7469 = vset.pattern.permute.xlu0 (!%p1251_p9), %v7960_v4  ;;  %v6834_v6 = vunpack.c.h.bf16 (!%p1251_p9), %v6851_v3  ;;  %v1440_v7 = vld [vmem:[%s9570_s9 + $0x10] sm:$0xf] (!%p1251_p9)  ;;  %v7961_v8 = vmov (!%p1251_p9), 0.0   ;;  %v6828_v9 = vld [vmem:[%s9570_s9] sm:$0xff] (!%p1251_p9)  }
  0x7f   : > { %1692 = vmatprep.mubr.bf16.mxu0 (!%p1251_p9), %v7960_v4  ;;  %s9580_s6 = sld [smem:[#allocation38_spill]] (!%p1251_p9)  ;;  %1420 = vst.msk [vmem:[#allocation2] sm:$0x1] (!%p1251_p9), %vm1419_vm0, %v7961_v8  ;;  %s9456_s7 = smov (!%p1251_p9), 2   ;;  %v1445_v11 = vunpack.c.l.bf16 (!%p1251_p9), %v1440_v7  ;;  %v6830_v12 = vunpack.c.h.bf16 (!%p1251_p9), %v6828_v9  ;;  %v6829_v14 = vunpack.c.l.bf16 (!%p1251_p9), %v6828_v9  ;;  %vm8277_vm2 = vcmp.ge.s32.totalorder (!%p1251_p9), %v1428_v15, 2  ;;  %v6836_v17 = vld [vmem:[%s9562_s25] sm:$0xff] (!%p1251_p9)  }
  0x80   : > { %1508 = vperm.xlu1 (!%p1251_p9), %7470, %v6833_v5   ;;  %2302 = vst.msk [vmem:[#allocation2 + $0x18] sm:$0xff] (!%p1251_p9), %vm9489_vm1, %v7961_v8  ;;  %vm8282_vm3 = vcmp.lt.s32.totalorder (!%p1251_p9), %v1428_v15, 258  ;;  %vm1434_vm5 = vcmask (!%p1251_p9), 24592   ;;  %v8302_v21 = vshrl.u32 (!%p1251_p9), %v1428_v15, 7  ;;  %s9466_s11 = smov (!%p1251_p9), 127   ;;  %vm9488_vm6 = vcmask (!%p1251_p9), 23552  }
  0x81   : > { %vm1431_vm4 = vmand (!%p1251_p9), %vm8277_vm2, %vm8282_vm3  ;;  %s9458_s24 = smov (!%p1251_p9), 124   ;;  %vm1499_vm7 = vcmask (!%p1251_p9), 1039360   ;;  %vm1523_vm8 = vcmask (!%p1251_p9), 1031168   ;;  %vm1547_vm9 = vcmask (!%p1251_p9), 1022976   ;;  %vm9481_vm10 = vcmask (!%p1251_p9), 1014784   ;;  %s9471_s9 = smov (!%p1251_p9), 122  }
  0x82   : > { %v8305_v22 = vsub.s32 (!%p1251_p9), 0, %v8302_v21  ;;  %v8308_v23 = vsub.s32 (!%p1251_p9), 1, %v8302_v21  ;;  %v8313_v27 = vsub.s32 (!%p1251_p9), 2, %v8302_v21  ;;  %vm9478_vm13 = vcmask (!%p1251_p9), 1047576   ;;  %s9590_s4 = sld [smem:[#allocation41_spill]] (!%p1251_p9)  ;;  %s9628_s8 = sld [smem:[#allocation34_spill]] (!%p1251_p9) }
  0x83   : > { %vm1610_vm14 = vcmask (!%p1251_p9), 48152   ;;  %vm9476_vm15 = vcmask (!%p1251_p9), 1043456   ;;  %vm9482_vm3 = vcmask (!%p1251_p9), 1040384   ;;  %s9640_s2 = sld [smem:[#allocation35_spill]] (!%p1251_p9) }
  0x84   : > { %1532 = vperm.xlu1 (!%p1251_p9), %7470, %v6834_v6  }
  0x85   : > { %s8263_s23 = scalar_select %p1404_p10, %s8229_s3, 1  ;;  %v1578_v13 = vld [vmem:[%s9580_s6] sm:$0xff] }
  0x86   : > { %s9587_s6 = smov 124  }
  0x87   : > { %s6600_s19 = sshll.u32 %s8263_s23, 1 }
  0x88   : > { %s1407_s26 = scalar_lea.vmem %s9579_s5, %s6600_s19  ;;  %1556 = vperm.xlu1 %7470, %v1445_v11   ;;  %s9462_s19 = smov 126  }
  0x89   : > { %v1418_v10 = vld [vmem:[%s1407_s26] sm:$0x3]  ;;  %s9460_s26 = smov 125   ;;  %s9586_s5 = smov 125  }
  0x8a   : > { %1422 = vrot.lane.b32.xlu0 %v1418_v10, %s9456_s7  ;;  %s8339_s7 = sand.u32 1, %s7906_s1   ;;  %s9641_s27 = smov %s9640_s2 }
  0x8c   : > { %1581 = vperm.xlu1 %7470, %v1578_v13  }
  0x8e   : > { %1468 = vperm.xlu0 %7469, %v6830_v12  }
  0x92   : > { %1449 = vperm.xlu0 %7469, %v6829_v14  }
  0xfc   : > { %v1423_v18 = vpop.permute.xlu0 %1422 }
  0xfd   : > { %v1424_v19 = vrot.slane %v1423_v18, 7 }
  0xff   : > { %v8291_v20 = vsel %vm9489_vm1, %v1424_v19, %v1423_v18  ;;  %v1509_v31 = vpop.permute.xlu1 %1508 }
 0x100   : > { %1432 = vst.msk [vmem:[#allocation2] ss:$8 sm:$0x7] %vm1431_vm4, %v8291_v20 }
 0x101   : > { %1435 = vst.msk [vmem:[#allocation2 + $0x10] sm:$0x1] %vm1434_vm5, %v7961_v8 }
 0x103   : > { %v1533_v35 = vpop.permute.xlu1 %1532 }
 0x107   : > { %v1557_v40 = vpop.permute.xlu1 %1556  ;;  %v1446_v43 = vld [vmem:[#allocation2] ss:$8 sm:$0x3] }
 0x108   : > { %v1465_v24 = vld [vmem:[#allocation2] ss:$8 sm:$0x7]  ;;  %v1456_v54 = vrot.slane %v1446_v43, %v8305_v22  ;;  %v1460_v55 = vrot.slane %v1446_v43, %v8308_v23 }
 0x109   : > { %v1479_v25 = vrot.slane %v1465_v24, %v8308_v23  ;;  %v1475_v26 = vrot.slane %v1465_v24, %v8305_v22  ;;  %v1483_v32 = vrot.slane %v1465_v24, %v8313_v27  ;;  %1595 = vst.msk [vmem:[#allocation2] sm:$0xff] %vm9488_vm6, %v7961_v8  ;;  %v7479_v43 = vld [vmem:[%s9563_s22] sm:$0xff]  }
 0x10b   : > { %v1511_v33 = vmul.f32 %v1509_v31, %v1475_v26  ;;  %v1513_v36 = vmul.f32 %v1509_v31, %v1483_v32  ;;  %v1512_v37 = vmul.f32 %v1509_v31, %v1479_v25  ;;  %v1535_v38 = vmul.f32 %v1533_v35, %v1475_v26  ;;  %v1582_v46 = vpop.permute.xlu1 %1581 }
 0x10c   : > { %v1536_v39 = vmul.f32 %v1533_v35, %v1479_v25  ;;  %v1537_v41 = vmul.f32 %v1533_v35, %v1483_v32  ;;  %v1559_v42 = vmul.f32 %v1557_v40, %v1475_v26  ;;  %v1560_v44 = vmul.f32 %v1557_v40, %v1479_v25 }
 0x10d   : > { %v1469_v28 = vpop.permute.xlu0 %1468  ;;  %v1561_v45 = vmul.f32 %v1557_v40, %v1483_v32  ;;  %v2145_v40 = vld [vmem:[%s9569_s12 + $0x8] sm:$0xff] }
 0x10e   : > { %v1488_v29 = vmul.f32 %v1479_v25, %v1469_v28  ;;  %v1487_v30 = vmul.f32 %v1475_v26, %v1469_v28  ;;  %v1489_v34 = vmul.f32 %v1483_v32, %v1469_v28 }
 0x110   : > { %1495 = vrot.lane.b32.xlu0 %v1488_v29, %s9466_s11  ;;  %1493 = vrot.lane.b32.xlu1 %v1487_v30, %s9466_s11 }
 0x111   : > { %v1450_v47 = vpop.permute.xlu0 %1449 }
 0x112   : > { %v1463_v60 = vmul.f32 %v1456_v54, %v1450_v47  ;;  %v1464_v61 = vmul.f32 %v1460_v55, %v1450_v47  ;;  %v7483_v47 = vld [vmem:[%s9563_s22 + $0x10] sm:$0xff]  }
 0x113   : > { %v7490_v54 = vld [vmem:[%s9563_s22 + $0x70] sm:$0xff]  }
 0x114   : > { %1517 = vrot.lane.b32.xlu0 %v1511_v33, %s9462_s19  ;;  %1497 = vrot.lane.b32.xlu1 %v1489_v34, %s9466_s11 }
 0x118   : > { %1521 = vrot.lane.b32.xlu0 %v1513_v36, %s9462_s19  ;;  %1519 = vrot.lane.b32.xlu1 %v1512_v37, %s9462_s19 }
 0x11c   : > { %1541 = vrot.lane.b32.xlu0 %v1535_v38, %s9460_s26  ;;  %1543 = vrot.lane.b32.xlu1 %v1536_v39, %s9460_s26 }
 0x120   : > { %1545 = vrot.lane.b32.xlu0 %v1537_v41, %s9460_s26  ;;  %1565 = vrot.lane.b32.xlu1 %v1559_v42, %s9458_s24  ;;  %s9464_s26 = smov 3   ;;  %v2144_v41 = vld [vmem:[%s9569_s12] sm:$0xff]  ;;  %s9589_s12 = smov 127  }
 0x121   : > { %v7478_v42 = vld [vmem:[%s9563_s22 + $0x40] sm:$0xff]  }
 0x122   : > { %6854 = vmatprep.subr.bf16.mxu1 %v7478_v42 }
 0x123   : > { %6855 = vmatpush3.bf16.msra.mxu1 %v7479_v43 }
 0x124   : > { %1567 = vrot.lane.b32.xlu0 %v1560_v44, %s9458_s24  ;;  %1569 = vrot.lane.b32.xlu1 %v1561_v45, %s9458_s24  ;;  %s8344_s24 = sshll.u32 %s8339_s7, 4  ;;  %v7480_v44 = vld [vmem:[%s9563_s22 + $0x48] sm:$0xff]  }
 0x125   : > { %s8348_s19 = scalar_lea.vmem [#allocation6], %s8344_s24  ;;  %v7481_v45 = vld [vmem:[%s9563_s22 + $0x8] sm:$0xff]   ;;  %6856 = vmatprep.subr.bf16.mxu1 %v7480_v44  ;;  %v7477_v44 = vld [vmem:[%s9568_s13 + $0x30] sm:$0xff]  }
 0x127   : > { %6857 = vmatpush3.bf16.msra.mxu1 %v7481_v45  ;;  %v7491_v45 = vld [vmem:[%s9563_s22 + $0x30] sm:$0xff]  }
 0x182   : > { %v1494_v48 = vpop.permute.xlu1 %1493  ;;  %v1496_v49 = vpop.permute.xlu0 %1495 }
 0x183   : > { %v1500_v58 = vsel %vm1499_vm7, %v1494_v48, %v1496_v49  ;;  %v7484_v48 = vld [vmem:[%s9563_s22 + $0x58] sm:$0xff]  }
 0x184   : > { %v1504_v0 = vadd.f32 %v1500_v58, %v1463_v60 }
 0x186   : > { %v1498_v50 = vpop.permute.xlu1 %1497  ;;  %v1518_v51 = vpop.permute.xlu0 %1517 }
 0x187   : > { %v1501_v59 = vsel %vm1499_vm7, %v1496_v49, %v1498_v50  ;;  %v7485_v49 = vld [vmem:[%s9563_s22 + $0x18] sm:$0xff]   ;;  %v7486_v50 = vld [vmem:[%s9563_s22 + $0x60] sm:$0xff]  }
 0x188   : > { %v1505_v1 = vadd.f32 %v1501_v59, %v1464_v61 }
 0x18a   : > { %v1520_v52 = vpop.permute.xlu1 %1519  ;;  %v1522_v53 = vpop.permute.xlu0 %1521 }
 0x18b   : > { %v1524_v62 = vsel %vm1523_vm8, %v1518_v51, %v1520_v52  ;;  %v1525_v63 = vsel %vm1523_vm8, %v1520_v52, %v1522_v53  ;;  %v7487_v51 = vld [vmem:[%s9563_s22 + $0x20] sm:$0xff]   ;;  %v7488_v52 = vld [vmem:[%s9563_s22 + $0x68] sm:$0xff]  }
 0x18c   : > { %v1528_v7 = vadd.f32 %v1524_v62, %v1504_v0  ;;  %v1529_v9 = vadd.f32 %v1525_v63, %v1505_v1  ;;  %v7489_v53 = vld [vmem:[%s9563_s22 + $0x28] sm:$0xff]  }
 0x18d   : > { %v7471_v62 = vld [vmem:[%s9568_s13 + $0x8] sm:$0xff]  }
 0x18e   : > { %v1544_v56 = vpop.permute.xlu1 %1543  ;;  %v1542_v57 = vpop.permute.xlu0 %1541 }
 0x18f   : > { %v1548_v5 = vsel %vm1547_vm9, %v1542_v57, %v1544_v56 }
 0x190   : > { %v1552_v10 = vadd.f32 %v1548_v5, %v1528_v7  ;;  %v7472_v5 = vld [vmem:[%s9568_s13] sm:$0xff]  }
 0x192   : > { %v1566_v2 = vpop.permute.xlu1 %1565  ;;  %v1546_v3 = vpop.permute.xlu0 %1545 }
 0x193   : > { %v1549_v6 = vsel %vm1547_vm9, %v1544_v56, %v1546_v3 }
 0x194   : > { %v1553_v11 = vadd.f32 %v1549_v6, %v1529_v9 }
 0x196   : > { %v1570_v12 = vpop.permute.xlu1 %1569  ;;  %v1568_v13 = vpop.permute.xlu0 %1567 }
 0x197   : > { %v1572_v14 = vsel %vm9481_vm10, %v1566_v2, %v1568_v13  ;;  %v1573_v18 = vsel %vm9481_vm10, %v1568_v13, %v1570_v12  ;;  %v7473_v13 = vld [vmem:[%s9568_s13 + $0x10] sm:$0xff]  }
 0x198   : > { %v1576_v19 = vadd.f32 %v1572_v14, %v1552_v10  ;;  %v1577_v24 = vadd.f32 %v1573_v18, %v1553_v11 }
 0x19a   : > { %v1585_v25 = vadd.f32 %v1582_v46, %v1577_v24  ;;  %v1584_v26 = vadd.f32 %v1582_v46, %v1576_v19  ;;  %v7482_v46 = vld [vmem:[%s9563_s22 + $0x50] sm:$0xff]  }
 0x19b   : > { %6858 = vmatprep.subr.bf16.mxu1 %v7482_v46  ;;  %v7492_v46 = vld [vmem:[%s9563_s22 + $0x78] sm:$0xff]  }
 0x19c   : > { %vm1587_vm11 = vcmp.ge.f32.partialorder %v1585_v25, 0.0  ;;  %v1589_v28 = vmul.f32 0.1, %v1585_v25  ;;  %vm1586_vm12 = vcmp.ge.f32.partialorder %v1584_v26, 0.0  ;;  %v1588_v29 = vmul.f32 0.1, %v1584_v26  ;;  %6859 = vmatpush3.bf16.msra.mxu1 %v7483_v47 }
 0x19d   : > { %6860 = vmatprep.subr.bf16.mxu1 %v7484_v48  ;;  %v7493_v47 = vld [vmem:[%s9563_s22 + $0x38] sm:$0xff]   ;;  %s9616_s22 = sld [smem:[#allocation50_spill]] }
 0x19e   : > { %v1591_v30 = vsel %vm1587_vm11, %v1585_v25, %v1589_v28  ;;  %v1590_v31 = vsel %vm1586_vm12, %v1584_v26, %v1588_v29  ;;  %vm9475_vm11 = vcmask 64512   ;;  %v7474_v28 = vld [vmem:[%s9568_s13 + $0x18] sm:$0xff]   ;;  %vm9470_vm12 = vcmask 1006592  }
 0x19f   : > { %1600 = vrot.lane.b32.xlu1 %v1591_v30, %s9464_s26  ;;  %1593 = vst [vmem:[%s8348_s19 + $0x8] sm:$0xff] %v1591_v30  ;;  %1598 = vrot.lane.b32.xlu0 %v1590_v31, %s9464_s26  ;;  %1592 = vst [vmem:[%s8348_s19] sm:$0xff] %v1590_v31  ;;  %s9585_s26 = smov 126  }
 0x1a0   : > { %6861 = vmatpush3.bf16.msra.mxu1 %v7485_v49 }
 0x1a1   : > { %6862 = vmatprep.subr.bf16.mxu1 %v7486_v50 }
 0x1a4   : > { %6863 = vmatpush3.bf16.msra.mxu1 %v7487_v51 }
 0x1a5   : > { %6864 = vmatprep.subr.bf16.mxu1 %v7488_v52 }
 0x1a8   : > { %6865 = vmatpush3.bf16.msra.mxu1 %v7489_v53 }
 0x1a9   : > { %6866 = vmatprep.subr.bf16.mxu1 %v7490_v54 }
 0x1ac   : > { %6867 = vmatpush3.bf16.msra.mxu1 %v7491_v45 }
 0x1ad   : > { %6868 = vmatprep.subr.bf16.mxu1 %v7492_v46 }
 0x1b0   : > { %6869 = vmatpush3.bf16.msra.mxu1 %v7493_v47  ;;  %v7498_v47 = vld [vmem:[%s9567_s17 + $0x20] sm:$0xff]  }
 0x1b1   : > { %6963 = vmatprep.subr.bf16.mxu1 %v7961_v8 }
 0x211   : > { %v1601_v32 = vpop.permute.xlu1 %1600  ;;  %v1599_v33 = vpop.permute.xlu0 %1598 }
 0x212   : > { %1609 = vst.msk [vmem:[#allocation2 + $0x10] sm:$0xff] %vm9488_vm6, %v1601_v32  ;;  %v1602_v34 = vsel %vm9488_vm6, %v1599_v33, %v1601_v32 }
 0x213   : > { %1607 = vst.msk [vmem:[#allocation2] sm:$0xff] %vm9478_vm13, %v1599_v33  ;;  %1608 = vst [vmem:[#allocation2 + $0x8] sm:$0xff] %v1602_v34  ;;  %v8357_v35 = vpack.c.bf16 %v1602_v34, %v1602_v34 }
 0x214   : > { %1611 = vst.msk [vmem:[#allocation2 + $0x10] sm:$0xff] %vm1610_vm14, %v7961_v8  ;;  %vm9469_vm14 = vcmask 998400  }
 0x215   : > { %1642 = vrot.lane.b32.xlu1 %v8357_v35, %s9466_s11 }
 0x21a   : > { %v1626_v36 = vld [vmem:[#allocation2] sm:$0xff] }
 0x21b   : > { %v8361_v37 = vpack.c.bf16 %v1626_v36, %v1626_v36  ;;  %2301 = vst.msk [vmem:[#allocation2] sm:$0xff] %vm9489_vm1, %v7961_v8  ;;  %v1630_v38 = vld [vmem:[#allocation2 + $0x10] sm:$0xff] }
 0x21c   : > { %v1631_v39 = vpack.c.bf16 %v1630_v38, %v1630_v38 }
 0x21d   : > { %1640 = vrot.lane.b32.xlu0 %v8361_v37, %s9466_s11  ;;  %1765 = vrot.lane.b32.xlu1 %v8361_v37, %s9585_s26  ;;  %v1712_v1 = vsel %vm9476_vm15, %v8361_v37, 0 }
 0x221   : > { %1644 = vrot.lane.b32.xlu0 %v1631_v39, %s9466_s11  ;;  %1769 = vrot.lane.b32.xlu1 %v1631_v39, %s9585_s26  ;;  %s9473_s11 = smov 123  }
 0x225   : > { %1767 = vrot.lane.b32.xlu0 %v8357_v35, %s9585_s26  ;;  %1837 = vrot.lane.b32.xlu1 %v8357_v35, %s9586_s5 }
 0x229   : > { %1835 = vrot.lane.b32.xlu0 %v8361_v37, %s9586_s5  ;;  %1905 = vrot.lane.b32.xlu1 %v8361_v37, %s9587_s6 }
 0x22d   : > { %1839 = vrot.lane.b32.xlu0 %v1631_v39, %s9586_s5  ;;  %1909 = vrot.lane.b32.xlu1 %v1631_v39, %s9587_s6 }
 0x231   : > { %1907 = vrot.lane.b32.xlu0 %v8357_v35, %s9587_s6  ;;  %1977 = vrot.lane.b32.xlu1 %v8357_v35, %s9473_s11 }
 0x235   : > { %1975 = vrot.lane.b32.xlu0 %v8361_v37, %s9473_s11  ;;  %2045 = vrot.lane.b32.xlu1 %v8361_v37, %s9471_s9 }
 0x239   : > { %1979 = vrot.lane.b32.xlu0 %v1631_v39, %s9473_s11  ;;  %2049 = vrot.lane.b32.xlu1 %v1631_v39, %s9471_s9  ;;  %s8463_s11 = scalar_lea.vmem [#allocation8], %s8344_s24 }
 0x23d   : > { %2047 = vrot.lane.b32.xlu0 %v8357_v35, %s9471_s9  ;;  %2153 = vperm.xlu1 %7470, %v2145_v40   ;;  %s9588_s9 = smov 2  }
 0x241   : > { %2148 = vperm.xlu0 %7469, %v2144_v41   ;;  %v7476_v41 = vld [vmem:[%s9568_s13 + $0x28] sm:$0xff]  }
 0x287   : > { %v1643_v56 = vpop.permute.xlu1 %1642 }
 0x28f   : > { %v1641_v55 = vpop.permute.xlu0 %1640  ;;  %v1766_v59 = vpop.permute.xlu1 %1765 }
 0x290   : > { %v1647_v57 = vsel %vm1499_vm7, %v1641_v55, %v1643_v56 }
 0x291   : > { %v1655_v61 = vsel %vm9476_vm15, %v1647_v57, 0 }
 0x293   : > { %v1645_v58 = vpop.permute.xlu0 %1644  ;;  %v1770_v0 = vpop.permute.xlu1 %1769 }
 0x294   : > { %v1648_v60 = vsel %vm1499_vm7, %v1643_v56, %v1645_v58 }
 0x295   : > { %6602 = vmatprep.subr.msk.bf16.mxu0 %vm9476_vm15, %v1648_v60 }
 0x296   : > { %1661 = vmatpush1.bf16.msra.mxu0 %v1655_v61 }
 0x297   : > { %v1768_v63 = vpop.permute.xlu0 %1767  ;;  %6605 = vmatprep.subr.msk.bf16.mxu0 %vm9476_vm15, %v8357_v35  ;;  %v1838_v9 = vpop.permute.xlu1 %1837  ;;  %v7475_v35 = vld [vmem:[%s9568_s13 + $0x20] sm:$0xff]   ;;  %s9483_s13 = smov 1  }
 0x298   : > { %v1773_v2 = vsel %vm1523_vm8, %v1768_v63, %v1770_v0  ;;  %v1772_v6 = vsel %vm1523_vm8, %v1766_v59, %v1768_v63 }
 0x299   : > { %6603 = vmatmul.mubr.msk.bf16.vlgmr.msra.gmra.mrb[0].mxu0 %vm9475_vm11, %v7471_v62  ;;  %v1778_v10 = vsel %vm9476_vm15, %v1772_v6, 0 }
 0x29a   : > { %1718 = vmatpush1.bf16.msra.mxu0 %v1712_v1  ;;  %1749 = vmatprep.mubr.bf16.mxu0 %v7960_v4 }
 0x29b   : > { %6608 = vmatprep.subr.msk.bf16.mxu0 %vm9476_vm15, %v1773_v2  ;;  %v1836_v3 = vpop.permute.xlu0 %1835  ;;  %v1906_v12 = vpop.permute.xlu1 %1905 }
 0x29c   : > { %v1842_v14 = vsel %vm1547_vm9, %v1836_v3, %v1838_v9 }
 0x29d   : > { %v1848_v24 = vsel %vm9476_vm15, %v1842_v14, 0  ;;  %v2630_v14 = vld [vmem:[%s9565_s20] sm:$0xff] }
 0x29f   : > { %v1840_v7 = vpop.permute.xlu0 %1839  ;;  %v1910_v19 = vpop.permute.xlu1 %1909 }
 0x2a0   : > { %v1843_v11 = vsel %vm1547_vm9, %v1838_v9, %v1840_v7 }
 0x2a3   : > { %v1908_v18 = vpop.permute.xlu0 %1907  ;;  %v1978_v31 = vpop.permute.xlu1 %1977 }
 0x2a4   : > { %v1913_v25 = vsel %vm9481_vm10, %v1908_v18, %v1910_v19  ;;  %v1912_v29 = vsel %vm9481_vm10, %v1906_v12, %v1908_v18  ;;  %v2631_v18 = vld [vmem:[%s9565_s20 + $0x8] sm:$0xff]  ;;  %v7499_v19 = vld [vmem:[%s9561_s28] sm:$0xff]   ;;  %s9598_s20 = smov 123  }
 0x2a5   : > { %6606 = vmatmul.mubr.msk.bf16.vlgmr.msra.gmra.mrb[0].mxu0 %vm9475_vm11, %v7472_v5  ;;  %v1918_v32 = vsel %vm9476_vm15, %v1912_v29, 0  ;;  %v7504_v29 = vld [vmem:[%s9561_s28 + $0x28] sm:$0xff]  }
 0x2a6   : > { %1784 = vmatpush1.bf16.msra.mxu0 %v1778_v10  ;;  %1815 = vmatprep.mubr.bf16.mxu0 %v7960_v4 }
 0x2a7   : > { %6611 = vmatprep.subr.msk.bf16.mxu0 %vm9476_vm15, %v1843_v11  ;;  %v1976_v26 = vpop.permute.xlu0 %1975  ;;  %v2046_v34 = vpop.permute.xlu1 %2045 }
 0x2a8   : > { %v1982_v36 = vsel %vm9470_vm12, %v1976_v26, %v1978_v31  ;;  %v7502_v26 = vld [vmem:[%s9561_s28 + $0x18] sm:$0xff]  }
 0x2a9   : > { %v1988_v39 = vsel %vm9476_vm15, %v1982_v36, 0 }
 0x2ab   : > { %v1980_v30 = vpop.permute.xlu0 %1979  ;;  %v2050_v38 = vpop.permute.xlu1 %2049 }
 0x2ac   : > { %v1983_v33 = vsel %vm9470_vm12, %v1978_v31, %v1980_v30  ;;  %v7505_v30 = vld [vmem:[%s9561_s28 + $0x30] sm:$0xff]  }
 0x2af   : > { %v2048_v37 = vpop.permute.xlu0 %2047 }
 0x2b0   : > { %v2053_v40 = vsel %vm9469_vm14, %v2048_v37, %v2050_v38  ;;  %v2052_v42 = vsel %vm9469_vm14, %v2046_v34, %v2048_v37  ;;  %v7494_v34 = vld [vmem:[%s9567_s17 + $0x8] sm:$0xff]  }
 0x2b1   : > { %6609 = vmatmul.mubr.msk.bf16.vlgmr.msra.gmra.mrb[0].mxu0 %vm9475_vm11, %v7473_v13  ;;  %v2058_v43 = vsel %vm9476_vm15, %v2052_v42, 0 }
 0x2b2   : > { %1854 = vmatpush1.bf16.msra.mxu0 %v1848_v24  ;;  %1885 = vmatprep.mubr.bf16.mxu0 %v7960_v4  ;;  %v7500_v24 = vld [vmem:[%s9561_s28 + $0x8] sm:$0xff]  }
 0x2b3   : > { %6614 = vmatprep.subr.msk.bf16.mxu0 %vm9476_vm15, %v1913_v25  ;;  %v7501_v25 = vld [vmem:[%s9561_s28 + $0x10] sm:$0xff]  }
 0x2bc   : > { %v2154_v62 = vpop.permute.xlu1 %2153 }
 0x2bd   : > { %6612 = vmatmul.mubr.msk.bf16.vlgmr.msra.gmra.mrb[0].mxu0 %vm9475_vm11, %v7474_v28  ;;  %v7503_v28 = vld [vmem:[%s9561_s28 + $0x20] sm:$0xff]  }
 0x2be   : > { %1924 = vmatpush1.bf16.msra.mxu0 %v1918_v32  ;;  %1955 = vmatprep.mubr.bf16.mxu0 %v7960_v4 }
 0x2bf   : > { %6617 = vmatprep.subr.msk.bf16.mxu0 %vm9476_vm15, %v1983_v33 }
 0x2c0   : > { %v2149_v58 = vpop.permute.xlu0 %2148 }
 0x2c9   : > { %6615 = vmatmul.mubr.msk.bf16.vlgmr.msra.gmra.mrb[0].mxu0 %vm9475_vm11, %v7475_v35  ;;  %v7495_v35 = vld [vmem:[%s9567_s17] sm:$0xff]  }
 0x2ca   : > { %1994 = vmatpush1.bf16.msra.mxu0 %v1988_v39  ;;  %2025 = vmatprep.mubr.bf16.mxu0 %v7960_v4  ;;  %v7496_v39 = vld [vmem:[%s9567_s17 + $0x10] sm:$0xff]  }
 0x2cb   : > { %6620 = vmatprep.subr.msk.bf16.mxu0 %vm9476_vm15, %v2053_v40  ;;  %vm2316_vm15 = vcmask 31760  }
 0x2d5   : > { %6618 = vmatmul.mubr.msk.bf16.vlgmr.msra.gmra.mrb[0].mxu0 %vm9475_vm11, %v7476_v41 }
 0x2d6   : > { %2064 = vmatpush1.bf16.msra.mxu0 %v2058_v43  ;;  %2095 = vmatprep.mubr.bf16.mxu0 %v7960_v4  ;;  %v7497_v43 = vld [vmem:[%s9567_s17 + $0x18] sm:$0xff]   ;;  %s8545_s17 = scalar_lea.vmem [#allocation10], %s8344_s24 }
 0x2d7   : > { %6993 = vmatprep.subr.bf16.mxu0 %v7961_v8 }
 0x2e1   : > { %6621 = vmatmul.mubr.msk.bf16.vlgmr.msra.gmra.mrb[0].mxu0 %vm9475_vm11, %v7477_v44  ;;  %vm2311_vm11 = vcmask 1047568  }
 0x2e2   : > { %6994 = vmatpush3.bf16.msra.mxu0 %v7499_v19 }
 0x2e3   : > { %6995 = vmatprep.subr.bf16.mxu0 %v7961_v8 }
 0x2e6   : > { %6996 = vmatpush3.bf16.msra.mxu0 %v7500_v24 }
 0x2e7   : > { %6997 = vmatprep.subr.bf16.mxu0 %v7961_v8 }
 0x2ea   : > { %6998 = vmatpush3.bf16.msra.mxu0 %v7501_v25 }
 0x2eb   : > { %6999 = vmatprep.subr.bf16.mxu0 %v7961_v8 }
 0x2ee   : > { %7000 = vmatpush3.bf16.msra.mxu0 %v7502_v26  ;;  %v2759_v26 = vld [vmem:[%s9564_s21 + $0x1] sm:$0x1] }
 0x2ef   : > { %7001 = vmatprep.subr.bf16.mxu0 %v7961_v8 }
 0x2f2   : > { %7002 = vmatpush3.bf16.msra.mxu0 %v7503_v28  ;;  %v7509_v28 = vld [vmem:[%s9566_s10 + $0x4] ss:$8 sps:$4 sm:$0xff]  }
 0x2f3   : > { %7003 = vmatprep.subr.bf16.mxu0 %v7961_v8 }
 0x2f6   : > { %7004 = vmatpush3.bf16.msra.mxu0 %v7504_v29 }
 0x2f7   : > { %7005 = vmatprep.subr.bf16.mxu0 %v7961_v8 }
 0x2fa   : > { %7006 = vmatpush3.bf16.msra.mxu0 %v7505_v30 }
 0x2fb   : > { %7007 = vmatprep.subr.bf16.mxu0 %v7961_v8 }
 0x3b4   : > { %v2097_v48 = vpop.f32.mrb[0].mxu0 }
 0x3b5   : > { %v2099_v49 = vpop.f32.mrb[1].mxu0 }
 0x3b6   : > { %v2101_v50 = vpop.f32.mrb[2].mxu0 }
 0x3b7   : > { %v2110_v51 = vpack.c.bf16 %v2101_v50, %v2097_v48  ;;  %v2103_v52 = vpop.f32.mrb[3].mxu0  ;;  %v7506_v48 = vld [vmem:[%s9561_s28 + $0x38] sm:$0xff]   ;;  %s9624_s28 = sld [smem:[#allocation32_spill]] }
 0x3b8   : > { %v2111_v53 = vpack.c.bf16 %v2103_v52, %v2099_v49  ;;  %7008 = vmatpush3.bf16.msra.mxu0 %v7506_v48 }
 0x3b9   : > { %7025 = vmatprep.subr.bf16.mxu0 %v7961_v8 }
 0x3ba   : > { %2284 = vmatprep.mubr.bf16.mxu1 %v2111_v53 }
 0x3bb   : > { %2285 = vmatmul.mubr.bf16.vlgmr.msra.gmra.mrb[0].mxu1 %v2110_v51 }
 0x48e   : > { %v6870_v54 = vpop.f32.mrb[0].mxu1 }
 0x48f   : > { %v6871_v55 = vpop.f32.mrb[1].mxu1 }
 0x490   : > { %v6872_v56 = vadd.f32 %v6871_v55, %v6870_v54  ;;  %v6873_v57 = vpop.f32.mrb[2].mxu1 }
 0x491   : > { %v6874_v59 = vpop.f32.mrb[3].mxu1 }
 0x492   : > { %v2287_v60 = vadd.f32 %v6872_v56, %v2149_v58  ;;  %v6875_v61 = vadd.f32 %v6874_v59, %v6873_v57 }
 0x494   : > { %v2290_v63 = vadd.f32 %v6875_v61, %v2154_v62  ;;  %vm2293_vm14 = vcmp.ge.f32.partialorder %v2287_v60, 0.0  ;;  %v2295_v0 = vmul.f32 0.1, %v2287_v60 }
 0x496   : > { %v2297_v1 = vsel %vm2293_vm14, %v2287_v60, %v2295_v0  ;;  %vm2294_vm12 = vcmp.ge.f32.partialorder %v2290_v63, 0.0  ;;  %v2296_v2 = vmul.f32 0.1, %v2290_v63  ;;  %vm7970_vm14 = vmmov 0  }
 0x497   : > { %2305 = vrot.lane.b32.xlu0 %v2297_v1, %s9588_s9  ;;  %2299 = vst [vmem:[%s8463_s11] sm:$0xff] %v2297_v1  ;;  %6965 = vmatprep.mubr.msk.bf16.mxu1 %vm7970_vm14, %v7961_v8 }
 0x498   : > { %v2298_v3 = vsel %vm2294_vm12, %v2290_v63, %v2296_v2  ;;  %7009 = vmatprep.mubr.msk.bf16.mxu0 %vm7970_vm14, %v7961_v8 }
 0x499   : > { %2307 = vrot.lane.b32.xlu1 %v2298_v3, %s9588_s9  ;;  %2300 = vst [vmem:[%s8463_s11 + $0x8] sm:$0xff] %v2298_v3 }
 0x509   : > { %v2306_v5 = vpop.permute.xlu0 %2305 }
 0x50a   : > { %2312 = vst.msk [vmem:[#allocation2] sm:$0xff] %vm2311_vm11, %v2306_v5 }
 0x50b   : > { %2313 = vst.msk [vmem:[#allocation2 + $0x8] sm:$0xff] %vm9489_vm1, %v2306_v5  ;;  %v2308_v6 = vpop.permute.xlu1 %2307 }
 0x50c   : > { %2317 = vst.msk [vmem:[#allocation2 + $0x8] sm:$0xff] %vm2316_vm15, %v7961_v8 }
 0x50d   : > { %2314 = vst.msk [vmem:[#allocation2 + $0x18] sm:$0xff] %vm2311_vm11, %v2308_v6  ;;  %vm2739_vm11 = vcmask 7168  }
 0x50e   : > { %2315 = vst.msk [vmem:[#allocation2 + $0x20] sm:$0xff] %vm9489_vm1, %v2308_v6 }
 0x50f   : > { %2318 = vst.msk [vmem:[#allocation2 + $0x20] sm:$0xff] %vm2316_vm15, %v7961_v8  ;;  %vm2348_vm15 = vcmask 130048  }
 0x511   : > { %v2329_v9 = vld [vmem:[#allocation2] sm:$0xff] }
 0x512   : > { %2740 = vst.msk [vmem:[#allocation2] sm:$0xff] %vm2739_vm11, %v7961_v8 }
 0x513   : > { %v2332_v7 = vld [vmem:[#allocation2 + $0x8] sm:$0xff] }
 0x514   : > { %v2330_v10 = vld [vmem:[#allocation2 + $0x18] sm:$0xff]  ;;  %2755 = vst.msk [vmem:[#allocation2 + $0x8] sm:$0xff] %vm9489_vm1, %v7961_v8 }
 0x515   : > { %v2331_v11 = vpack.c.bf16 %v2330_v10, %v2329_v9  ;;  %2741 = vst.msk [vmem:[#allocation2 + $0x18] sm:$0xff] %vm2739_vm11, %v7961_v8 }
 0x516   : > { %v2333_v12 = vld [vmem:[#allocation2 + $0x20] sm:$0xff] }
 0x517   : > { %v2334_v13 = vpack.c.bf16 %v2333_v12, %v2332_v7  ;;  %2757 = vst.msk [vmem:[#allocation2 + $0x20] sm:$0xff] %vm9489_vm1, %v7961_v8  ;;  %2342 = vrot.lane.b32.xlu0 %v2331_v11, %s9589_s12 }
 0x519   : > { %2344 = vrot.lane.b32.xlu1 %v2334_v13, %s9589_s12 }
 0x51b   : > { %2447 = vrot.lane.b32.xlu0 %v2331_v11, %s9585_s26  ;;  %v2764_v2 = vld [vmem:[#allocation2 + $0x8] sm:$0xff] }
 0x51d   : > { %2449 = vrot.lane.b32.xlu1 %v2334_v13, %s9585_s26 }
 0x51e   : > { %v2765_v60 = vld [vmem:[#allocation2 + $0x20] sm:$0xff] }
 0x51f   : > { %2504 = vrot.lane.b32.xlu0 %v2331_v11, %s9586_s5  ;;  %4482 = vst.msk [vmem:[#allocation2 + $0x20] sm:$0xff] %vm9489_vm1, %v7961_v8  ;;  %v8550_v5 = vpack.c.bf16 %v2765_v60, %v2764_v2  ;;  %v7533_v60 = vld [vmem:[%s9566_s10 + $0x84] ss:$8 sps:$4 sm:$0xff]   ;;  %v7542_v2 = vld [vmem:[%s9566_s10 + $0xb4] ss:$8 sps:$4 sm:$0xff]  }
 0x521   : > { %2506 = vrot.lane.b32.xlu1 %v2334_v13, %s9586_s5 }
 0x523   : > { %2561 = vrot.lane.b32.xlu0 %v2331_v11, %s9587_s6 }
 0x525   : > { %2563 = vrot.lane.b32.xlu1 %v2334_v13, %s9587_s6  ;;  %v8579_v13 = vld [vmem:[%s9562_s25 + $0x8] sm:$0xff]  }
 0x527   : > { %2634 = vperm.xlu0 %7469, %v2630_v14   ;;  %v6842_v14 = vunpack.c.h.bf16 %v8579_v13 }
 0x529   : > { %2639 = vperm.xlu1 %7470, %v2631_v18   ;;  %v6837_v18 = vunpack.c.l.bf16 %v6836_v17 }
 0x589   : > { %v2343_v31 = vpop.permute.xlu0 %2342 }
 0x58b   : > { %v2345_v32 = vpop.permute.xlu1 %2344 }
 0x58c   : > { %v2346_v33 = vsel %vm1499_vm7, %v2343_v31, %v2345_v32 }
 0x58d   : > { %6964 = vmatpush3.bf16.msra.mxu1 %v2346_v33  ;;  %v2448_v36 = vpop.permute.xlu0 %2447 }
 0x58e   : > { %6969 = vmatprep.subr.bf16.mxu1 %v7961_v8 }
 0x58f   : > { %v2450_v37 = vpop.permute.xlu1 %2449 }
 0x590   : > { %6966 = vmatmul.mubr.msk.bf16.vlgmr.msra.gmra.mrb[4].mxu1 %vm2348_vm15, %v7494_v34  ;;  %v2451_v38 = vsel %vm1523_vm8, %v2448_v36, %v2450_v37  ;;  %v7507_v36 = vld [vmem:[%s9566_s10] ss:$8 sps:$4 sm:$0xff]  }
 0x591   : > { %6970 = vmatpush3.bf16.msra.mxu1 %v2331_v11  ;;  %6971 = vmatprep.mubr.msk.bf16.mxu1 %vm7970_vm14, %v7961_v8  ;;  %v2505_v40 = vpop.permute.xlu0 %2504  ;;  %v2758_v37 = vld [vmem:[%s9564_s21] sm:$0x1] }
 0x592   : > { %6975 = vmatprep.subr.bf16.mxu1 %v7961_v8 }
 0x593   : > { %v2507_v41 = vpop.permute.xlu1 %2506 }
 0x594   : > { %v2508_v42 = vsel %vm1547_vm9, %v2505_v40, %v2507_v41  ;;  %v7512_v40 = vld [vmem:[%s9566_s10 + $0x14] ss:$8 sps:$4 sm:$0xff]  }
 0x595   : > { %v2562_v44 = vpop.permute.xlu0 %2561 }
 0x597   : > { %v2564_v45 = vpop.permute.xlu1 %2563 }
 0x598   : > { %v2565_v46 = vsel %vm9481_vm10, %v2562_v44, %v2564_v45  ;;  %vm2753_vm10 = vcmask 1048072   ;;  %v7510_v44 = vld [vmem:[%s9566_s10 + $0x10] ss:$8 sps:$4 sm:$0xff]   ;;  %v7515_v45 = vld [vmem:[%s9566_s10 + $0x24] ss:$8 sps:$4 sm:$0xff]  }
 0x59c   : > { %6972 = vmatmul.mubr.msk.bf16.vlgmr.msra.gmra.mrb[4].mxu1 %vm2348_vm15, %v7495_v35 }
 0x59d   : > { %6976 = vmatpush3.bf16.msra.mxu1 %v2451_v38  ;;  %6977 = vmatprep.mubr.msk.bf16.mxu1 %vm7970_vm14, %v7961_v8 }
 0x59e   : > { %6981 = vmatprep.subr.bf16.mxu1 %v7961_v8 }
 0x5a6   : > { %v2635_v54 = vpop.permute.xlu0 %2634 }
 0x5a8   : > { %6978 = vmatmul.mubr.msk.bf16.vlgmr.msra.gmra.mrb[4].mxu1 %vm2348_vm15, %v7496_v39  ;;  %v2640_v58 = vpop.permute.xlu1 %2639 }
 0x5a9   : > { %6982 = vmatpush3.bf16.msra.mxu1 %v2508_v42  ;;  %6983 = vmatprep.mubr.msk.bf16.mxu1 %vm7970_vm14, %v7961_v8 }
 0x5aa   : > { %6987 = vmatprep.subr.bf16.mxu1 %v7961_v8 }
 0x5b4   : > { %6984 = vmatmul.mubr.msk.bf16.vlgmr.msra.gmra.mrb[4].mxu1 %vm2348_vm15, %v7497_v43 }
 0x5b5   : > { %6988 = vmatpush3.bf16.msra.mxu1 %v2565_v46  ;;  %6989 = vmatprep.mubr.msk.bf16.mxu1 %vm7970_vm14, %v7961_v8 }
 0x5b6   : > { %7013 = vmatprep.subr.bf16.mxu1 %v7961_v8 }
 0x5c0   : > { %6990 = vmatmul.mubr.msk.bf16.vlgmr.msra.gmra.mrb[4].mxu1 %vm2348_vm15, %v7498_v47  ;;  %v7513_v47 = vld [vmem:[%s9566_s10 + $0x20] ss:$8 sps:$4 sm:$0xff]  }
 0x5c1   : > { %7015 = vmatprep.mubr.msk.bf16.mxu1 %vm7970_vm14, %v7961_v8 }
 0x693   : > { %v2604_v49 = vpop.f32.mrb[4].mxu1 }
 0x694   : > { %v6991_v50 = vpop.f32.mrb[5].mxu1 }
 0x695   : > { %v2607_v51 = vpop.f32.mrb[6].mxu1 }
 0x696   : > { %v2613_v52 = vpack.c.bf16 %v2607_v51, %v2604_v49  ;;  %v6992_v53 = vpop.f32.mrb[7].mxu1  ;;  %v7518_v49 = vld [vmem:[%s9566_s10 + $0x34] ss:$8 sps:$4 sm:$0xff]   ;;  %v7516_v51 = vld [vmem:[%s9566_s10 + $0x30] ss:$8 sps:$4 sm:$0xff]  }
 0x697   : > { %v7519_v53 = vld [vmem:[%s9566_s10 + $0x40] ss:$8 sps:$4 sm:$0xff]  }
 0x698   : > { %7010 = vmatmul.mubr.bf16.vlgmr.msra.gmra.mrb[4].mxu0 %v2613_v52  ;;  %v7521_v52 = vld [vmem:[%s9566_s10 + $0x44] ss:$8 sps:$4 sm:$0xff]  }
 0x699   : > { %7027 = vmatprep.mubr.msk.bf16.mxu0 %vm7970_vm14, %v7961_v8 }
 0x76b   : > { %v2724_v55 = vpop.f32.mrb[4].mxu0 }
 0x76c   : > { %v2725_v56 = vadd.f32 %v2724_v55, %v2635_v54  ;;  %v7011_v57 = vpop.f32.mrb[5].mxu0  ;;  %v7524_v54 = vld [vmem:[%s9566_s10 + $0x54] ss:$8 sps:$4 sm:$0xff]   ;;  %v7522_v55 = vld [vmem:[%s9566_s10 + $0x50] ss:$8 sps:$4 sm:$0xff]  }
 0x76d   : > { %v2727_v59 = vpop.f32.mrb[6].mxu0  ;;  %v7525_v57 = vld [vmem:[%s9566_s10 + $0x60] ss:$8 sps:$4 sm:$0xff]  }
 0x76e   : > { %v2733_v61 = vmul.f32 0.1, %v2725_v56  ;;  %v2728_v62 = vadd.f32 %v2727_v59, %v2640_v58  ;;  %v7012_v63 = vpop.f32.mrb[7].mxu0  ;;  %vm2731_vm12 = vcmp.ge.f32.partialorder %v2725_v56, 0.0  ;;  %v7530_v58 = vld [vmem:[%s9566_s10 + $0x74] ss:$8 sps:$4 sm:$0xff]  }
 0x76f   : > { %v7528_v59 = vld [vmem:[%s9566_s10 + $0x70] ss:$8 sps:$4 sm:$0xff]  }
 0x770   : > { %v2734_v0 = vmul.f32 0.1, %v2728_v62  ;;  %v2735_v1 = vsel %vm2731_vm12, %v2725_v56, %v2733_v61  ;;  %vm2732_vm13 = vcmp.ge.f32.partialorder %v2728_v62, 0.0  ;;  %vm2750_vm12 = vcmask 531464   ;;  %v7527_v56 = vld [vmem:[%s9566_s10 + $0x64] ss:$8 sps:$4 sm:$0xff]  }
 0x771   : > { %2744 = vrot.lane.b32.xlu0 %v2735_v1, %s9483_s13  ;;  %2737 = vst [vmem:[%s8545_s17] sm:$0xff] %v2735_v1  ;;  %v7531_v61 = vld [vmem:[%s9566_s10 + $0x80] ss:$8 sps:$4 sm:$0xff]   ;;  %v7534_v63 = vld [vmem:[%s9566_s10 + $0x90] ss:$8 sps:$4 sm:$0xff]  }
 0x772   : > { %v2736_v3 = vsel %vm2732_vm13, %v2728_v62, %v2734_v0  ;;  %v7536_v62 = vld [vmem:[%s9566_s10 + $0x94] ss:$8 sps:$4 sm:$0xff]   ;;  %v7539_v0 = vld [vmem:[%s9566_s10 + $0xa4] ss:$8 sps:$4 sm:$0xff]   ;;  %v7537_v1 = vld [vmem:[%s9566_s10 + $0xa0] ss:$8 sps:$4 sm:$0xff]  }
 0x773   : > { %2746 = vrot.lane.b32.xlu1 %v2736_v3, %s9483_s13  ;;  %2738 = vst [vmem:[%s8545_s17 + $0x8] sm:$0xff] %v2736_v3  ;;  %v7540_v3 = vld [vmem:[%s9566_s10 + $0xb0] ss:$8 sps:$4 sm:$0xff]   ;;  %s9595_s13 = smov 3  }
 0x777   : > { %2771 = vrot.lane.b32.xlu1 %v8550_v5, %s9589_s12 }
 0x7e3   : > { %v2745_v6 = vpop.permute.xlu0 %2744 }
 0x7e4   : > { %2751 = vst.msk [vmem:[#allocation2] sm:$0xff] %vm2750_vm12, %v2745_v6  ;;  %v7545_v6 = vld [vmem:[%s9566_s10 + $0xc4] ss:$8 sps:$4 sm:$0xff]  }
 0x7e5   : > { %2754 = vst.msk [vmem:[#allocation2] sm:$0xff] %vm2753_vm10, %v7961_v8  ;;  %v2747_v7 = vpop.permute.xlu1 %2746 }
 0x7e6   : > { %2752 = vst.msk [vmem:[#allocation2 + $0x18] sm:$0xff] %vm2750_vm12, %v2747_v7  ;;  %v7543_v7 = vld [vmem:[%s9566_s10 + $0xc0] ss:$8 sps:$4 sm:$0xff]  }
 0x7e7   : > { %2756 = vst.msk [vmem:[#allocation2 + $0x18] sm:$0xff] %vm2753_vm10, %v7961_v8  ;;  %vm3287_vm10 = vcmp.lt.s32.totalorder %v1428_v15, 132 }
 0x7e9   : > { %v2772_v19 = vpop.permute.xlu1 %2771 }
 0x7ec   : > { %v2761_v9 = vld [vmem:[#allocation2] sm:$0xff] }
 0x7ed   : > { %2923 = vst.msk [vmem:[#allocation2] sm:$0x1] %vm1419_vm0, %v7961_v8 }
 0x7ee   : > { %2924 = vst.msk [vmem:[#allocation2] ss:$8 sm:$0x7] %vm1431_vm4, %v8291_v20  ;;  %v2762_v10 = vld [vmem:[#allocation2 + $0x18] sm:$0xff]  ;;  %v6838_v20 = vunpack.c.h.bf16 %v6836_v17  ;;  %v2999_v17 = vld [vmem:[%s9566_s10 + $0x100] sm:$0x11] }
 0x7ef   : > { %2926 = vst.msk [vmem:[#allocation2 + $0x10] sm:$0x1] %vm1434_vm5, %v7961_v8  ;;  %v8566_v11 = vpack.c.bf16 %v2762_v10, %v2761_v9  ;;  %v7548_v9 = vld [vmem:[%s9566_s10 + $0xd4] ss:$8 sps:$4 sm:$0xff]   ;;  %v7546_v10 = vld [vmem:[%s9566_s10 + $0xd0] ss:$8 sps:$4 sm:$0xff]  }
 0x7f0   : > { %4068 = vst.msk [vmem:[#allocation2 + $0x18] sm:$0xff] %vm9489_vm1, %v7961_v8  ;;  %vm8654_vm4 = vcmp.lt.s32.totalorder %v1428_v15, 131  ;;  %vm3286_vm5 = vcmp.ge.s32.totalorder %v1428_v15, 3 }
 0x7f1   : > { %2769 = vrot.lane.b32.xlu0 %v8566_v11, %s9589_s12  ;;  %vm3283_vm13 = vmand %vm8277_vm2, %vm8654_vm4  ;;  %vm4810_vm2 = vcmask 24576   ;;  %vm9631_vm4 = vcmask 1040384  }
 0x7f2   : > { %vm3288_vm12 = vmand %vm3286_vm5, %vm3287_vm10  ;;  %vm9593_vm5 = vcmask 1014784  }
 0x7f3   : > { %vm9594_vm10 = vmmov %vm9593_vm5 }
 0x7f6   : > { %v2927_v12 = vld [vmem:[#allocation2] ss:$8 sm:$0x7] }
 0x7f7   : > { %2935 = vrot.lane.b32.xlu1 %v2927_v12, %s9585_s26  ;;  %3259 = vst.msk [vmem:[#allocation2] sm:$0x1] %vm1419_vm0, %v7961_v8  ;;  %2929 = vrot.lane.b32.xlu0 %v2927_v12, %s9589_s12 }
 0x7fb   : > { %2941 = vrot.lane.b32.xlu0 %v2927_v12, %s9586_s5 }
 0x7ff   : > { %3324 = vperm.xlu0 %7469, %v6838_v20   ;;  %v7549_v20 = vld [vmem:[%s9566_s10 + $0xe0] ss:$8 sps:$4 sm:$0xff]  }
 0x803   : > { %3386 = vperm.xlu0 %7469, %v6842_v14   ;;  %v7554_v14 = vld [vmem:[%s9566_s10 + $0xf4] ss:$8 sps:$4 sm:$0xff]  }
 0x807   : > { %3305 = vperm.xlu0 %7469, %v6837_v18   ;;  %v6692_v18 = vcombine.high %v2999_v17, %v2999_v17 }
 0x863   : > { %v2770_v24 = vpop.permute.xlu0 %2769 }
 0x864   : > { %v2773_v25 = vsel %vm1499_vm7, %v2770_v24, %v2772_v19  ;;  %v8632_v19 = vsel %vm9482_vm3, 65535, %v7960_v4  ;;  %v7552_v24 = vld [vmem:[%s9566_s10 + $0xf0] ss:$8 sps:$4 sm:$0xff]  }
 0x865   : > { %7014 = vmatpush3.bf16.msra.mxu1 %v2773_v25  ;;  %v6691_v25 = vcombine.low %v2999_v17, %v2999_v17 }
 0x866   : > { %7019 = vmatprep.subr.bf16.mxu1 %v7961_v8 }
 0x868   : > { %7016 = vmatmul.mubr.msk.bf16.vlgmr.msra.gmra.mrb[8].mxu1 %vm2348_vm15, %v2759_v26 }
 0x869   : > { %v2936_v29 = vpop.permute.xlu1 %2935  ;;  %v2930_v30 = vpop.permute.xlu0 %2929  ;;  %7020 = vmatpush3.bf16.msra.mxu1 %v8566_v11  ;;  %7021 = vmatprep.mubr.msk.bf16.mxu1 %vm7970_vm14, %v7961_v8 }
 0x86a   : > { %v2937_v31 = vrot.slane %v2936_v29, 1  ;;  %v2931_v32 = vrot.slane %v2930_v30, 1  ;;  %3177 = vmatprep.subr.bf16.mxu1 %v7509_v28  ;;  %v3175_v28 = vand.u32 %v6692_v18, %v8632_v19 }
 0x86c   : > { %v2932_v33 = vsel %vm1499_vm7, %v2930_v30, %v2931_v32  ;;  %v2938_v38 = vsel %vm1523_vm8, %v2936_v29, %v2937_v31  ;;  %v3172_v29 = vand.u32 %v6691_v25, %v8632_v19 }
 0x86d   : > { %v2934_v34 = vadd.f32 %v2932_v33, %v2927_v12  ;;  %v2942_v35 = vpop.permute.xlu0 %2941  ;;  %v7551_v12 = vld [vmem:[%s9566_s10 + $0xe4] ss:$8 sps:$4 sm:$0xff]   ;;  %s9597_s10 = sld [smem:[#allocation31_spill]] }
 0x86e   : > { %v2943_v39 = vrot.slane %v2942_v35, 1 }
 0x86f   : > { %v2940_v41 = vadd.f32 %v2938_v38, %v2934_v34 }
 0x870   : > { %v2944_v42 = vsel %vm1547_vm9, %v2942_v35, %v2943_v39  ;;  %7022 = vmatmul.mubr.msk.bf16.vlgmr.msra.gmra.mrb[12].mxu1 %vm2348_vm15, %v2758_v37 }
 0x871   : > { %v2946_v43 = vadd.f32 %v2944_v42, %v2940_v41  ;;  %3178 = vmatpush1.bf16.msra.mxu1 %v7507_v36  ;;  %v7972_v42 = vmov 1966171168  }
 0x872   : > { %3179 = vmatprep.subr.bf16.mxu1 %v7512_v40 }
 0x873   : > { %v8599_v46 = vmul.f32 0.25, %v2946_v43  ;;  %v3264_v43 = vunpack.c.l.s4 %v7972_v42 }
 0x875   : > { %3180 = vmatpush1.bf16.msra.mxu1 %v7510_v44  ;;  %v2956_v48 = vrot.slane %v8599_v46, %v8308_v23  ;;  %v2952_v26 = vrot.slane %v8599_v46, %v8305_v22  ;;  %v2960_v31 = vrot.slane %v8599_v46, %v8313_v27  ;;  %v3265_v44 = vunpack.c.0.s8 %v3264_v43 }
 0x876   : > { %3181 = vmatprep.subr.bf16.mxu1 %v7515_v45 }
 0x877   : > { %v2965_v50 = vpack.c.bf16 %v2956_v48, %v2956_v48  ;;  %v2964_v30 = vpack.c.bf16 %v2952_v26, %v2952_v26  ;;  %v2966_v32 = vpack.c.bf16 %v2960_v31, %v2960_v31  ;;  %v3268_v46 = vsub.s32 %v3265_v44, %v8302_v21 }
 0x879   : > { %3182 = vmatpush1.bf16.msra.mxu1 %v7513_v47  ;;  %3209 = vmatprep.mubr.bf16.mxu1 %v2965_v50 }
 0x87a   : > { %3183 = vmatprep.subr.bf16.mxu1 %v7518_v49 }
 0x87d   : > { %3184 = vmatpush1.bf16.msra.mxu1 %v7516_v51 }
 0x87e   : > { %3185 = vmatprep.subr.bf16.mxu1 %v7521_v52 }
 0x881   : > { %3186 = vmatpush1.bf16.msra.mxu1 %v7519_v53  ;;  %v6841_v53 = vunpack.c.l.bf16 %v8579_v13 }
 0x882   : > { %3187 = vmatprep.subr.bf16.mxu1 %v7524_v54  ;;  %v3296_v54 = vld [vmem:[%s9562_s25 + $0x10] sm:$0xf]  ;;  %s9623_s25 = sld [smem:[#allocation51_spill]] }
 0x885   : > { %3188 = vmatpush1.bf16.msra.mxu1 %v7522_v55  ;;  %v3301_v55 = vunpack.c.l.bf16 %v3296_v54 }
 0x886   : > { %3189 = vmatprep.subr.bf16.mxu1 %v7527_v56  ;;  %v3430_v56 = vld [vmem:[%s9590_s4] sm:$0xff]  ;;  %s8703_s4 = scalar_lea.vmem [#allocation11], %s8344_s24 }
 0x889   : > { %3190 = vmatpush1.bf16.msra.mxu1 %v7525_v57 }
 0x88a   : > { %3191 = vmatprep.subr.bf16.mxu1 %v7530_v58 }
 0x88d   : > { %3192 = vmatpush1.bf16.msra.mxu1 %v7528_v59 }
 0x88e   : > { %3193 = vmatprep.subr.bf16.mxu1 %v7533_v60 }
 0x891   : > { %3194 = vmatpush1.bf16.msra.mxu1 %v7531_v61 }
 0x892   : > { %3195 = vmatprep.subr.bf16.mxu1 %v7536_v62  ;;  %v3325_v62 = vpop.permute.xlu0 %3324 }
 0x895   : > { %3196 = vmatpush1.bf16.msra.mxu1 %v7534_v63 }
 0x896   : > { %3197 = vmatprep.subr.bf16.mxu1 %v7539_v0 }
 0x899   : > { %3198 = vmatpush1.bf16.msra.mxu1 %v7537_v1 }
 0x89a   : > { %3199 = vmatprep.subr.bf16.mxu1 %v7542_v2 }
 0x89d   : > { %3200 = vmatpush1.bf16.msra.mxu1 %v7540_v3 }
 0x89e   : > { %3201 = vmatprep.subr.bf16.mxu1 %v7545_v6 }
 0x8a1   : > { %3202 = vmatpush1.bf16.msra.mxu1 %v7543_v7 }
 0x8a2   : > { %3203 = vmatprep.subr.bf16.mxu1 %v7548_v9 }
 0x8a5   : > { %3204 = vmatpush1.bf16.msra.mxu1 %v7546_v10 }
 0x8a6   : > { %3205 = vmatprep.subr.bf16.mxu1 %v7551_v12 }
 0x8a9   : > { %3206 = vmatpush1.bf16.msra.mxu1 %v7549_v20 }
 0x8aa   : > { %3207 = vmatprep.subr.bf16.mxu1 %v7554_v14 }
 0x8ad   : > { %3208 = vmatpush1.bf16.msra.mxu1 %v7552_v24 }
 0x8ae   : > { %3218 = vmatprep.subr.bf16.mxu1 %v3175_v28 }
 0x8b0   : > { %3210 = vmatmul.mubr.bf16.vlgmr.msra.gmra.mrb[16].mxu1 %v2964_v30 }
 0x8b1   : > { %3219 = vmatpush1.bf16.msra.mxu1 %v3172_v29  ;;  %3250 = vmatprep.mubr.bf16.mxu1 %v7960_v4 }
 0x8b2   : > { %7031 = vmatprep.subr.bf16.mxu1 %v7961_v8 }
 0x8bc   : > { %6693 = vmatmul.mubr.msk.bf16.vlgmr.msra.gmra.mrb[16].mxu1 %vm2739_vm11, %v2966_v32 }
 0x8bd   : > { %7033 = vmatprep.mubr.msk.bf16.mxu1 %vm7970_vm14, %v7961_v8 }
 0x93b   : > { %v2812_v33 = vpop.f32.mrb[8].mxu1 }
 0x93c   : > { %v7017_v34 = vpop.f32.mrb[9].mxu1 }
 0x93d   : > { %v2815_v35 = vpop.f32.mrb[10].mxu1 }
 0x93e   : > { %v7018_v36 = vpop.f32.mrb[11].mxu1 }
 0x943   : > { %v2855_v37 = vpop.f32.mrb[12].mxu1 }
 0x944   : > { %v8646_v38 = vadd.f32 %v2855_v37, %v2812_v33  ;;  %v7023_v39 = vpop.f32.mrb[13].mxu1 }
 0x945   : > { %v2858_v40 = vpop.f32.mrb[14].mxu1 }
 0x946   : > { %v7024_v41 = vpop.f32.mrb[15].mxu1 }
 0x98f   : > { %v3252_v45 = vpop.f32.mrb[16].mxu1 }
 0x990   : > { %v3254_v47 = vpop.f32.mrb[17].mxu1 }
 0x991   : > { %v3262_v48 = vcombine.low %v3252_v45, %v3254_v47  ;;  %v3256_v49 = vpop.f32.mrb[18].mxu1 }
 0x992   : > { %v3257_v50 = vpop.f32.mrb[19].mxu1 }
 0x993   : > { %v3269_v51 = vrot.slane %v3262_v48, %v3268_v46 }
 0x995   : > { %v3276_v52 = vrot.slane %v3269_v51, %v3268_v46 }
 0x997   : > { %3277 = vrot.lane.b32.xlu1 %v3276_v52, %s9588_s9 }
 0x99b   : > { %3363 = vperm.xlu1 %7470, %v6841_v53  }
 0x99f   : > { %3409 = vperm.xlu1 %7470, %v3301_v55  }
 0x9a3   : > { %3433 = vperm.xlu1 %7470, %v3430_v56  }
 0xa09   : > { %v3278_v21 = vpop.permute.xlu1 %3277 }
 0xa0a   : > { %v3279_v13 = vrot.slane %v3278_v21, 7 }
 0xa0c   : > { %v8665_v58 = vsel %vm9489_vm1, %v3279_v13, %v3278_v21 }
 0xa0d   : > { %3284 = vst.msk [vmem:[#allocation2] ss:$8 sm:$0x3] %vm3283_vm13, %v8665_v58 }
 0xa0e   : > { %3290 = vst.msk [vmem:[#allocation2 + $0x8] ss:$8 sm:$0x3] %vm3288_vm12, %v7961_v8 }
 0xa15   : > { %v3321_v15 = vld [vmem:[#allocation2] ss:$8 sm:$0x7] }
 0xa16   : > { %v3302_v59 = vld [vmem:[#allocation2] ss:$8 sm:$0x3]  ;;  %v3331_v60 = vrot.slane %v3321_v15, %v8305_v22  ;;  %v3335_v61 = vrot.slane %v3321_v15, %v8308_v23  ;;  %v3339_v63 = vrot.slane %v3321_v15, %v8313_v27  ;;  %v3387_v27 = vpop.permute.xlu0 %3386 }
 0xa17   : > { %3446 = vst.msk [vmem:[#allocation2] sm:$0xff] %vm9488_vm6, %v7961_v8  ;;  %v3312_v34 = vrot.slane %v3302_v59, %v8305_v22  ;;  %v3316_v35 = vrot.slane %v3302_v59, %v8308_v23 }
 0xa18   : > { %v3344_v0 = vmul.f32 %v3335_v61, %v3325_v62  ;;  %v3343_v1 = vmul.f32 %v3331_v60, %v3325_v62  ;;  %v3345_v6 = vmul.f32 %v3339_v63, %v3325_v62  ;;  %v3390_v10 = vmul.f32 %v3387_v27, %v3335_v61 }
 0xa19   : > { %v3389_v12 = vmul.f32 %v3387_v27, %v3331_v60  ;;  %v3391_v14 = vmul.f32 %v3387_v27, %v3339_v63 }
 0xa1a   : > { %v3364_v2 = vpop.permute.xlu1 %3363  ;;  %3351 = vrot.lane.b32.xlu0 %v3344_v0, %s9589_s12  ;;  %3349 = vrot.lane.b32.xlu1 %v3343_v1, %s9589_s12  ;;  %v3306_v25 = vpop.permute.xlu0 %3305 }
 0xa1b   : > { %v3366_v3 = vmul.f32 %v3364_v2, %v3331_v60  ;;  %v3367_v7 = vmul.f32 %v3364_v2, %v3335_v61  ;;  %v3368_v9 = vmul.f32 %v3364_v2, %v3339_v63  ;;  %v3319_v41 = vmul.f32 %v3312_v34, %v3306_v25 }
 0xa1c   : > { %v3320_v42 = vmul.f32 %v3316_v35, %v3306_v25 }
 0xa1e   : > { %3372 = vrot.lane.b32.xlu0 %v3366_v3, %s9585_s26  ;;  %3353 = vrot.lane.b32.xlu1 %v3345_v6, %s9589_s12  ;;  %v3410_v17 = vpop.permute.xlu1 %3409 }
 0xa1f   : > { %v3412_v20 = vmul.f32 %v3410_v17, %v3331_v60  ;;  %v3413_v18 = vmul.f32 %v3410_v17, %v3335_v61  ;;  %v3414_v24 = vmul.f32 %v3410_v17, %v3339_v63 }
 0xa22   : > { %3376 = vrot.lane.b32.xlu0 %v3368_v9, %s9585_s26  ;;  %3374 = vrot.lane.b32.xlu1 %v3367_v7, %s9585_s26  ;;  %v3434_v26 = vpop.permute.xlu1 %3433 }
 0xa26   : > { %3397 = vrot.lane.b32.xlu1 %v3390_v10, %s9586_s5  ;;  %3395 = vrot.lane.b32.xlu0 %v3389_v12, %s9586_s5 }
 0xa2a   : > { %3418 = vrot.lane.b32.xlu1 %v3412_v20, %s9587_s6  ;;  %3399 = vrot.lane.b32.xlu0 %v3391_v14, %s9586_s5  ;;  %v3949_v20 = vld [vmem:[%s9560_s30] sm:$0xff]  ;;  %v3950_v14 = vld [vmem:[%s9560_s30 + $0x8] sm:$0xff]  ;;  %s9627_s30 = sld [smem:[#allocation52_spill]] }
 0xa2e   : > { %3422 = vrot.lane.b32.xlu1 %v3414_v24, %s9587_s6  ;;  %3420 = vrot.lane.b32.xlu0 %v3413_v18, %s9587_s6 }
 0xa30   : > { %v7584_v16 = vld [vmem:[%s9627_s30 + $0x8] sm:$0xff]  }
 0xa8c   : > { %v3350_v28 = vpop.permute.xlu1 %3349  ;;  %v3352_v29 = vpop.permute.xlu0 %3351 }
 0xa8d   : > { %v3355_v39 = vsel %vm1499_vm7, %v3350_v28, %v3352_v29  ;;  %v7557_v28 = vld [vmem:[%s9597_s10 + $0x8] sm:$0xff]  }
 0xa8e   : > { %v3359_v45 = vadd.f32 %v3355_v39, %v3319_v41 }
 0xa90   : > { %v3354_v30 = vpop.permute.xlu1 %3353  ;;  %v3373_v31 = vpop.permute.xlu0 %3372 }
 0xa91   : > { %v3356_v40 = vsel %vm1499_vm7, %v3352_v29, %v3354_v30 }
 0xa92   : > { %v3360_v46 = vadd.f32 %v3356_v40, %v3320_v42 }
 0xa94   : > { %v3375_v32 = vpop.permute.xlu1 %3374  ;;  %v3377_v33 = vpop.permute.xlu0 %3376 }
 0xa95   : > { %v3378_v43 = vsel %vm1523_vm8, %v3373_v31, %v3375_v32  ;;  %v3379_v44 = vsel %vm1523_vm8, %v3375_v32, %v3377_v33  ;;  %v7558_v32 = vld [vmem:[%s9597_s10] sm:$0xff]  }
 0xa96   : > { %v3382_v51 = vadd.f32 %v3378_v43, %v3359_v45  ;;  %v3383_v52 = vadd.f32 %v3379_v44, %v3360_v46  ;;  %v7560_v43 = vld [vmem:[%s9597_s10 + $0x18] sm:$0xff]  }
 0xa98   : > { %v3398_v36 = vpop.permute.xlu1 %3397  ;;  %v3396_v37 = vpop.permute.xlu0 %3395 }
 0xa99   : > { %v3401_v49 = vsel %vm1547_vm9, %v3396_v37, %v3398_v36  ;;  %v7559_v37 = vld [vmem:[%s9597_s10 + $0x10] sm:$0xff]  }
 0xa9a   : > { %v3405_v53 = vadd.f32 %v3401_v49, %v3382_v51 }
 0xa9c   : > { %v3419_v47 = vpop.permute.xlu1 %3418  ;;  %v3400_v48 = vpop.permute.xlu0 %3399 }
 0xa9d   : > { %v3402_v50 = vsel %vm1547_vm9, %v3398_v36, %v3400_v48  ;;  %v7561_v48 = vld [vmem:[%s9597_s10 + $0x20] sm:$0xff]  }
 0xa9e   : > { %v3406_v54 = vadd.f32 %v3402_v50, %v3383_v52 }
 0xaa0   : > { %v3423_v55 = vpop.permute.xlu1 %3422  ;;  %v3421_v56 = vpop.permute.xlu0 %3420 }
 0xaa1   : > { %v3424_v21 = vsel %vm9593_vm5, %v3419_v47, %v3421_v56  ;;  %v3425_v13 = vsel %vm9594_vm10, %v3421_v56, %v3423_v55  ;;  %vm3457_vm5 = vcmask 31744   ;;  %vm9596_vm10 = vcmask 1047576   ;;  %v7563_v56 = vld [vmem:[%s9597_s10 + $0x30] sm:$0xff]  }
 0xaa2   : > { %v3428_v15 = vadd.f32 %v3424_v21, %v3405_v53  ;;  %v3429_v59 = vadd.f32 %v3425_v13, %v3406_v54  ;;  %v7562_v53 = vld [vmem:[%s9597_s10 + $0x28] sm:$0xff]   ;;  %v7564_v21 = vld [vmem:[%s9616_s22] sm:$0xff]   ;;  %s8805_s10 = scalar_lea.vmem [#allocation13], %s8344_s24 }
 0xaa3   : > { %v7565_v13 = vld [vmem:[%s9616_s22 + $0x8] sm:$0xff]  }
 0xaa4   : > { %v3436_v60 = vadd.f32 %v3434_v26, %v3428_v15  ;;  %v3437_v61 = vadd.f32 %v3434_v26, %v3429_v59  ;;  %v7566_v15 = vld [vmem:[%s9616_s22 + $0x10] sm:$0xff]   ;;  %v7567_v59 = vld [vmem:[%s9616_s22 + $0x18] sm:$0xff]  }
 0xaa6   : > { %vm3439_vm12 = vcmp.ge.f32.partialorder %v3437_v61, 0.0  ;;  %v3441_v62 = vmul.f32 0.1, %v3437_v61  ;;  %vm3438_vm3 = vcmp.ge.f32.partialorder %v3436_v60, 0.0  ;;  %v3440_v63 = vmul.f32 0.1, %v3436_v60 }
 0xaa8   : > { %v3443_v0 = vsel %vm3439_vm12, %v3437_v61, %v3441_v62  ;;  %v3442_v1 = vsel %vm3438_vm3, %v3436_v60, %v3440_v63  ;;  %vm3459_vm3 = vcmask 56352   ;;  %vm9600_vm12 = vcmask 1043456   ;;  %v7568_v60 = vld [vmem:[%s9616_s22 + $0x20] sm:$0xff]  }
 0xaa9   : > { %3451 = vrot.lane.b32.xlu1 %v3443_v0, %s9595_s13  ;;  %3445 = vst [vmem:[%s8703_s4 + $0x8] sm:$0xff] %v3443_v0  ;;  %3449 = vrot.lane.b32.xlu0 %v3442_v1, %s9595_s13  ;;  %3444 = vst [vmem:[%s8703_s4] sm:$0xff] %v3442_v1 }
 0xaaa   : > { %v7569_v1 = vld [vmem:[%s9616_s22 + $0x28] sm:$0xff]  }
 0xaad   : > { %2863 = vrot.lane.b32.xlu1 %v8550_v5, %s9585_s26  ;;  %2861 = vrot.lane.b32.xlu0 %v8566_v11, %s9585_s26  ;;  %v2760_v5 = vld [vmem:[%s9564_s21 + $0x2] sm:$0x1]  ;;  %s9599_s21 = smov 122  }
 0xb1b   : > { %v3452_v2 = vpop.permute.xlu1 %3451  ;;  %v3450_v3 = vpop.permute.xlu0 %3449 }
 0xb1c   : > { %v3453_v6 = vsel %vm9488_vm6, %v3450_v3, %v3452_v2  ;;  %3456 = vst.msk [vmem:[#allocation2] sm:$0xff] %vm9596_vm10, %v3450_v3  ;;  %vm9603_vm10 = vcmask 64512   ;;  %v7570_v3 = vld [vmem:[%s9616_s22 + $0x30] sm:$0xff]  }
 0xb1d   : > { %3458 = vst.msk [vmem:[#allocation2 + $0x8] sm:$0xff] %vm3457_vm5, %v3453_v6  ;;  %vm9601_vm5 = vmmov %vm9600_vm12  ;;  %v7571_v6 = vld [vmem:[%s9616_s22 + $0x38] sm:$0xff]  }
 0xb1e   : > { %3460 = vst.msk [vmem:[#allocation2 + $0x8] sm:$0xff] %vm3459_vm3, %v7961_v8  ;;  %vm9602_vm3 = vmmov %vm9601_vm5 }
 0xb1f   : > { %v2864_v7 = vpop.permute.xlu1 %2863  ;;  %v2862_v9 = vpop.permute.xlu0 %2861  ;;  %vm9604_vm6 = vmmov %vm9602_vm3 }
 0xb20   : > { %v2865_v27 = vsel %vm1523_vm8, %v2862_v9, %v2864_v7  ;;  %v7572_v7 = vld [vmem:[%s9616_s22 + $0x40] ss:$0 sps:$4 sm:$0x11]   ;;  %s9622_s22 = sld [smem:[#allocation43_spill]] }
 0xb21   : > { %7026 = vmatpush3.bf16.msra.mxu0 %v2865_v27 }
 0xb23   : > { %v3475_v10 = vld [vmem:[#allocation2] sm:$0xff] }
 0xb24   : > { %7028 = vmatmul.mubr.msk.bf16.vlgmr.msra.gmra.mrb[8].mxu0 %vm2348_vm15, %v2760_v5  ;;  %v3477_v11 = vpack.c.bf16 %v3475_v10, %v3475_v10  ;;  %4067 = vst.msk [vmem:[#allocation2] sm:$0xff] %vm9489_vm1, %v7961_v8 }
 0xb25   : > { %v3476_v12 = vld [vmem:[#allocation2 + $0x8] sm:$0xff]  ;;  %3532 = vmatprep.mubr.bf16.mxu0 %v7960_v4 }
 0xb26   : > { %4480 = vst.msk [vmem:[#allocation2 + $0x8] sm:$0xff] %vm9489_vm1, %v7961_v8  ;;  %3486 = vrot.lane.b32.xlu0 %v3477_v11, %s9589_s12  ;;  %v3478_v17 = vpack.c.bf16 %v3476_v12, %v3476_v12  ;;  %v3552_v29 = vsel %vm9604_vm6, %v3477_v11, 0  ;;  %vm9605_vm1 = vmmov %vm9602_vm3 }
 0xb27   : > { %vm9608_vm6 = vmmov %vm9605_vm1 }
 0xb28   : > { %3488 = vrot.lane.b32.xlu1 %v3478_v17, %s9589_s12 }
 0xb2a   : > { %3605 = vrot.lane.b32.xlu0 %v3477_v11, %s9585_s26 }
 0xb2c   : > { %3607 = vrot.lane.b32.xlu1 %v3478_v17, %s9585_s26 }
 0xb2e   : > { %3671 = vrot.lane.b32.xlu0 %v3477_v11, %s9586_s5 }
 0xb30   : > { %3673 = vrot.lane.b32.xlu1 %v3478_v17, %s9586_s5 }
 0xb32   : > { %3737 = vrot.lane.b32.xlu0 %v3477_v11, %s9587_s6 }
 0xb34   : > { %3739 = vrot.lane.b32.xlu1 %v3478_v17, %s9587_s6 }
 0xb36   : > { %3803 = vrot.lane.b32.xlu0 %v3477_v11, %s9598_s20 }
 0xb38   : > { %3805 = vrot.lane.b32.xlu1 %v3478_v17, %s9598_s20 }
 0xb3a   : > { %3869 = vrot.lane.b32.xlu0 %v3477_v11, %s9599_s21 }
 0xb3c   : > { %3871 = vrot.lane.b32.xlu1 %v3478_v17, %s9599_s21 }
 0xb3e   : > { %3953 = vperm.xlu0 %7469, %v3949_v20  }
 0xb40   : > { %3958 = vperm.xlu1 %7470, %v3950_v14  }
 0xb98   : > { %v3487_v18 = vpop.permute.xlu0 %3486 }
 0xb9a   : > { %v3489_v24 = vpop.permute.xlu1 %3488 }
 0xb9b   : > { %v3490_v25 = vsel %vm1499_vm7, %v3487_v18, %v3489_v24  ;;  %6695 = vmatprep.subr.msk.bf16.mxu0 %vm9600_vm12, %v3489_v24  ;;  %vm9606_vm12 = vmmov %vm9605_vm1 }
 0xb9c   : > { %v3495_v26 = vsel %vm9601_vm5, %v3490_v25, 0  ;;  %v3606_v31 = vpop.permute.xlu0 %3605  ;;  %vm9607_vm5 = vmmov %vm9603_vm10 }
 0xb9d   : > { %3501 = vmatpush1.bf16.msra.mxu0 %v3495_v26 }
 0xb9e   : > { %6698 = vmatprep.subr.msk.bf16.mxu0 %vm9602_vm3, %v3478_v17  ;;  %v3608_v30 = vpop.permute.xlu1 %3607  ;;  %vm9609_vm3 = vmmov %vm9607_vm5 }
 0xb9f   : > { %v3609_v33 = vsel %vm1523_vm8, %v3606_v31, %v3608_v30 }
 0xba0   : > { %6696 = vmatmul.mubr.msk.bf16.vlgmr.msra.gmra.mrb[12].mxu0 %vm9603_vm10, %v7557_v28  ;;  %v3614_v34 = vsel %vm9606_vm12, %v3609_v33, 0  ;;  %v3672_v36 = vpop.permute.xlu0 %3671  ;;  %vm9610_vm10 = vmmov %vm9605_vm1  ;;  %vm9611_vm12 = vcmask 1014784  }
 0xba1   : > { %3558 = vmatpush1.bf16.msra.mxu0 %v3552_v29  ;;  %3589 = vmatprep.mubr.bf16.mxu0 %v7960_v4 }
 0xba2   : > { %6701 = vmatprep.subr.msk.bf16.mxu0 %vm9605_vm1, %v3608_v30  ;;  %v3674_v35 = vpop.permute.xlu1 %3673 }
 0xba3   : > { %v3675_v39 = vsel %vm1547_vm9, %v3672_v36, %v3674_v35 }
 0xba4   : > { %v3680_v40 = vsel %vm9605_vm1, %v3675_v39, 0  ;;  %v3738_v42 = vpop.permute.xlu0 %3737  ;;  %v4371_v39 = vld [vmem:[%s9622_s22 + $0x8] sm:$0xff] }
 0xba6   : > { %v3740_v41 = vpop.permute.xlu1 %3739 }
 0xba7   : > { %v3741_v44 = vsel %vm9611_vm12, %v3738_v42, %v3740_v41  ;;  %v7579_v42 = vld [vmem:[%s9623_s25 + $0x8] sm:$0xff]  }
 0xba8   : > { %v3804_v47 = vpop.permute.xlu0 %3803 }
 0xbaa   : > { %v3806_v46 = vpop.permute.xlu1 %3805 }
 0xbac   : > { %6699 = vmatmul.mubr.msk.bf16.vlgmr.msra.gmra.mrb[12].mxu0 %vm9607_vm5, %v7558_v32  ;;  %vm9612_vm5 = vmmov %vm9605_vm1  ;;  %v3870_v52 = vpop.permute.xlu0 %3869 }
 0xbad   : > { %3620 = vmatpush1.bf16.msra.mxu0 %v3614_v34  ;;  %3651 = vmatprep.mubr.bf16.mxu0 %v7960_v4  ;;  %v3746_v45 = vsel %vm9612_vm5, %v3741_v44, 0  ;;  %vm9618_vm5 = vmmov %vm9605_vm1  ;;  %v7581_v44 = vld [vmem:[%s9623_s25 + $0x18] sm:$0xff]  }
 0xbae   : > { %6704 = vmatprep.subr.msk.bf16.mxu0 %vm9608_vm6, %v3674_v35  ;;  %vm9613_vm6 = vmmov %vm9609_vm3  ;;  %v3872_v51 = vpop.permute.xlu1 %3871 }
 0xbaf   : > { %vm9617_vm12 = vmmov %vm9613_vm6 }
 0xbb8   : > { %6702 = vmatmul.mubr.msk.bf16.vlgmr.msra.gmra.mrb[12].mxu0 %vm9609_vm3, %v7559_v37  ;;  %vm9614_vm3 = vcmask 1006592  }
 0xbb9   : > { %3686 = vmatpush1.bf16.msra.mxu0 %v3680_v40  ;;  %3717 = vmatprep.mubr.bf16.mxu0 %v7960_v4  ;;  %v3807_v49 = vsel %vm9614_vm3, %v3804_v47, %v3806_v46  ;;  %vm9620_vm3 = vmmov %vm9617_vm12  ;;  %v4370_v40 = vld [vmem:[%s9622_s22] sm:$0xff]  ;;  %s9625_s22 = smov 1  }
 0xbba   : > { %6707 = vmatprep.subr.msk.bf16.mxu0 %vm9610_vm10, %v3740_v41  ;;  %vm9615_vm10 = vmmov %vm9605_vm1  ;;  %v7578_v41 = vld [vmem:[%s9623_s25] sm:$0xff]  }
 0xbbb   : > { %v3812_v50 = vsel %vm9615_vm10, %v3807_v49, 0  ;;  %vm9621_vm10 = vmmov %vm9620_vm3  ;;  %v7574_v47 = vld [vmem:[%s9624_s28] sm:$0xff]   ;;  %v7575_v49 = vld [vmem:[%s9624_s28 + $0x10] sm:$0xff]  }
 0xbbd   : > { %v3954_v17 = vpop.permute.xlu0 %3953 }
 0xbbf   : > { %v3959_v24 = vpop.permute.xlu1 %3958 }
 0xbc4   : > { %6705 = vmatmul.mubr.msk.bf16.vlgmr.msra.gmra.mrb[12].mxu0 %vm9613_vm6, %v7560_v43  ;;  %vm9619_vm6 = vcmask 998400   ;;  %v7580_v43 = vld [vmem:[%s9623_s25 + $0x10] sm:$0xff]  }
 0xbc5   : > { %3752 = vmatpush1.bf16.msra.mxu0 %v3746_v45  ;;  %3783 = vmatprep.mubr.bf16.mxu0 %v7960_v4  ;;  %v3873_v54 = vsel %vm9619_vm6, %v3870_v52, %v3872_v51  ;;  %vm4077_vm6 = vcmask 547856  }
 0xbc6   : > { %6710 = vmatprep.subr.msk.bf16.mxu0 %vm9605_vm1, %v3806_v46  ;;  %v3878_v55 = vsel %vm9605_vm1, %v3873_v54, 0  ;;  %vm4080_vm1 = vcmask 564760   ;;  %v7573_v46 = vld [vmem:[%s9624_s28 + $0x8] sm:$0xff]   ;;  %v7582_v54 = vld [vmem:[%s9623_s25 + $0x20] ss:$0 sps:$4 sm:$0x11]  }
 0xbc7   : > { %s8863_s25 = scalar_lea.vmem [#allocation14], %s8344_s24 }
 0xbd0   : > { %6708 = vmatmul.mubr.msk.bf16.vlgmr.msra.gmra.mrb[12].mxu0 %vm9617_vm12, %v7561_v48 }
 0xbd1   : > { %3818 = vmatpush1.bf16.msra.mxu0 %v3812_v50  ;;  %3849 = vmatprep.mubr.bf16.mxu0 %v7960_v4 }
 0xbd2   : > { %6713 = vmatprep.subr.msk.bf16.mxu0 %vm9618_vm5, %v3872_v51  ;;  %v7576_v51 = vld [vmem:[%s9624_s28 + $0x18] sm:$0xff]  }
 0xbdc   : > { %6711 = vmatmul.mubr.msk.bf16.vlgmr.msra.gmra.mrb[12].mxu0 %vm9620_vm3, %v7562_v53  ;;  %v7577_v53 = vld [vmem:[%s9624_s28 + $0x20] sm:$0xff]   ;;  %vm4409_vm3 = vcmask 531456   ;;  %s9626_s28 = sld [smem:[#allocation33_spill]] }
 0xbdd   : > { %3884 = vmatpush1.bf16.msra.mxu0 %v3878_v55  ;;  %3915 = vmatprep.mubr.bf16.mxu0 %v7960_v4  ;;  %v4414_v55 = vand.u32 %v7582_v54, %v8632_v19 }
 0xbde   : > { %4018 = vmatprep.subr.bf16.mxu0 %v7960_v4 }
 0xbe8   : > { %6714 = vmatmul.mubr.msk.bf16.vlgmr.msra.gmra.mrb[12].mxu0 %vm9621_vm10, %v7563_v56 }
 0xbe9   : > { %4019 = vmatpush1.bf16.msra.mxu0 %v7564_v21 }
 0xbea   : > { %4020 = vmatprep.subr.bf16.mxu0 %v7960_v4 }
 0xbed   : > { %4021 = vmatpush1.bf16.msra.mxu0 %v7565_v13 }
 0xbee   : > { %4022 = vmatprep.subr.bf16.mxu0 %v7960_v4 }
 0xbf1   : > { %4023 = vmatpush1.bf16.msra.mxu0 %v7566_v15 }
 0xbf2   : > { %4024 = vmatprep.subr.bf16.mxu0 %v7960_v4 }
 0xbf5   : > { %4025 = vmatpush1.bf16.msra.mxu0 %v7567_v59 }
 0xbf6   : > { %4026 = vmatprep.subr.bf16.mxu0 %v7960_v4 }
 0xbf7   : > { %v2904_v61 = vpop.f32.mrb[8].mxu0 }
 0xbf8   : > { %v8788_v62 = vadd.f32 %v2904_v61, %v8646_v38  ;;  %v7029_v63 = vpop.f32.mrb[9].mxu0  ;;  %v4016_v38 = vand.u32 %v7572_v7, %v8632_v19 }
 0xbf9   : > { %v2907_v0 = vpop.f32.mrb[10].mxu0  ;;  %4027 = vmatpush1.bf16.msra.mxu0 %v7568_v60 }
 0xbfa   : > { %v7030_v2 = vpop.f32.mrb[11].mxu0  ;;  %4028 = vmatprep.subr.bf16.mxu0 %v7960_v4 }
 0xbfd   : > { %4029 = vmatpush1.bf16.msra.mxu0 %v7569_v1 }
 0xbfe   : > { %4030 = vmatprep.subr.bf16.mxu0 %v7960_v4 }
 0xc01   : > { %4031 = vmatpush1.bf16.msra.mxu0 %v7570_v3 }
 0xc02   : > { %4032 = vmatprep.subr.bf16.mxu0 %v7960_v4 }
 0xc05   : > { %4033 = vmatpush1.bf16.msra.mxu0 %v7571_v6 }
 0xc06   : > { %4034 = vmatprep.subr.bf16.mxu0 %v7960_v4 }
 0xc09   : > { %4035 = vmatpush1.bf16.msra.mxu0 %v4016_v38 }
 0xc0a   : > { %7061 = vmatprep.subr.bf16.mxu0 %v7961_v8 }
 0xcbb   : > { %v3917_v9 = vpop.f32.mrb[12].mxu0 }
 0xcbc   : > { %v3919_v27 = vpop.f32.mrb[13].mxu0 }
 0xcbd   : > { %v3921_v5 = vpop.f32.mrb[14].mxu0 }
 0xcbe   : > { %v3930_v10 = vpack.c.bf16 %v3921_v5, %v3917_v9  ;;  %v3923_v11 = vpop.f32.mrb[15].mxu0 }
 0xcbf   : > { %v3931_v12 = vpack.c.bf16 %v3923_v11, %v3919_v27  ;;  %v8870_v11 = vld [vmem:[#allocation2 + $0x8] sm:$0xff] }
 0xcc1   : > { %6724 = vmatprep.mubr.msk.bf16.mxu0 %vm2739_vm11, %v3931_v12 }
 0xcc2   : > { %4051 = vmatmul.mubr.bf16.vlgmr.msra.gmra.mrb[16].mxu0 %v3930_v10 }
 0xcc3   : > { %7071 = vmatprep.mubr.msk.bf16.mxu0 %vm7970_vm14, %v7961_v8  ;;  %7062 = vmatpush3.bf16.msra.mxu0 %v7578_v41 }
 0xcc4   : > { %7063 = vmatprep.subr.bf16.mxu0 %v7961_v8 }
 0xcc7   : > { %7064 = vmatpush3.bf16.msra.mxu0 %v7579_v42 }
 0xcc8   : > { %7065 = vmatprep.subr.bf16.mxu0 %v7961_v8 }
 0xccb   : > { %7066 = vmatpush3.bf16.msra.mxu0 %v7580_v43 }
 0xccc   : > { %7067 = vmatprep.subr.bf16.mxu0 %v7961_v8 }
 0xccf   : > { %7068 = vmatpush3.bf16.msra.mxu0 %v7581_v44 }
 0xcd0   : > { %7069 = vmatprep.subr.bf16.mxu0 %v7961_v8 }
 0xcd3   : > { %7070 = vmatpush3.bf16.msra.mxu0 %v4414_v55 }
 0xcd4   : > { %7081 = vmatprep.subr.bf16.mxu0 %v7961_v8 }
 0xd95   : > { %v4052_v20 = vpop.f32.mrb[16].mxu0 }
 0xd96   : > { %v4053_v14 = vadd.f32 %v4052_v20, %v3954_v17  ;;  %v4054_v18 = vpop.f32.mrb[17].mxu0 }
 0xd97   : > { %v4055_v25 = vpop.f32.mrb[18].mxu0  ;;  %v7583_v18 = vld [vmem:[%s9627_s30] sm:$0xff]  }
 0xd98   : > { %v4061_v26 = vmul.f32 0.1, %v4053_v14  ;;  %v4056_v28 = vadd.f32 %v4055_v25, %v3959_v24  ;;  %v4057_v29 = vpop.f32.mrb[19].mxu0  ;;  %vm4059_vm12 = vcmp.ge.f32.partialorder %v4053_v14, 0.0  ;;  %v7585_v24 = vld [vmem:[%s9627_s30 + $0x10] sm:$0xff]  }
 0xd9a   : > { %vm4060_vm5 = vcmp.ge.f32.partialorder %v4056_v28, 0.0  ;;  %v4062_v30 = vmul.f32 0.1, %v4056_v28  ;;  %v4063_v31 = vsel %vm4059_vm12, %v4053_v14, %v4061_v26  ;;  %v4483_v14 = vld [vmem:[%s9626_s28] sm:$0x1]  ;;  %v8902_v26 = vld [vmem:[%s9628_s8 + $0x8] sm:$0xff]  }
 0xd9b   : > { %4071 = vrot.lane.b32.xlu0 %v4063_v31, %s9588_s9  ;;  %4065 = vst [vmem:[%s8805_s10] sm:$0xff] %v4063_v31  ;;  %v6850_v29 = vunpack.c.h.bf16 %v8902_v26  ;;  %v7587_v31 = vld [vmem:[%s9627_s30 + $0x20] sm:$0xff]  }
 0xd9c   : > { %v4064_v32 = vsel %vm4060_vm5, %v4056_v28, %v4062_v30  ;;  %vm4475_vm5 = vcmask 277512   ;;  %v7586_v28 = vld [vmem:[%s9627_s30 + $0x18] sm:$0xff]  }
 0xd9d   : > { %4073 = vrot.lane.b32.xlu1 %v4064_v32, %s9588_s9  ;;  %4066 = vst [vmem:[%s8805_s10 + $0x8] sm:$0xff] %v4064_v32 }
 0xe0d   : > { %v4072_v33 = vpop.permute.xlu0 %4071 }
 0xe0e   : > { %4078 = vst.msk [vmem:[#allocation2] sm:$0xff] %vm4077_vm6, %v4072_v33  ;;  %v7588_v33 = vld [vmem:[%s9627_s30 + $0x28] sm:$0xff]  }
 0xe0f   : > { %4081 = vst.msk [vmem:[#allocation2] sm:$0xff] %vm4080_vm1, %v7961_v8  ;;  %v4074_v34 = vpop.permute.xlu1 %4073 }
 0xe10   : > { %4079 = vst.msk [vmem:[#allocation2 + $0x18] sm:$0xff] %vm4077_vm6, %v4074_v34  ;;  %vm4478_vm6 = vcmask 1047824   ;;  %v7589_v34 = vld [vmem:[%s9627_s30 + $0x30] sm:$0xff]  }
 0xe11   : > { %4082 = vst.msk [vmem:[#allocation2 + $0x18] sm:$0xff] %vm4080_vm1, %v7961_v8  ;;  %vm4651_vm1 = vcmask 32792  }
 0xe16   : > { %v4093_v35 = vld [vmem:[#allocation2] sm:$0xff] }
 0xe17   : > { %4465 = vst.msk [vmem:[#allocation2] sm:$0xff] %vm2739_vm11, %v7961_v8 }
 0xe18   : > { %v4094_v36 = vld [vmem:[#allocation2 + $0x18] sm:$0xff] }
 0xe19   : > { %v4095_v37 = vpack.c.bf16 %v4094_v36, %v4093_v35  ;;  %4466 = vst.msk [vmem:[#allocation2 + $0x18] sm:$0xff] %vm2739_vm11, %v7961_v8  ;;  %v7590_v35 = vld [vmem:[%s9627_s30 + $0x38] sm:$0xff]   ;;  %v7591_v36 = vld [vmem:[%s9627_s30 + $0x40] ss:$0 sps:$4 sm:$0x11]   ;;  %s9633_s30 = sld [smem:[#allocation44_spill]] }
 0xe1b   : > { %4203 = vrot.lane.b32.xlu1 %v4095_v37, %s9585_s26  ;;  %4102 = vrot.lane.b32.xlu0 %v4095_v37, %s9589_s12 }
 0xe1f   : > { %4311 = vrot.lane.b32.xlu1 %v4095_v37, %s9587_s6  ;;  %4257 = vrot.lane.b32.xlu0 %v4095_v37, %s9586_s5 }
 0xe23   : > { %4379 = vperm.xlu1 %7470, %v4371_v39   ;;  %4374 = vperm.xlu0 %7469, %v4370_v40  }
 0xe8d   : > { %v4103_v45 = vpop.permute.xlu0 %4102  ;;  %v4204_v48 = vpop.permute.xlu1 %4203 }
 0xe8e   : > { %7032 = vmatpush3.bf16.msra.mxu1 %v4103_v45 }
 0xe8f   : > { %7037 = vmatprep.subr.bf16.mxu1 %v7961_v8 }
 0xe91   : > { %7034 = vmatmul.mubr.msk.bf16.vlgmr.msra.gmra.mrb[20].mxu1 %vm2348_vm15, %v7573_v46  ;;  %v4258_v50 = vpop.permute.xlu0 %4257  ;;  %v4312_v52 = vpop.permute.xlu1 %4311 }
 0xe92   : > { %7038 = vmatpush3.bf16.msra.mxu1 %v4095_v37  ;;  %7039 = vmatprep.mubr.msk.bf16.mxu1 %vm7970_vm14, %v7961_v8  ;;  %v4759_v37 = vsel %vm9631_vm4, %v7591_v36, 0 }
 0xe93   : > { %7043 = vmatprep.subr.bf16.mxu1 %v7961_v8 }
 0xe9d   : > { %7040 = vmatmul.mubr.msk.bf16.vlgmr.msra.gmra.mrb[20].mxu1 %vm2348_vm15, %v7574_v47 }
 0xe9e   : > { %7044 = vmatpush3.bf16.msra.mxu1 %v4204_v48  ;;  %7045 = vmatprep.mubr.msk.bf16.mxu1 %vm7970_vm14, %v7961_v8 }
 0xe9f   : > { %7049 = vmatprep.subr.bf16.mxu1 %v7961_v8 }
 0xea2   : > { %v4375_v60 = vpop.permute.xlu0 %4374  ;;  %v4380_v1 = vpop.permute.xlu1 %4379 }
 0xea9   : > { %7046 = vmatmul.mubr.msk.bf16.vlgmr.msra.gmra.mrb[20].mxu1 %vm2348_vm15, %v7575_v49 }
 0xeaa   : > { %7050 = vmatpush3.bf16.msra.mxu1 %v4258_v50  ;;  %7051 = vmatprep.mubr.msk.bf16.mxu1 %vm7970_vm14, %v7961_v8 }
 0xeab   : > { %7055 = vmatprep.subr.bf16.mxu1 %v7961_v8 }
 0xeb5   : > { %7052 = vmatmul.mubr.msk.bf16.vlgmr.msra.gmra.mrb[20].mxu1 %vm2348_vm15, %v7576_v51 }
 0xeb6   : > { %7056 = vmatpush3.bf16.msra.mxu1 %v4312_v52  ;;  %7057 = vmatprep.mubr.msk.bf16.mxu1 %vm7970_vm14, %v7961_v8 }
 0xeb7   : > { %7075 = vmatprep.subr.bf16.mxu1 %v7961_v8 }
 0xec1   : > { %7058 = vmatmul.mubr.msk.bf16.vlgmr.msra.gmra.mrb[20].mxu1 %vm2348_vm15, %v7577_v53 }
 0xec2   : > { %7077 = vmatprep.mubr.msk.bf16.mxu1 %vm7970_vm14, %v7961_v8 }
 0xf94   : > { %v4351_v56 = vpop.f32.mrb[20].mxu1 }
 0xf95   : > { %v7059_v21 = vpop.f32.mrb[21].mxu1 }
 0xf96   : > { %v4354_v13 = vpop.f32.mrb[22].mxu1 }
 0xf97   : > { %v4360_v15 = vpack.c.bf16 %v4354_v13, %v4351_v56  ;;  %v7060_v59 = vpop.f32.mrb[23].mxu1 }
 0xf99   : > { %7072 = vmatmul.mubr.msk.bf16.vlgmr.msra.gmra.mrb[20].mxu0 %vm4409_vm3, %v4360_v15 }
 0xf9a   : > { %7083 = vmatprep.mubr.msk.bf16.mxu0 %vm7970_vm14, %v7961_v8 }
0x106c   : > { %v4450_v61 = vpop.f32.mrb[20].mxu0 }
0x106d   : > { %v4451_v63 = vadd.f32 %v4450_v61, %v4375_v60  ;;  %v7073_v0 = vpop.f32.mrb[21].mxu0  ;;  %v6849_v61 = vunpack.c.l.bf16 %v8902_v26 }
0x106e   : > { %v4453_v2 = vpop.f32.mrb[22].mxu0  ;;  %v4816_v0 = vld [vmem:[%s9628_s8 + $0x10] sm:$0xf] }
0x106f   : > { %vm4457_vm10 = vcmp.ge.f32.partialorder %v4451_v63, 0.0  ;;  %v4459_v3 = vmul.f32 0.1, %v4451_v63  ;;  %v4454_v6 = vadd.f32 %v4453_v2, %v4380_v1  ;;  %v7074_v7 = vpop.f32.mrb[23].mxu0  ;;  %v4821_v2 = vunpack.c.l.bf16 %v4816_v0  ;;  %v7592_v0 = vld [vmem:[%s9640_s2 + $0x8] sm:$0xff]   ;;  %s9657_s2 = sld [smem:[#allocation54_spill]] }
0x1071   : > { %vm4458_vm12 = vcmp.ge.f32.partialorder %v4454_v6, 0.0  ;;  %v4460_v38 = vmul.f32 0.1, %v4454_v6  ;;  %v4461_v9 = vsel %vm4457_vm10, %v4451_v63, %v4459_v3  ;;  %vm9629_vm10 = vcmask 15360   ;;  %v4895_v3 = vld [vmem:[%s9633_s30] sm:$0xff]  ;;  %s6597_s30 = sshll.u32 %s8339_s7, 3 }
0x1072   : > { %4469 = vrot.lane.b32.xlu0 %v4461_v9, %s9625_s22  ;;  %4463 = vst [vmem:[%s8863_s25] sm:$0xff] %v4461_v9 }
0x1073   : > { %v4462_v27 = vsel %vm4458_vm12, %v4454_v6, %v4460_v38  ;;  %vm4806_vm12 = vcmask 540688  }
0x1074   : > { %4471 = vrot.lane.b32.xlu1 %v4462_v27, %s9625_s22  ;;  %4464 = vst [vmem:[%s8863_s25 + $0x8] sm:$0xff] %v4462_v27 }
0x10e4   : > { %v4470_v5 = vpop.permute.xlu0 %4469 }
0x10e5   : > { %4476 = vst.msk [vmem:[#allocation2] sm:$0xff] %vm4475_vm5, %v4470_v5 }
0x10e6   : > { %4479 = vst.msk [vmem:[#allocation2] sm:$0xff] %vm4478_vm6, %v7961_v8  ;;  %v4472_v10 = vpop.permute.xlu1 %4471 }
0x10e7   : > { %4477 = vst.msk [vmem:[#allocation2 + $0x18] sm:$0xff] %vm4475_vm5, %v4472_v10  ;;  %vm4808_vm5 = vcmask 1040920  }
0x10e8   : > { %4481 = vst.msk [vmem:[#allocation2 + $0x18] sm:$0xff] %vm4478_vm6, %v7961_v8  ;;  %vm9634_vm6 = vcmask 23552  }
0x10ed   : > { %v4486_v12 = vld [vmem:[#allocation2] sm:$0xff] }
0x10ee   : > { %4648 = vst.msk [vmem:[#allocation2] sm:$0x1] %vm1419_vm0, %v7961_v8 }
0x10ef   : > { %4649 = vst.msk [vmem:[#allocation2] ss:$8 sm:$0x3] %vm3283_vm13, %v8665_v58  ;;  %v4487_v17 = vld [vmem:[#allocation2 + $0x18] sm:$0xff]  ;;  %v6844_v58 = vld [vmem:[%s9628_s8] sm:$0xff]   ;;  %s8964_s8 = scalar_lea.vmem [#allocation16], %s6597_s30 }
0x10f0   : > { %4652 = vst.msk [vmem:[#allocation2 + $0x8] sm:$0x1] %vm4651_vm1, %v7961_v8  ;;  %v8881_v20 = vpack.c.bf16 %v4487_v17, %v4486_v12  ;;  %v6846_v25 = vunpack.c.h.bf16 %v6844_v58  ;;  %v6845_v32 = vunpack.c.l.bf16 %v6844_v58  ;;  %s9639_s30 = sld [smem:[#allocation53_spill]] }
0x10f1   : > { %5423 = vst.msk [vmem:[#allocation2 + $0x18] sm:$0xff] %vm9629_vm10, %v7961_v8 }
0x10f2   : > { %7082 = vmatpush3.bf16.msra.mxu0 %v8881_v20 }
0x10f3   : > { %4761 = vmatprep.subr.bf16.mxu0 %v7960_v4 }
0x10f5   : > { %7084 = vmatmul.mubr.msk.bf16.vlgmr.msra.gmra.mrb[24].mxu0 %vm2348_vm15, %v4483_v14 }
0x10f6   : > { %4762 = vmatpush1.bf16.msra.mxu0 %v7583_v18 }
0x10f7   : > { %v4653_v57 = vld [vmem:[#allocation2] ss:$8 sm:$0x3]  ;;  %4763 = vmatprep.subr.bf16.mxu0 %v7960_v4 }
0x10f8   : > { %4661 = vrot.lane.b32.xlu1 %v4653_v57, %s9585_s26  ;;  %4801 = vst.msk [vmem:[#allocation2] sm:$0x1] %vm1419_vm0, %v7961_v8  ;;  %4655 = vrot.lane.b32.xlu0 %v4653_v57, %s9589_s12  ;;  %vm9630_vm0 = vmmov %vm9629_vm10  ;;  %vm9636_vm10 = vcmask 1014784  }
0x10f9   : > { %4811 = vst.msk [vmem:[#allocation2 + $0x8] sm:$0x1] %vm4810_vm2, %v7961_v8  ;;  %vm9632_vm13 = vmmov %vm9630_vm0 }
0x10fa   : > { %4764 = vmatpush1.bf16.msra.mxu0 %v7584_v16  ;;  %v4490_v16 = vld [vmem:[#allocation2 + $0x20] sm:$0xff]  ;;  %vm9635_vm1 = vmmov %vm9630_vm0 }
0x10fb   : > { %4765 = vmatprep.subr.bf16.mxu0 %v7960_v4  ;;  %5821 = vst.msk [vmem:[#allocation2 + $0x20] sm:$0xff] %vm9635_vm1, %v7961_v8  ;;  %vm9638_vm4 = vmmov %vm9635_vm1 }
0x10fc   : > { %4667 = vrot.lane.b32.xlu0 %v4653_v57, %s9586_s5 }
0x10fe   : > { %4766 = vmatpush1.bf16.msra.mxu0 %v7585_v24 }
0x10ff   : > { %4767 = vmatprep.subr.bf16.mxu0 %v7960_v4 }
0x1100   : > { %4833 = vperm.xlu0 %7469, %v6846_v25   ;;  %v8907_v30 = vld [vmem:[#allocation2 + $0x8] ss:$0 sm:$0xff] }
0x1101   : > { %5819 = vst.msk [vmem:[#allocation2 + $0x8] sm:$0xff] %vm9630_vm0, %v7961_v8  ;;  %vm4913_vm0 = vcmask 581152  }
0x1102   : > { %4768 = vmatpush1.bf16.msra.mxu0 %v7586_v28 }
0x1103   : > { %4769 = vmatprep.subr.bf16.mxu0 %v7960_v4 }
0x1104   : > { %4865 = vperm.xlu0 %7469, %v6850_v29  }
0x1106   : > { %4770 = vmatpush1.bf16.msra.mxu0 %v7587_v31 }
0x1107   : > { %4771 = vmatprep.subr.bf16.mxu0 %v7960_v4 }
0x1108   : > { %4825 = vperm.xlu0 %7469, %v6845_v32  }
0x110a   : > { %4772 = vmatpush1.bf16.msra.mxu0 %v7588_v33 }
0x110b   : > { %4773 = vmatprep.subr.bf16.mxu0 %v7960_v4 }
0x110e   : > { %4774 = vmatpush1.bf16.msra.mxu0 %v7589_v34 }
0x110f   : > { %4775 = vmatprep.subr.bf16.mxu0 %v7960_v4 }
0x1112   : > { %4776 = vmatpush1.bf16.msra.mxu0 %v7590_v35 }
0x1113   : > { %4777 = vmatprep.subr.bf16.mxu0 %v7960_v4 }
0x1116   : > { %4778 = vmatpush1.bf16.msra.mxu0 %v4759_v37 }
0x1117   : > { %7135 = vmatprep.subr.bf16.mxu0 %v7961_v8 }
0x116a   : > { %v4662_v39 = vpop.permute.xlu1 %4661  ;;  %v4656_v40 = vpop.permute.xlu0 %4655 }
0x116b   : > { %v4663_v41 = vrot.slane %v4662_v39, 1  ;;  %v4657_v42 = vrot.slane %v4656_v40, 1 }
0x116d   : > { %v4658_v43 = vsel %vm1499_vm7, %v4656_v40, %v4657_v42  ;;  %v4664_v46 = vsel %vm1523_vm8, %v4662_v39, %v4663_v41 }
0x116e   : > { %v4660_v44 = vadd.f32 %v4658_v43, %v4653_v57  ;;  %v4668_v45 = vpop.permute.xlu0 %4667 }
0x116f   : > { %v4669_v47 = vrot.slane %v4668_v45, 1 }
0x1170   : > { %v4666_v48 = vadd.f32 %v4664_v46, %v4660_v44  ;;  %v4491_v46 = vpack.c.bf16 %v4490_v16, %v8870_v11 }
0x1171   : > { %v4670_v49 = vsel %vm1547_vm9, %v4668_v45, %v4669_v47 }
0x1172   : > { %v4672_v4 = vadd.f32 %v4670_v49, %v4666_v48 }
0x1174   : > { %v4673_v50 = vmul.f32 0.25, %v4672_v4 }
0x1176   : > { %v4678_v51 = vrot.slane %v4673_v50, %v8305_v22  ;;  %v4682_v52 = vrot.slane %v4673_v50, %v8308_v23  ;;  %v4484_v50 = vld [vmem:[%s9626_s28 + $0x1] sm:$0x1] }
0x1178   : > { %v4685_v53 = vpack.c.bf16 %v4678_v51, %v4678_v51  ;;  %v4686_v54 = vpack.c.bf16 %v4682_v52, %v4682_v52 }
0x117a   : > { %6753 = vmatprep.mubr.msk.bf16.mxu0 %vm9632_vm13, %v4686_v54  ;;  %vm9642_vm13 = vcmask 1043456  }
0x117b   : > { %4794 = vmatmul.mubr.bf16.vlgmr.msra.gmra.mrb[28].mxu0 %v4685_v53 }
0x117c   : > { %7145 = vmatprep.mubr.msk.bf16.mxu0 %vm7970_vm14, %v7961_v8 }
0x117f   : > { %v4834_v55 = vpop.permute.xlu0 %4833 }
0x1180   : > { %v4837_v56 = vmul.f32 %v4834_v55, %v8907_v30 }
0x1182   : > { %4842 = vrot.lane.b32.xlu0 %v4837_v56, %s9589_s12 }
0x1183   : > { %v4866_v6 = vpop.permute.xlu0 %4865 }
0x1184   : > { %v4869_v7 = vmul.f32 %v4866_v6, %v8907_v30 }
0x1187   : > { %v4826_v24 = vpop.permute.xlu0 %4825 }
0x11c8   : > { %v8933_v21 = vpop.f32.mrb[24].mxu0 }
0x11c9   : > { %v7085_v13 = vpop.f32.mrb[25].mxu0 }
0x11ca   : > { %v4583_v15 = vpop.f32.mrb[26].mxu0 }
0x11cb   : > { %v7086_v23 = vpop.f32.mrb[27].mxu0  ;;  %v7599_v15 = vld [vmem:[%s9639_s30] sm:$0xff]  }
0x11cc   : > { %7136 = vmatpush3.bf16.msra.mxu0 %v7599_v15  ;;  %v7600_v23 = vld [vmem:[%s9639_s30 + $0x8] sm:$0xff]   ;;  %v7609_v15 = vld [vmem:[%s9657_s2] sm:$0xff]  }
0x11cd   : > { %7137 = vmatprep.subr.bf16.mxu0 %v7961_v8 }
0x11d0   : > { %7138 = vmatpush3.bf16.msra.mxu0 %v7600_v23 }
0x11d1   : > { %7139 = vmatprep.subr.bf16.mxu0 %v7961_v8 }
0x11f4   : > { %v4843_v26 = vpop.permute.xlu0 %4842 }
0x124e   : > { %v4795_v59 = vpop.f32.mrb[28].mxu0 }
0x124f   : > { %4803 = vrot.lane.b32.xlu1 %v4795_v59, %s9588_s9  ;;  %v4797_v60 = vpop.f32.mrb[29].mxu0  ;;  %v7601_v59 = vld [vmem:[%s9639_s30 + $0x10] sm:$0xff]  }
0x1250   : > { %v4798_v63 = vpop.f32.mrb[30].mxu0  ;;  %7140 = vmatpush3.bf16.msra.mxu0 %v7601_v59  ;;  %v7602_v60 = vld [vmem:[%s9639_s30 + $0x18] sm:$0xff]  }
0x1251   : > { %v4799_v1 = vpop.f32.mrb[31].mxu0  ;;  %7141 = vmatprep.subr.bf16.mxu0 %v7961_v8 }
0x1253   : > { %4849 = vperm.xlu1 %7470, %v6849_v61  }
0x1254   : > { %7142 = vmatpush3.bf16.msra.mxu0 %v7602_v60 }
0x1255   : > { %7143 = vmatprep.subr.bf16.mxu0 %v7961_v8 }
0x1257   : > { %4881 = vperm.xlu1 %7470, %v4821_v2   ;;  %v7593_v2 = vld [vmem:[%s9641_s27] sm:$0xff]  }
0x125b   : > { %4898 = vperm.xlu1 %7470, %v4895_v3  }
0x125f   : > { %4874 = vrot.lane.b32.xlu1 %v4869_v7, %s9586_s5  ;;  %v7594_v7 = vld [vmem:[%s9641_s27 + $0x10] sm:$0xff]  }
0x12c1   : > { %v4804_v38 = vpop.permute.xlu1 %4803 }
0x12c2   : > { %4807 = vst.msk [vmem:[#allocation2] sm:$0x1] %vm4806_vm12, %v4804_v38  ;;  %vm9643_vm12 = vmmov %vm9642_vm13 }
0x12c3   : > { %4809 = vst.msk [vmem:[#allocation2] sm:$0x1] %vm4808_vm5, %v7961_v8  ;;  %vm9644_vm5 = vcmask 64512  }
0x12c4   : > { %vm9646_vm1 = vmmov %vm9644_vm5 }
0x12ca   : > { %v4829_v9 = vld [vmem:[#allocation2] ss:$0 sm:$0xff] }
0x12cb   : > { %v4836_v27 = vmul.f32 %v4834_v55, %v4829_v9  ;;  %4906 = vst.msk [vmem:[#allocation2] sm:$0xff] %vm9634_vm6, %v7961_v8  ;;  %v4868_v18 = vmul.f32 %v4866_v6, %v4829_v9  ;;  %v4828_v32 = vmul.f32 %v4829_v9, %v4826_v24  ;;  %v4485_v55 = vld [vmem:[%s9626_s28 + $0x2] sm:$0x1]  ;;  %vm9645_vm6 = vmmov %vm9643_vm12 }
0x12cd   : > { %4840 = vrot.lane.b32.xlu1 %v4836_v27, %s9589_s12  ;;  %v7595_v27 = vld [vmem:[%s9641_s27 + $0x18] sm:$0xff]  }
0x12d2   : > { %v4850_v5 = vpop.permute.xlu1 %4849 }
0x12d3   : > { %v4852_v10 = vmul.f32 %v4850_v5, %v4829_v9  ;;  %v4853_v12 = vmul.f32 %v4850_v5, %v8907_v30 }
0x12d5   : > { %4858 = vrot.lane.b32.xlu0 %v4853_v12, %s9585_s26  ;;  %4856 = vrot.lane.b32.xlu1 %v4852_v10, %s9585_s26  ;;  %v7596_v12 = vld [vmem:[%s9641_s27 + $0x20] sm:$0xff]  }
0x12d6   : > { %v4882_v17 = vpop.permute.xlu1 %4881 }
0x12d7   : > { %v4885_v14 = vmul.f32 %v4882_v17, %v8907_v30  ;;  %v4884_v57 = vmul.f32 %v4882_v17, %v4829_v9 }
0x12d9   : > { %4872 = vrot.lane.b32.xlu0 %v4868_v18, %s9586_s5  ;;  %4890 = vrot.lane.b32.xlu1 %v4885_v14, %s9587_s6  ;;  %v7597_v18 = vld [vmem:[%s9641_s27 + $0x28] sm:$0xff]  }
0x12da   : > { %v4899_v58 = vpop.permute.xlu1 %4898 }
0x12dd   : > { %4888 = vrot.lane.b32.xlu0 %v4884_v57, %s9587_s6  ;;  %4494 = vrot.lane.b32.xlu1 %v8881_v20, %s9589_s12 }
0x12de   : > { %v4875_v25 = vpop.permute.xlu1 %4874 }
0x12e1   : > { %4586 = vrot.lane.b32.xlu1 %v8881_v20, %s9585_s26 }
0x133f   : > { %v4841_v28 = vpop.permute.xlu1 %4840 }
0x1340   : > { %v4844_v31 = vsel %vm1499_vm7, %v4841_v28, %v4843_v26 }
0x1341   : > { %v4846_v34 = vadd.f32 %v4844_v31, %v4828_v32 }
0x1347   : > { %v4859_v29 = vpop.permute.xlu0 %4858  ;;  %v4857_v30 = vpop.permute.xlu1 %4856 }
0x1348   : > { %v4860_v33 = vsel %vm1523_vm8, %v4857_v30, %v4859_v29 }
0x1349   : > { %v4862_v37 = vadd.f32 %v4860_v33, %v4846_v34 }
0x134b   : > { %v4873_v35 = vpop.permute.xlu0 %4872  ;;  %v4891_v20 = vpop.permute.xlu1 %4890 }
0x134c   : > { %v4876_v36 = vsel %vm1547_vm9, %v4873_v35, %v4875_v25  ;;  %vm4911_vm9 = vcmask 556056   ;;  %v7603_v35 = vld [vmem:[%s9639_s30 + $0x20] ss:$0 sps:$4 sm:$0x11]  }
0x134d   : > { %v4878_v39 = vadd.f32 %v4876_v36, %v4862_v37  ;;  %v5371_v36 = vand.u32 %v7603_v35, %v8632_v19 }
0x134f   : > { %v4889_v40 = vpop.permute.xlu0 %4888  ;;  %v4495_v48 = vpop.permute.xlu1 %4494  ;;  %7144 = vmatpush3.bf16.msra.mxu0 %v5371_v36 }
0x1350   : > { %v4892_v41 = vsel %vm9636_vm10, %v4889_v40, %v4891_v20  ;;  %vm9647_vm10 = vmmov %vm9645_vm6  ;;  %7149 = vmatprep.subr.bf16.mxu0 %v7961_v8 }
0x1351   : > { %v4894_v42 = vadd.f32 %v4892_v41, %v4878_v39 }
0x1353   : > { %v4901_v43 = vadd.f32 %v4899_v58, %v4894_v42  ;;  %v4587_v51 = vpop.permute.xlu1 %4586  ;;  %v7598_v58 = vld [vmem:[%s9641_s27 + $0x30] sm:$0xff]  }
0x1355   : > { %vm4902_vm2 = vcmp.ge.f32.partialorder %v4901_v43, 0.0  ;;  %v4903_v44 = vmul.f32 0.1, %v4901_v43 }
0x1357   : > { %v4904_v45 = vsel %vm4902_vm2, %v4901_v43, %v4903_v44  ;;  %vm9648_vm2 = vmmov %vm9646_vm1 }
0x1358   : > { %4908 = vrot.lane.b32.xlu0 %v4904_v45, %s9595_s13  ;;  %4905 = vst [vmem:[%s8964_s8] sm:$0xff] %v4904_v45  ;;  %s9637_s13 = sld [smem:[#allocation45_spill]] }
0x135c   : > { %4496 = vrot.lane.b32.xlu0 %v4491_v46, %s9589_s12 }
0x135e   : > { %v5329_v56 = vld [vmem:[%s9637_s13 + $0x8] sm:$0xff]  ;;  %v5328_v13 = vld [vmem:[%s9637_s13] sm:$0xff]  ;;  %s9658_s13 = smov %s9657_s2  ;;  %s9663_s2 = sld [smem:[#allocation56_spill]] }
0x135f   : > { %v7610_v23 = vld [vmem:[%s9658_s13 + $0x8] sm:$0xff]  }
0x1360   : > { %4588 = vrot.lane.b32.xlu0 %v4491_v46, %s9585_s26 }
0x13ca   : > { %v4909_v47 = vpop.permute.xlu0 %4908 }
0x13cb   : > { %4912 = vst.msk [vmem:[#allocation2] sm:$0xff] %vm4911_vm9, %v4909_v47  ;;  %vm9649_vm9 = vmmov %vm9645_vm6 }
0x13cc   : > { %4914 = vst.msk [vmem:[#allocation2] sm:$0xff] %vm4913_vm0, %v7961_v8  ;;  %vm9650_vm0 = vmmov %vm9646_vm1 }
0x13ce   : > { %v4497_v49 = vpop.permute.xlu0 %4496 }
0x13cf   : > { %v4498_v4 = vsel %vm1499_vm7, %v4495_v48, %v4497_v49 }
0x13d0   : > { %7076 = vmatpush3.bf16.msra.mxu1 %v4498_v4 }
0x13d1   : > { %7087 = vmatprep.subr.bf16.mxu1 %v7961_v8 }
0x13d2   : > { %v4589_v11 = vpop.permute.xlu0 %4588 }
0x13d3   : > { %7078 = vmatmul.mubr.msk.bf16.vlgmr.msra.gmra.mrb[24].mxu1 %vm2348_vm15, %v4484_v50  ;;  %v4929_v52 = vld [vmem:[#allocation2] sm:$0xff]  ;;  %v4590_v53 = vsel %vm1523_vm8, %v4587_v51, %v4589_v11 }
0x13d4   : > { %v4930_v54 = vpack.c.bf16 %v4929_v52, %v4929_v52  ;;  %5422 = vst.msk [vmem:[#allocation2] sm:$0xff] %vm9638_vm4, %v7961_v8  ;;  %7088 = vmatpush3.bf16.msra.mxu1 %v4590_v53  ;;  %7089 = vmatprep.mubr.msk.bf16.mxu1 %vm7970_vm14, %v7961_v8  ;;  %vm9651_vm4 = vmmov %vm9645_vm6 }
0x13d5   : > { %7093 = vmatprep.subr.bf16.mxu1 %v7961_v8 }
0x13d6   : > { %5043 = vrot.lane.b32.xlu0 %v4930_v54, %s9585_s26  ;;  %4937 = vrot.lane.b32.xlu1 %v4930_v54, %s9589_s12  ;;  %v4995_v1 = vsel %vm9643_vm12, %v4930_v54, 0  ;;  %vm9653_vm12 = vmmov %vm9651_vm4 }
0x13da   : > { %5155 = vrot.lane.b32.xlu0 %v4930_v54, %s9587_s6  ;;  %5099 = vrot.lane.b32.xlu1 %v4930_v54, %s9586_s5 }
0x13db   : > { %7090 = vmatmul.mubr.msk.bf16.vlgmr.msra.gmra.mrb[28].mxu1 %vm2348_vm15, %v4485_v55 }
0x13dc   : > { %7095 = vmatprep.mubr.msk.bf16.mxu1 %vm7970_vm14, %v7961_v8 }
0x13de   : > { %5267 = vrot.lane.b32.xlu0 %v4930_v54, %s9599_s21  ;;  %5211 = vrot.lane.b32.xlu1 %v4930_v54, %s9598_s20  ;;  %s9054_s21 = scalar_lea.vmem [#allocation17], %s8344_s24  ;;  %s9656_s20 = sld [smem:[#allocation46_spill]] }
0x13df   : > { %s6161_s27 = sshll.u32 %s9054_s21, 4  ;;  %s9151_s27 = int_to_ptr.vmem [resolvable:$true] %s6161_s27 }
0x13e2   : > { %5337 = vperm.xlu0 %7469, %v5329_v56   ;;  %5332 = vperm.xlu1 %7470, %v5328_v13  }
0x13e4   : > { %v5722_v56 = vld [vmem:[%s9656_s20 + $0x8] sm:$0xff]  ;;  %v5721_v13 = vld [vmem:[%s9656_s20] sm:$0xff]  ;;  %s6129_s20 = sshll.u32 %s8863_s25, 4  ;;  %s9159_s25 = sshll.u32 %s8229_s3, 8  ;;  %s9149_s20 = int_to_ptr.vmem [resolvable:$true] %s6129_s20 }
0x1448   : > { %v4938_v61 = vpop.permute.xlu1 %4937  ;;  %v5044_v3 = vpop.permute.xlu0 %5043 }
0x1449   : > { %v4943_v63 = vsel %vm9642_vm13, %v4938_v61, 0  ;;  %v5049_v6 = vsel %vm9645_vm6, %v5044_v3, 0  ;;  %vm9652_vm13 = vmmov %vm9650_vm0 }
0x144a   : > { %7094 = vmatpush3.bf16.msra.mxu1 %v4943_v63  ;;  %vm9655_vm6 = vmmov %vm9650_vm0 }
0x144b   : > { %7099 = vmatprep.subr.bf16.mxu1 %v7961_v8 }
0x144c   : > { %v5100_v38 = vpop.permute.xlu1 %5099  ;;  %v5156_v5 = vpop.permute.xlu0 %5155 }
0x144d   : > { %7096 = vmatmul.mubr.msk.bf16.vlgmr.msra.gmra.mrb[32].mxu1 %vm9644_vm5, %v7592_v0  ;;  %v5105_v9 = vsel %vm9647_vm10, %v5100_v38, 0  ;;  %v5161_v10 = vsel %vm9649_vm9, %v5156_v5, 0  ;;  %vm9654_vm5 = vmmov %vm9650_vm0 }
0x144e   : > { %7100 = vmatpush3.bf16.msra.mxu1 %v4995_v1  ;;  %7101 = vmatprep.mubr.msk.bf16.mxu1 %vm7970_vm14, %v7961_v8 }
0x144f   : > { %7105 = vmatprep.subr.bf16.mxu1 %v7961_v8 }
0x1450   : > { %v5212_v17 = vpop.permute.xlu1 %5211  ;;  %v5268_v16 = vpop.permute.xlu0 %5267 }
0x1451   : > { %v5217_v14 = vsel %vm9651_vm4, %v5212_v17, 0  ;;  %v5273_v57 = vsel %vm9653_vm12, %v5268_v16, 0  ;;  %vm5814_vm4 = vcmask 146440  }
0x1459   : > { %7102 = vmatmul.mubr.msk.bf16.vlgmr.msra.gmra.mrb[32].mxu1 %vm9646_vm1, %v7593_v2 }
0x145a   : > { %7106 = vmatpush3.bf16.msra.mxu1 %v5049_v6  ;;  %7107 = vmatprep.mubr.msk.bf16.mxu1 %vm7970_vm14, %v7961_v8 }
0x145b   : > { %7111 = vmatprep.subr.bf16.mxu1 %v7961_v8 }
0x1461   : > { %v5333_v41 = vpop.permute.xlu1 %5332  ;;  %v5338_v45 = vpop.permute.xlu0 %5337 }
0x1465   : > { %7108 = vmatmul.mubr.msk.bf16.vlgmr.msra.gmra.mrb[32].mxu1 %vm9648_vm2, %v7594_v7  ;;  %vm5435_vm2 = vcmask 302360   ;;  %v7611_v7 = vld [vmem:[%s9658_s13 + $0x10] ss:$0 sps:$4 sm:$0x11]   ;;  %s6113_s13 = sshll.u32 %s8805_s10, 4  ;;  %s9163_s10 = scalar_lea.hbm %s9663_s2, %s9159_s25  ;;  %s9147_s13 = int_to_ptr.vmem [resolvable:$true] %s6113_s13 }
0x1466   : > { %7112 = vmatpush3.bf16.msra.mxu1 %v5105_v9  ;;  %7113 = vmatprep.mubr.msk.bf16.mxu1 %vm7970_vm14, %v7961_v8  ;;  %v5753_v38 = vand.u32 %v7611_v7, %v8632_v19 }
0x1467   : > { %7117 = vmatprep.subr.bf16.mxu1 %v7961_v8 }
0x1471   : > { %7114 = vmatmul.mubr.msk.bf16.vlgmr.msra.gmra.mrb[32].mxu1 %vm9650_vm0, %v7595_v27 }
0x1472   : > { %7118 = vmatpush3.bf16.msra.mxu1 %v5161_v10  ;;  %7119 = vmatprep.mubr.msk.bf16.mxu1 %vm7970_vm14, %v7961_v8 }
0x1473   : > { %7123 = vmatprep.subr.bf16.mxu1 %v7961_v8 }
0x147d   : > { %7120 = vmatmul.mubr.msk.bf16.vlgmr.msra.gmra.mrb[32].mxu1 %vm9652_vm13, %v7596_v12  ;;  %vm5817_vm13 = vcmask 1047696  }
0x147e   : > { %7124 = vmatpush3.bf16.msra.mxu1 %v5217_v14  ;;  %7125 = vmatprep.mubr.msk.bf16.mxu1 %vm7970_vm14, %v7961_v8 }
0x147f   : > { %7129 = vmatprep.subr.bf16.mxu1 %v7961_v8 }
0x1489   : > { %7126 = vmatmul.mubr.msk.bf16.vlgmr.msra.gmra.mrb[32].mxu1 %vm9654_vm5, %v7597_v18 }
0x148a   : > { %7130 = vmatpush3.bf16.msra.mxu1 %v5273_v57  ;;  %7131 = vmatprep.mubr.msk.bf16.mxu1 %vm7970_vm14, %v7961_v8 }
0x148b   : > { %7179 = vmatprep.subr.bf16.mxu1 %v7961_v8 }
0x1495   : > { %7132 = vmatmul.mubr.msk.bf16.vlgmr.msra.gmra.mrb[32].mxu1 %vm9655_vm6, %v7598_v58 }
0x1496   : > { %7185 = vmatprep.mubr.msk.bf16.mxu1 %vm7970_vm14, %v7961_v8  ;;  %7180 = vmatpush3.bf16.msra.mxu1 %v7609_v15 }
0x1497   : > { %7181 = vmatprep.subr.bf16.mxu1 %v7961_v8 }
0x149a   : > { %7182 = vmatpush3.bf16.msra.mxu1 %v7610_v23 }
0x149b   : > { %7183 = vmatprep.subr.bf16.mxu1 %v7961_v8 }
0x149e   : > { %7184 = vmatpush3.bf16.msra.mxu1 %v5753_v38 }
0x149f   : > { %7189 = vmatprep.subr.bf16.mxu1 %v7961_v8 }
0x14a6   : > { %v4537_v24 = vpop.f32.mrb[24].mxu1 }
0x14a7   : > { %v4581_v25 = vadd.f32 %v8933_v21, %v4537_v24  ;;  %v7079_v26 = vpop.f32.mrb[25].mxu1 }
0x14a8   : > { %v4540_v28 = vpop.f32.mrb[26].mxu1 }
0x14a9   : > { %v7080_v29 = vpop.f32.mrb[27].mxu1 }
0x14aa   : > { %v5828_v29 = vld [vmem:[#allocation2 + $0x8] sm:$0xff] }
0x14ae   : > { %v4629_v30 = vpop.f32.mrb[28].mxu1 }
0x14af   : > { %v9044_v31 = vadd.f32 %v4629_v30, %v4581_v25  ;;  %v7091_v32 = vpop.f32.mrb[29].mxu1  ;;  %v5829_v30 = vld [vmem:[#allocation2 + $0x20] sm:$0xff] }
0x14b0   : > { %v4632_v33 = vpop.f32.mrb[30].mxu1 }
0x14b1   : > { %v7092_v34 = vpop.f32.mrb[31].mxu1  ;;  %v5830_v33 = vpack.c.bf16 %v5829_v30, %v5828_v29 }
0x14b2   : > { %v4636_v34 = vld [vmem:[#allocation4] sm:$0x1] }
0x1568   : > { %v5309_v37 = vpop.f32.mrb[32].mxu1 }
0x1569   : > { %v7133_v39 = vpop.f32.mrb[33].mxu1 }
0x156a   : > { %v5312_v20 = vpop.f32.mrb[34].mxu1 }
0x156b   : > { %v5318_v40 = vpack.c.bf16 %v5312_v20, %v5309_v37  ;;  %v7134_v21 = vpop.f32.mrb[35].mxu1 }
0x156c   : > { %v2911_v21 = vld [vmem:[#allocation3] sm:$0x1] }
0x156d   : > { %7146 = vmatmul.mubr.msk.bf16.vlgmr.msra.gmra.mrb[32].mxu0 %vm4409_vm3, %v5318_v40  ;;  %vm5432_vm3 = vcmask 285712  }
0x156e   : > { %7151 = vmatprep.mubr.msk.bf16.mxu0 %vm7970_vm14, %v7961_v8 }
0x1640   : > { %v5407_v42 = vpop.f32.mrb[32].mxu0 }
0x1641   : > { %v5408_v43 = vadd.f32 %v5407_v42, %v5333_v41  ;;  %v7147_v44 = vpop.f32.mrb[33].mxu0  ;;  %v5975_v42 = vld [vmem:[#allocation5] sm:$0x1] }
0x1642   : > { %v5410_v46 = vpop.f32.mrb[34].mxu0 }
0x1643   : > { %vm5414_vm1 = vcmp.ge.f32.partialorder %v5408_v43, 0.0  ;;  %v5416_v47 = vmul.f32 0.1, %v5408_v43  ;;  %v5411_v48 = vadd.f32 %v5410_v46, %v5338_v45  ;;  %v7148_v49 = vpop.f32.mrb[35].mxu0 }
0x1645   : > { %vm5415_vm10 = vcmp.ge.f32.partialorder %v5411_v48, 0.0  ;;  %v5417_v4 = vmul.f32 0.1, %v5411_v48  ;;  %v5418_v50 = vsel %vm5414_vm1, %v5408_v43, %v5416_v47 }
0x1646   : > { %5426 = vrot.lane.b32.xlu1 %v5418_v50, %s9588_s9  ;;  %5420 = vst [vmem:[%s9054_s21] sm:$0xff] %v5418_v50 }
0x1647   : > { %v5419_v51 = vsel %vm5415_vm10, %v5411_v48, %v5417_v4 }
0x1648   : > { %5428 = vrot.lane.b32.xlu0 %v5419_v51, %s9588_s9  ;;  %5421 = vst [vmem:[%s9054_s21 + $0x8] sm:$0xff] %v5419_v51  ;;  %s9659_s9 = sld [smem:[#allocation36_spill]] }
0x164e   : > { %v7604_v60 = vld [vmem:[%s9659_s9 + $0x8] sm:$0xff]   ;;  %v7605_v61 = vld [vmem:[%s9659_s9] sm:$0xff]   ;;  %v7606_v0 = vld [vmem:[%s9659_s9 + $0x10] sm:$0xff]  }
0x164f   : > { %v7607_v2 = vld [vmem:[%s9659_s9 + $0x18] sm:$0xff]   ;;  %v7608_v6 = vld [vmem:[%s9659_s9 + $0x20] sm:$0xff]   ;;  %s6080_s9 = sshll.u32 %s8545_s17, 4  ;;  %s9156_s17 = sand.u32 1, %s8229_s3   ;;  %s9145_s9 = int_to_ptr.vmem [resolvable:$true] %s6080_s9 }
0x16b8   : > { %v5427_v11 = vpop.permute.xlu1 %5426 }
0x16b9   : > { %5433 = vst.msk [vmem:[#allocation2] sm:$0xff] %vm5432_vm3, %v5427_v11 }
0x16ba   : > { %5436 = vst.msk [vmem:[#allocation2] sm:$0xff] %vm5435_vm2, %v7961_v8  ;;  %v5429_v52 = vpop.permute.xlu0 %5428 }
0x16bb   : > { %5434 = vst.msk [vmem:[#allocation2 + $0x18] sm:$0xff] %vm5432_vm3, %v5429_v52 }
0x16bc   : > { %5437 = vst.msk [vmem:[#allocation2 + $0x18] sm:$0xff] %vm5435_vm2, %v7961_v8 }
0x16c1   : > { %v5448_v53 = vld [vmem:[#allocation2] sm:$0xff] }
0x16c2   : > { %5804 = vst.msk [vmem:[#allocation2] sm:$0xff] %vm2739_vm11, %v7961_v8 }
0x16c3   : > { %v5449_v54 = vld [vmem:[#allocation2 + $0x18] sm:$0xff] }
0x16c4   : > { %v5450_v55 = vpack.c.bf16 %v5449_v54, %v5448_v53  ;;  %5805 = vst.msk [vmem:[#allocation2 + $0x18] sm:$0xff] %vm2739_vm11, %v7961_v8  ;;  %vm5748_vm11 = vcmask 269312  }
0x16c6   : > { %5558 = vrot.lane.b32.xlu0 %v5450_v55, %s9585_s26  ;;  %5457 = vrot.lane.b32.xlu1 %v5450_v55, %s9589_s12 }
0x16ca   : > { %5666 = vrot.lane.b32.xlu0 %v5450_v55, %s9587_s6  ;;  %5612 = vrot.lane.b32.xlu1 %v5450_v55, %s9586_s5  ;;  %s9104_s5 = scalar_lea.vmem [#allocation19], %s8344_s24  ;;  %s9660_s6 = sld [smem:[#allocation62_spill]] }
0x16cb   : > { %s6177_s28 = sshll.u32 %s9104_s5, 4  ;;  %s9153_s28 = int_to_ptr.vmem [resolvable:$true] %s6177_s28 }
0x16ce   : > { %5730 = vperm.xlu0 %7469, %v5722_v56   ;;  %5725 = vperm.xlu1 %7470, %v5721_v13  }
0x16d0   : > { %s1413_s24 = scalar_lea.vmem %s9660_s6, %s8263_s23  ;;  %s9664_s6 = smov %s9663_s2 }
0x1738   : > { %v5458_v59 = vpop.permute.xlu1 %5457  ;;  %v5559_v63 = vpop.permute.xlu0 %5558 }
0x1739   : > { %7150 = vmatpush3.bf16.msra.mxu0 %v5458_v59 }
0x173a   : > { %7155 = vmatprep.subr.bf16.mxu0 %v7961_v8 }
0x173c   : > { %7152 = vmatmul.mubr.msk.bf16.vlgmr.msra.gmra.mrb[36].mxu0 %vm2348_vm15, %v7604_v60  ;;  %v5613_v1 = vpop.permute.xlu1 %5612  ;;  %v5667_v3 = vpop.permute.xlu0 %5666 }
0x173d   : > { %7156 = vmatpush3.bf16.msra.mxu0 %v5450_v55  ;;  %7157 = vmatprep.mubr.msk.bf16.mxu0 %vm7970_vm14, %v7961_v8 }
0x173e   : > { %7161 = vmatprep.subr.bf16.mxu0 %v7961_v8 }
0x1748   : > { %7158 = vmatmul.mubr.msk.bf16.vlgmr.msra.gmra.mrb[36].mxu0 %vm2348_vm15, %v7605_v61 }
0x1749   : > { %7162 = vmatpush3.bf16.msra.mxu0 %v5559_v63  ;;  %7163 = vmatprep.mubr.msk.bf16.mxu0 %vm7970_vm14, %v7961_v8 }
0x174a   : > { %7167 = vmatprep.subr.bf16.mxu0 %v7961_v8 }
0x174d   : > { %v5726_v17 = vpop.permute.xlu1 %5725  ;;  %v5731_v57 = vpop.permute.xlu0 %5730 }
0x1754   : > { %7164 = vmatmul.mubr.msk.bf16.vlgmr.msra.gmra.mrb[36].mxu0 %vm2348_vm15, %v7606_v0 }
0x1755   : > { %7168 = vmatpush3.bf16.msra.mxu0 %v5613_v1  ;;  %7169 = vmatprep.mubr.msk.bf16.mxu0 %vm7970_vm14, %v7961_v8 }
0x1756   : > { %7173 = vmatprep.subr.bf16.mxu0 %v7961_v8 }
0x1760   : > { %7170 = vmatmul.mubr.msk.bf16.vlgmr.msra.gmra.mrb[36].mxu0 %vm2348_vm15, %v7607_v2 }
0x1761   : > { %7174 = vmatpush3.bf16.msra.mxu0 %v5667_v3  ;;  %7175 = vmatprep.mubr.msk.bf16.mxu0 %vm7970_vm14, %v7961_v8 }
0x176c   : > { %7176 = vmatmul.mubr.msk.bf16.vlgmr.msra.gmra.mrb[36].mxu0 %vm2348_vm15, %v7608_v6 }
0x183f   : > { %v5706_v9 = vpop.f32.mrb[36].mxu0 }
0x1840   : > { %v7177_v27 = vpop.f32.mrb[37].mxu0 }
0x1841   : > { %v5709_v5 = vpop.f32.mrb[38].mxu0 }
0x1842   : > { %v5715_v10 = vpack.c.bf16 %v5709_v5, %v5706_v9  ;;  %v7178_v12 = vpop.f32.mrb[39].mxu0 }
0x1844   : > { %7186 = vmatmul.mubr.msk.bf16.vlgmr.msra.gmra.mrb[36].mxu1 %vm5748_vm11, %v5715_v10 }
0x1845   : > { %7191 = vmatprep.mubr.msk.bf16.mxu1 %vm7970_vm14, %v7961_v8 }
0x1917   : > { %v5789_v14 = vpop.f32.mrb[36].mxu1 }
0x1918   : > { %v5790_v18 = vadd.f32 %v5789_v14, %v5726_v17  ;;  %v7187_v16 = vpop.f32.mrb[37].mxu1 }
0x1919   : > { %v5792_v19 = vpop.f32.mrb[38].mxu1 }
0x191a   : > { %vm5796_vm9 = vcmp.ge.f32.partialorder %v5790_v18, 0.0  ;;  %v5798_v58 = vmul.f32 0.1, %v5790_v18  ;;  %v5793_v24 = vadd.f32 %v5792_v19, %v5731_v57  ;;  %v7188_v25 = vpop.f32.mrb[39].mxu1 }
0x191c   : > { %vm5797_vm0 = vcmp.ge.f32.partialorder %v5793_v24, 0.0  ;;  %v5799_v26 = vmul.f32 0.1, %v5793_v24  ;;  %v5800_v28 = vsel %vm5796_vm9, %v5790_v18, %v5798_v58 }
0x191d   : > { %5808 = vrot.lane.b32.xlu1 %v5800_v28, %s9625_s22  ;;  %5802 = vst [vmem:[%s9104_s5] sm:$0xff] %v5800_v28 }
0x191e   : > { %v5801_v32 = vsel %vm5797_vm0, %v5793_v24, %v5799_v26 }
0x191f   : > { %5810 = vrot.lane.b32.xlu0 %v5801_v32, %s9625_s22  ;;  %5803 = vst [vmem:[%s9104_s5 + $0x8] sm:$0xff] %v5801_v32  ;;  %s9661_s22 = sld [smem:[#allocation37_spill]]  ;;  %s7973_s5 = smov [#allocation8]  }
0x1923   : > { %5835 = vrot.lane.b32.xlu0 %v5830_v33, %s9589_s12 }
0x1925   : > { %v5823_v48 = vld [vmem:[%s9661_s22 + $0x1] sm:$0x1]  ;;  %v5822_v49 = vld [vmem:[%s9661_s22] sm:$0x1]  ;;  %v5824_v50 = vld [vmem:[%s9661_s22 + $0x2] sm:$0x1] }
0x1927   : > { %5927 = vrot.lane.b32.xlu0 %v5830_v33, %s9585_s26 }
0x192b   : > { %4639 = vperm.xlu0 %7469, %v4636_v34  }
0x198f   : > { %v5809_v35 = vpop.permute.xlu1 %5808 }
0x1990   : > { %5815 = vst.msk [vmem:[#allocation2] sm:$0xff] %vm5814_vm4, %v5809_v35 }
0x1991   : > { %5818 = vst.msk [vmem:[#allocation2] sm:$0xff] %vm5817_vm13, %v7961_v8  ;;  %v5811_v36 = vpop.permute.xlu0 %5810 }
0x1992   : > { %5816 = vst.msk [vmem:[#allocation2 + $0x18] sm:$0xff] %vm5814_vm4, %v5811_v36 }
0x1993   : > { %5820 = vst.msk [vmem:[#allocation2 + $0x18] sm:$0xff] %vm5817_vm13, %v7961_v8 }
0x1995   : > { %v5836_v40 = vpop.permute.xlu0 %5835 }
0x1998   : > { %v5825_v37 = vld [vmem:[#allocation2] sm:$0xff] }
0x1999   : > { %v5928_v41 = vpop.permute.xlu0 %5927 }
0x199a   : > { %v5826_v39 = vld [vmem:[#allocation2 + $0x18] sm:$0xff] }
0x199b   : > { %v5827_v20 = vpack.c.bf16 %v5826_v39, %v5825_v37 }
0x199d   : > { %5833 = vrot.lane.b32.xlu1 %v5827_v20, %s9589_s12  ;;  %s9662_s12 = sld [smem:[#allocation58_spill]] }
0x19a1   : > { %5925 = vrot.lane.b32.xlu1 %v5827_v20, %s9585_s26 }
0x19a3   : > { %s1410_s26 = scalar_lea.vmem %s9662_s12, %s8263_s23  ;;  %s7616_s12 = sshll.u32 %s7973_s5, 4  ;;  %s7617_s12 = int_to_ptr.vmem [resolvable:$false] %s7616_s12 }
0x19a5   : > { %2914 = vperm.xlu1 %7470, %v2911_v21  }
0x19a9   : > { %5978 = vperm.xlu1 %7470, %v5975_v42  }
0x19aa   : > { %v4640_v43 = vpop.permute.xlu0 %4639 }
0x19ab   : > { %v4645_v44 = vrot.slane %v4640_v43, %v8305_v22 }
0x19ad   : > { %v4646_v45 = vadd.f32 %v4645_v44, %v9044_v31 }
0x19af   : > { %4647 = vst [vmem:[%s1413_s24] sm:$0x1] %v4646_v45  ;;  %s6064_s24 = sshll.u32 %s8463_s11, 4  ;;  %s9143_s24 = int_to_ptr.vmem [resolvable:$true] %s6064_s24 }
0x19b0   : > { %s7612_s21 = scalar_lea.vmem %s9143_s24, 256  ;;  %p7619_p0 = scmp.lt.s32.totalorder %s9143_s24, %s7617_s12 }
0x19b1   : > { %p7613_p11 = scmp.ne.s32.totalorder %s9143_s24, %s7612_s21 }
0x19b3   : > { %p7614_p12 = pnand %p7613_p11, %p8248_p5 }
0x19b5   : > { %p7615_p13 = pneg %p7614_p12 }
0x1a0f   : > { %v5834_v46 = vpop.permute.xlu1 %5833 }
0x1a10   : > { %v5837_v47 = vsel %vm1499_vm7, %v5834_v46, %v5836_v40 }
0x1a11   : > { %7190 = vmatpush3.bf16.msra.mxu1 %v5837_v47 }
0x1a12   : > { %7195 = vmatprep.subr.bf16.mxu1 %v7961_v8 }
0x1a13   : > { %v5926_v31 = vpop.permute.xlu1 %5925 }
0x1a14   : > { %7192 = vmatmul.mubr.msk.bf16.vlgmr.msra.gmra.mrb[40].mxu1 %vm2348_vm15, %v5823_v48  ;;  %v5929_v4 = vsel %vm1523_vm8, %v5926_v31, %v5928_v41 }
0x1a15   : > { %7196 = vmatpush3.bf16.msra.mxu1 %v5827_v20  ;;  %7197 = vmatprep.mubr.msk.bf16.mxu1 %vm7970_vm14, %v7961_v8 }
0x1a16   : > { %7201 = vmatprep.subr.bf16.mxu1 %v7961_v8 }
0x1a1c   : > { %7198 = vmatmul.mubr.msk.bf16.vlgmr.msra.gmra.mrb[44].mxu1 %vm2348_vm15, %v5822_v49 }
0x1a1d   : > { %7202 = vmatpush3.bf16.msra.mxu1 %v5929_v4  ;;  %7203 = vmatprep.mubr.msk.bf16.mxu1 %vm7970_vm14, %v7961_v8 }
0x1a24   : > { %v2915_v51 = vpop.permute.xlu1 %2914  ;;  %7204 = vmatmul.mubr.msk.bf16.vlgmr.msra.gmra.mrb[48].mxu1 %vm2348_vm15, %v5824_v50 }
0x1a25   : > { %v2920_v11 = vrot.slane %v2915_v51, %v8305_v22 }
0x1a27   : > { %v2921_v52 = vadd.f32 %v2920_v11, %v8788_v62 }
0x1a29   : > { %2922 = vst [vmem:[%s1410_s26] sm:$0x1] %v2921_v52  ;;  %s7618_s26 = scalar_lea.vmem %s7617_s12, 512 }
0x1a2a   : > { %p7620_p1 = scmp.lt.s32.totalorder %s7618_s26, %s7612_s21 }
0x1a2c   : > { %p7621_p2 = por %p7620_p1, %p7619_p0 }
0x1a2e   : > { %p7622_p3 = pnand %p7621_p2, %p7615_p13 }
0x1a30   : > { %7625 = shalt.err (!%p7622_p3)
}
0x1a31   : > { %s7626_s2 = scalar_lea.hbm %s9163_s10, 256  ;;  %s7630_s5 = scalar_lea.hbm %s9664_s6, 512 }
0x1a32   : > { %p7627_p4 = scmp.ne.s32.totalorder %s9163_s10, %s7626_s2  ;;  %p7631_p9 = scmp.lt.u32.totalorder %s9163_s10, %s9664_s6 }
0x1a33   : > { %p7632_p10 = scmp.lt.u32.totalorder %s7630_s5, %s7626_s2  ;;  %p7634_p12 = scmp.lt.u32.totalorder %s7626_s2, %s9163_s10 }
0x1a34   : > { %p7628_p7 = pnand %p7627_p4, %p8248_p5 }
0x1a35   : > { %p7633_p11 = por %p7632_p10, %p7631_p9 }
0x1a36   : > { %p7629_p8 = pneg %p7628_p7 }
0x1a37   : > { %p7635_p0 = por %p7634_p12, %p7633_p11 }
0x1a39   : > { %p7636_p13 = pnand %p7635_p0, %p7629_p8 }
0x1a3b   : > { %7639 = shalt.err (!%p7636_p13)
}
0x1a3c   : > { %s7974_s21 = smov 128   ;;  %s9665_s12 = sld [smem:[#allocation59_spill]] }
0x1a3d   : > { %s9666_s26 = sld [smem:[#allocation61_spill]]  ;;  %s7975_s11 = smov 8  }
0x1a3e   : > { %s9667_s2 = scalar_lea.sflag [#allocation9], %s9156_s17  ;;  %s6100_s6 = sshll.u32 %s8703_s4, 4  ;;  %s9193_s6 = int_to_ptr.vmem [resolvable:$true] %s6100_s6 }
0x1a3f   : > { %7332 = dma.vmem_to_hbm [thread:$0]  (%p8248_p5), %s9143_s24, 256, %s9163_s10, %s9667_s2, %s7974_s21, %s7974_s21, %s7975_s11  }
0x1a40   : > { %s9517_s30 = scalar_lea.sflag [#allocation12], %s9156_s17  ;;  %s7640_s1 = scalar_lea.vmem %s9193_s6, 256 }
0x1a41   : > { %p7641_p1 = scmp.ne.s32.totalorder %s9193_s6, %s7640_s1  ;;  %s7976_s18 = smov [#allocation11]  }
0x1a42   : > { %s9190_s5 = scalar_lea.hbm %s9665_s12, %s9159_s25  ;;  %s7644_s14 = sshll.u32 %s7976_s18, 4  ;;  %s7645_s14 = int_to_ptr.vmem [resolvable:$false] %s7644_s14 }
0x1a43   : > { %s9197_s22 = scalar_lea.hbm %s9666_s26, %s9159_s25  ;;  %p7642_p2 = pnand %p7641_p1, %p8248_p5 }
0x1a44   : > { %s7646_s24 = scalar_lea.vmem %s7645_s14, 512  ;;  %p7647_p4 = scmp.lt.s32.totalorder %s9193_s6, %s7645_s14 }
0x1a45   : > { %p7643_p3 = pneg %p7642_p2  ;;  %p7648_p7 = scmp.lt.s32.totalorder %s7646_s24, %s7640_s1 }
0x1a47   : > { %p7649_p8 = por %p7648_p7, %p7647_p4 }
0x1a49   : > { %p7650_p9 = pnand %p7649_p8, %p7643_p3 }
0x1a4b   : > { %7653 = shalt.err (!%p7650_p9)
}
0x1a4c   : > { %s7654_s4 = scalar_lea.hbm %s9190_s5, 256  ;;  %s7658_s18 = scalar_lea.hbm %s9665_s12, 512 }
0x1a4d   : > { %p7655_p10 = scmp.ne.s32.totalorder %s9190_s5, %s7654_s4  ;;  %p7659_p0 = scmp.lt.u32.totalorder %s9190_s5, %s9665_s12 }
0x1a4e   : > { %p7660_p13 = scmp.lt.u32.totalorder %s7658_s18, %s7654_s4  ;;  %p7662_p2 = scmp.lt.u32.totalorder %s7654_s4, %s9190_s5 }
0x1a4f   : > { %p7656_p11 = pnand %p7655_p10, %p8248_p5 }
0x1a50   : > { %p7661_p1 = por %p7660_p13, %p7659_p0 }
0x1a51   : > { %p7657_p12 = pneg %p7656_p11 }
0x1a52   : > { %p7663_p4 = por %p7662_p2, %p7661_p1 }
0x1a54   : > { %p7664_p3 = pnand %p7663_p4, %p7657_p12 }
0x1a56   : > { %7667 = shalt.err (!%p7664_p3)
}
0x1a57   : > { %7334 = dma.vmem_to_hbm [thread:$0]  (%p8248_p5), %s9193_s6, 256, %s9190_s5, %s9517_s30  }
0x1a58   : > { %s9516_s14 = scalar_lea.sflag [#allocation15], %s9156_s17  ;;  %s7668_s1 = scalar_lea.vmem %s9149_s20, 256 }
0x1a59   : > { %p7669_p7 = scmp.ne.s32.totalorder %s9149_s20, %s7668_s1  ;;  %s7977_s10 = smov [#allocation14]  }
0x1a5a   : > { %s7672_s2 = sshll.u32 %s7977_s10, 4  ;;  %s7673_s2 = int_to_ptr.vmem [resolvable:$false] %s7672_s2 }
0x1a5b   : > { %p7670_p8 = pnand %p7669_p7, %p8248_p5  ;;  %s7674_s24 = scalar_lea.vmem %s7673_s2, 512 }
0x1a5c   : > { %p7675_p10 = scmp.lt.s32.totalorder %s9149_s20, %s7673_s2  ;;  %p7676_p11 = scmp.lt.s32.totalorder %s7674_s24, %s7668_s1 }
0x1a5d   : > { %p7671_p9 = pneg %p7670_p8 }
0x1a5e   : > { %p7677_p12 = por %p7676_p11, %p7675_p10 }
0x1a60   : > { %p7678_p0 = pnand %p7677_p12, %p7671_p9 }
0x1a62   : > { %7681 = shalt.err (!%p7678_p0)
}
0x1a63   : > { %s7682_s6 = scalar_lea.hbm %s9197_s22, 256  ;;  %s7686_s5 = scalar_lea.hbm %s9666_s26, 512 }
0x1a64   : > { %p7683_p13 = scmp.ne.s32.totalorder %s9197_s22, %s7682_s6  ;;  %p7687_p4 = scmp.lt.u32.totalorder %s9197_s22, %s9666_s26 }
0x1a65   : > { %p7688_p3 = scmp.lt.u32.totalorder %s7686_s5, %s7682_s6  ;;  %p7690_p8 = scmp.lt.u32.totalorder %s7682_s6, %s9197_s22 }
0x1a66   : > { %p7684_p1 = pnand %p7683_p13, %p8248_p5 }
0x1a67   : > { %p7689_p7 = por %p7688_p3, %p7687_p4 }
0x1a68   : > { %p7685_p2 = pneg %p7684_p1 }
0x1a69   : > { %p7691_p10 = por %p7690_p8, %p7689_p7 }
0x1a6b   : > { %p7692_p9 = pnand %p7691_p10, %p7685_p2 }
0x1a6d   : > { %7695 = shalt.err (!%p7692_p9)
}
0x1a6e   : > { %s9668_s4 = sld [smem:[#allocation64_spill]]  ;;  %s6029_s1 = scalar_lea.sflag [#allocation18], %s9156_s17 }
0x1a6f   : > { %7336 = dma.vmem_to_hbm [thread:$0]  (%p8248_p5), %s9149_s20, 256, %s9197_s22, %s9516_s14, %s7974_s21, %s7974_s21, %s7975_s11  }
0x1a70   : > { %s7696_s10 = scalar_lea.vmem %s9151_s27, 256  ;;  %s7978_s2 = smov [#allocation17]  }
0x1a71   : > { %p7697_p11 = scmp.ne.s32.totalorder %s9151_s27, %s7696_s10  ;;  %s7700_s24 = sshll.u32 %s7978_s2, 4  ;;  %s7701_s24 = int_to_ptr.vmem [resolvable:$false] %s7700_s24 }
0x1a72   : > { %s7702_s6 = scalar_lea.vmem %s7701_s24, 512  ;;  %p7703_p13 = scmp.lt.s32.totalorder %s9151_s27, %s7701_s24 }
0x1a73   : > { %p7698_p12 = pnand %p7697_p11, %p8248_p5  ;;  %p7704_p1 = scmp.lt.s32.totalorder %s7702_s6, %s7696_s10 }
0x1a74   : > { %s9244_s18 = scalar_lea.hbm %s9668_s4, %s9159_s25 }
0x1a75   : > { %p7699_p0 = pneg %p7698_p12  ;;  %p7705_p2 = por %p7704_p1, %p7703_p13 }
0x1a77   : > { %p7706_p4 = pnand %p7705_p2, %p7699_p0 }
0x1a79   : > { %7709 = shalt.err (!%p7706_p4)
}
0x1a7a   : > { %s7710_s20 = scalar_lea.hbm %s9244_s18, 256  ;;  %s7714_s22 = scalar_lea.hbm %s9668_s4, 512 }
0x1a7b   : > { %p7711_p3 = scmp.ne.s32.totalorder %s9244_s18, %s7710_s20  ;;  %p7715_p10 = scmp.lt.u32.totalorder %s9244_s18, %s9668_s4 }
0x1a7c   : > { %p7716_p9 = scmp.lt.u32.totalorder %s7714_s22, %s7710_s20  ;;  %p7718_p12 = scmp.lt.u32.totalorder %s7710_s20, %s9244_s18 }
0x1a7d   : > { %p7712_p7 = pnand %p7711_p3, %p8248_p5 }
0x1a7e   : > { %p7717_p11 = por %p7716_p9, %p7715_p10 }
0x1a7f   : > { %p7713_p8 = pneg %p7712_p7 }
0x1a80   : > { %p7719_p13 = por %p7718_p12, %p7717_p11 }
0x1a82   : > { %p7720_p0 = pnand %p7719_p13, %p7713_p8 }
0x1a84   : > { %7723 = shalt.err (!%p7720_p0)
}
0x1a85   : > { %s9669_s5 = sld [smem:[#allocation55_spill]]  ;;  %s9670_s10 = sld [smem:[#allocation57_spill]] }
0x1a86   : > { %s9671_s2 = sld [smem:[#allocation60_spill]]  ;;  %s6051_s20 = sshll.u32 %s8348_s19, 4  ;;  %s9278_s20 = int_to_ptr.vmem [resolvable:$true] %s6051_s20 }
0x1a87   : > { %7338 = dma.vmem_to_hbm [thread:$0]  (%p8248_p5), %s9151_s27, 256, %s9244_s18, %s6029_s1, %s7974_s21, %s7974_s21, %s7975_s11  }
0x1a88   : > { %s5988_s30 = scalar_lea.sflag [#allocation7], %s8339_s7  ;;  %s7724_s4 = scalar_lea.vmem %s9278_s20, 256 }
0x1a89   : > { %p7725_p1 = scmp.ne.s32.totalorder %s9278_s20, %s7724_s4  ;;  %s7979_s12 = smov [#allocation6]  }
0x1a8a   : > { %s7728_s27 = sshll.u32 %s7979_s12, 4  ;;  %s7729_s27 = int_to_ptr.vmem [resolvable:$false] %s7728_s27 }
0x1a8b   : > { %s9271_s6 = scalar_lea.hbm %s9669_s5, %s9159_s25  ;;  %s9276_s22 = scalar_lea.hbm %s9670_s10, %s9159_s25 }
0x1a8c   : > { %s9672_s24 = smov %s9671_s2  ;;  %s9282_s14 = scalar_lea.hbm %s9671_s2, %s9159_s25 }
0x1a8d   : > { %p7726_p2 = pnand %p7725_p1, %p8248_p5  ;;  %s7730_s18 = scalar_lea.vmem %s7729_s27, 512 }
0x1a8e   : > { %p7731_p3 = scmp.lt.s32.totalorder %s9278_s20, %s7729_s27  ;;  %p7732_p7 = scmp.lt.s32.totalorder %s7730_s18, %s7724_s4 }
0x1a8f   : > { %p7727_p4 = pneg %p7726_p2 }
0x1a90   : > { %p7733_p8 = por %p7732_p7, %p7731_p3 }
0x1a92   : > { %p7734_p10 = pnand %p7733_p8, %p7727_p4 }
0x1a94   : > { %7737 = shalt.err (!%p7734_p10)
}
0x1a95   : > { %s7738_s7 = scalar_lea.hbm %s9271_s6, 256  ;;  %s7742_s19 = scalar_lea.hbm %s9669_s5, 512 }
0x1a96   : > { %p7739_p9 = scmp.ne.s32.totalorder %s9271_s6, %s7738_s7  ;;  %p7743_p13 = scmp.lt.u32.totalorder %s9271_s6, %s9669_s5 }
0x1a97   : > { %p7744_p0 = scmp.lt.u32.totalorder %s7742_s19, %s7738_s7  ;;  %p7746_p2 = scmp.lt.u32.totalorder %s7738_s7, %s9271_s6 }
0x1a98   : > { %p7740_p11 = pnand %p7739_p9, %p8248_p5 }
0x1a99   : > { %p7745_p1 = por %p7744_p0, %p7743_p13 }
0x1a9a   : > { %p7741_p12 = pneg %p7740_p11 }
0x1a9b   : > { %p7747_p3 = por %p7746_p2, %p7745_p1 }
0x1a9d   : > { %p7748_p4 = pnand %p7747_p3, %p7741_p12 }
0x1a9f   : > { %7751 = shalt.err (!%p7748_p4)
}
0x1aa0   : > { %7331 = dma.vmem_to_hbm [thread:$0]  (%p8248_p5), %s9278_s20, 256, %s9271_s6, %s5988_s30  }
0x1aa1   : > { %s7752_s12 = scalar_lea.vmem %s9145_s9, 256  ;;  %s7980_s4 = smov [#allocation10]  }
0x1aa2   : > { %p7753_p7 = scmp.ne.s32.totalorder %s9145_s9, %s7752_s12  ;;  %s7756_s2 = sshll.u32 %s7980_s4, 4  ;;  %s7757_s2 = int_to_ptr.vmem [resolvable:$false] %s7756_s2 }
0x1aa3   : > { %s7758_s27 = scalar_lea.vmem %s7757_s2, 512  ;;  %p7759_p9 = scmp.lt.s32.totalorder %s9145_s9, %s7757_s2 }
0x1aa4   : > { %p7754_p8 = pnand %p7753_p7, %p8248_p5  ;;  %p7760_p11 = scmp.lt.s32.totalorder %s7758_s27, %s7752_s12 }
0x1aa6   : > { %p7755_p10 = pneg %p7754_p8  ;;  %p7761_p12 = por %p7760_p11, %p7759_p9 }
0x1aa8   : > { %p7762_p13 = pnand %p7761_p12, %p7755_p10 }
0x1aaa   : > { %7765 = shalt.err (!%p7762_p13)
}
0x1aab   : > { %s7766_s30 = scalar_lea.hbm %s9276_s22, 256  ;;  %s7770_s6 = scalar_lea.hbm %s9670_s10, 512 }
0x1aac   : > { %p7767_p0 = scmp.ne.s32.totalorder %s9276_s22, %s7766_s30  ;;  %p7771_p3 = scmp.lt.u32.totalorder %s9276_s22, %s9670_s10 }
0x1aad   : > { %p7772_p4 = scmp.lt.u32.totalorder %s7770_s6, %s7766_s30  ;;  %p7774_p8 = scmp.lt.u32.totalorder %s7766_s30, %s9276_s22 }
0x1aae   : > { %p7768_p1 = pnand %p7767_p0, %p8248_p5 }
0x1aaf   : > { %p7773_p7 = por %p7772_p4, %p7771_p3 }
0x1ab0   : > { %p7769_p2 = pneg %p7768_p1 }
0x1ab1   : > { %p7775_p9 = por %p7774_p8, %p7773_p7 }
0x1ab3   : > { %p7776_p10 = pnand %p7775_p9, %p7769_p2 }
0x1ab5   : > { %7779 = shalt.err (!%p7776_p10)
}
0x1ab6   : > { %s9673_s20 = scalar_lea.sflag [#allocation9], %s9156_s17  ;;  %s7780_s18 = scalar_lea.vmem %s9147_s13, 256 }
0x1ab7   : > { %7333 = dma.vmem_to_hbm [thread:$0]  (%p8248_p5), %s9145_s9, 256, %s9276_s22, %s9673_s20, %s7974_s21, %s7974_s21, %s7975_s11  }
0x1ab8   : > { %p7781_p11 = scmp.ne.s32.totalorder %s9147_s13, %s7780_s18  ;;  %s7981_s7 = smov [#allocation13]  }
0x1ab9   : > { %s7784_s19 = sshll.u32 %s7981_s7, 4  ;;  %s7785_s19 = int_to_ptr.vmem [resolvable:$false] %s7784_s19 }
0x1aba   : > { %p7782_p12 = pnand %p7781_p11, %p8248_p5  ;;  %s7786_s12 = scalar_lea.vmem %s7785_s19, 512 }
0x1abb   : > { %p7787_p0 = scmp.lt.s32.totalorder %s9147_s13, %s7785_s19  ;;  %p7788_p1 = scmp.lt.s32.totalorder %s7786_s12, %s7780_s18 }
0x1abc   : > { %p7783_p13 = pneg %p7782_p12 }
0x1abd   : > { %p7789_p2 = por %p7788_p1, %p7787_p0 }
0x1abf   : > { %p7790_p3 = pnand %p7789_p2, %p7783_p13 }
0x1ac1   : > { %7793 = shalt.err (!%p7790_p3)
}
0x1ac2   : > { %s7794_s9 = scalar_lea.hbm %s9282_s14, 256  ;;  %s7798_s22 = scalar_lea.hbm %s9672_s24, 512 }
0x1ac3   : > { %p7795_p4 = scmp.ne.s32.totalorder %s9282_s14, %s7794_s9  ;;  %p7799_p9 = scmp.lt.u32.totalorder %s9282_s14, %s9672_s24 }
0x1ac4   : > { %p7800_p10 = scmp.lt.u32.totalorder %s7798_s22, %s7794_s9  ;;  %p7802_p12 = scmp.lt.u32.totalorder %s7794_s9, %s9282_s14 }
0x1ac5   : > { %p7796_p7 = pnand %p7795_p4, %p8248_p5 }
0x1ac6   : > { %p7801_p11 = por %p7800_p10, %p7799_p9 }
0x1ac7   : > { %p7797_p8 = pneg %p7796_p7 }
0x1ac8   : > { %p7803_p0 = por %p7802_p12, %p7801_p11 }
0x1aca   : > { %p7804_p13 = pnand %p7803_p0, %p7797_p8 }
0x1acc   : > { %7807 = shalt.err (!%p7804_p13)
}
0x1acd   : > { %s9674_s4 = scalar_lea.sflag [#allocation12], %s9156_s17  ;;  %s9675_s2 = sld [smem:[#allocation63_spill]] }
0x1ace   : > { %7335 = dma.vmem_to_hbm [thread:$0]  (%p8248_p5), %s9147_s13, 256, %s9282_s14, %s9674_s4, %s7974_s21, %s7974_s21, %s7975_s11  }
0x1acf   : > { %s6812_s30 = sshll.u32 %s8229_s3, 7  ;;  %s6148_s6 = sshll.u32 %s8964_s8, 4  ;;  %s6149_s6 = int_to_ptr.vmem [resolvable:$true] %s6148_s6 }
0x1ad0   : > { %s7808_s18 = scalar_lea.vmem %s6149_s6, 128  ;;  %s7982_s7 = smov [#allocation16]  }
0x1ad1   : > { %p7809_p1 = scmp.ne.s32.totalorder %s6149_s6, %s7808_s18  ;;  %s7812_s19 = sshll.u32 %s7982_s7, 4  ;;  %s7813_s19 = int_to_ptr.vmem [resolvable:$false] %s7812_s19 }
0x1ad2   : > { %s7814_s12 = scalar_lea.vmem %s7813_s19, 256  ;;  %p7815_p4 = scmp.lt.s32.totalorder %s6149_s6, %s7813_s19 }
0x1ad3   : > { %s9676_s27 = smov %s9675_s2  ;;  %s6146_s20 = scalar_lea.hbm %s9675_s2, %s6812_s30 }
0x1ad4   : > { %p7810_p2 = pnand %p7809_p1, %p8248_p5  ;;  %p7816_p7 = scmp.lt.s32.totalorder %s7814_s12, %s7808_s18 }
0x1ad6   : > { %p7811_p3 = pneg %p7810_p2  ;;  %p7817_p8 = por %p7816_p7, %p7815_p4 }
0x1ad8   : > { %p7818_p9 = pnand %p7817_p8, %p7811_p3 }
0x1ada   : > { %7821 = shalt.err (!%p7818_p9)
}
0x1adb   : > { %s7822_s9 = scalar_lea.hbm %s6146_s20, 128  ;;  %s7826_s3 = scalar_lea.hbm %s9676_s27, 256 }
0x1adc   : > { %p7823_p10 = scmp.ne.s32.totalorder %s6146_s20, %s7822_s9  ;;  %p7827_p0 = scmp.lt.u32.totalorder %s6146_s20, %s9676_s27 }
0x1add   : > { %p7828_p13 = scmp.lt.u32.totalorder %s7826_s3, %s7822_s9  ;;  %p7830_p2 = scmp.lt.u32.totalorder %s7822_s9, %s6146_s20 }
0x1ade   : > { %p7824_p11 = pnand %p7823_p10, %p8248_p5 }
0x1adf   : > { %p7829_p1 = por %p7828_p13, %p7827_p0 }
0x1ae0   : > { %p7825_p12 = pneg %p7824_p11 }
0x1ae1   : > { %p7831_p6 = por %p7830_p2, %p7829_p1 }
0x1ae3   : > { %p7832_p4 = pnand %p7831_p6, %p7825_p12 }
0x1ae5   : > { %7835 = shalt.err (!%p7832_p4)
}
0x1ae6   : > { %s9677_s8 = scalar_lea.sflag [#allocation15], %s9156_s17  ;;  %s9361_s13 = scalar_lea.hbm %s8195_s29, %s9159_s25 }
0x1ae7   : > { %7337 = dma.vmem_to_hbm [thread:$0]  (%p8248_p5), %s6149_s6, 128, %s6146_s20, %s9677_s8  }
0x1ae8   : > { %s7836_s14 = scalar_lea.vmem %s9153_s28, 256  ;;  %s7983_s22 = smov [#allocation19]  }
0x1ae9   : > { %p7837_p3 = scmp.ne.s32.totalorder %s9153_s28, %s7836_s14  ;;  %s7840_s4 = sshll.u32 %s7983_s22, 4  ;;  %s7841_s4 = int_to_ptr.vmem [resolvable:$false] %s7840_s4 }
0x1aea   : > { %s7842_s2 = scalar_lea.vmem %s7841_s4, 512  ;;  %p7843_p6 = scmp.lt.s32.totalorder %s9153_s28, %s7841_s4 }
0x1aeb   : > { %p7838_p7 = pnand %p7837_p3, %p8248_p5  ;;  %p7844_p9 = scmp.lt.s32.totalorder %s7842_s2, %s7836_s14 }
0x1aed   : > { %p7839_p8 = pneg %p7838_p7  ;;  %p7845_p10 = por %p7844_p9, %p7843_p6 }
0x1aef   : > { %p7846_p11 = pnand %p7845_p10, %p7839_p8 }
0x1af1   : > { %7849 = shalt.err (!%p7846_p11)
}
0x1af2   : > { %s7850_s25 = scalar_lea.hbm %s9361_s13, 256  ;;  %s7854_s30 = scalar_lea.hbm %s8195_s29, 512 }
0x1af3   : > { %p7851_p12 = scmp.ne.s32.totalorder %s9361_s13, %s7850_s25  ;;  %p7855_p1 = scmp.lt.u32.totalorder %s9361_s13, %s8195_s29 }
0x1af4   : > { %p7856_p2 = scmp.lt.u32.totalorder %s7854_s30, %s7850_s25  ;;  %p7858_p3 = scmp.lt.u32.totalorder %s7850_s25, %s9361_s13 }
0x1af5   : > { %p7852_p0 = pnand %p7851_p12, %p8248_p5 }
0x1af6   : > { %p7857_p4 = por %p7856_p2, %p7855_p1 }
0x1af7   : > { %p7853_p13 = pneg %p7852_p0 }
0x1af8   : > { %p7859_p7 = por %p7858_p3, %p7857_p4 }
0x1afa   : > { %p7860_p8 = pnand %p7859_p7, %p7853_p13 }
0x1afc   : > { %7863 = shalt.err (!%p7860_p8)
}
0x1afd   : > { %7339 = dma.vmem_to_hbm [thread:$0]  (%p8248_p5), %s9153_s28, 256, %s9361_s13, %s6029_s1, %s7974_s21, %s7974_s21, %s7975_s11   ;;  %v5876_v8 = vpop.f32.mrb[40].mxu1  ;;  %v5979_v59 = vpop.permute.xlu1 %5978 }
0x1afe   : > { %v7193_v62 = vpop.f32.mrb[41].mxu1  ;;  %v5984_v61 = vrot.slane %v5979_v59, %v8305_v22  ;;  %s1416_s16 = scalar_lea.vmem %s8200_s15, %s8263_s23 }
0x1aff   : > { %v5879_v53 = vpop.f32.mrb[42].mxu1 }
0x1b00   : > { %v7194_v54 = vpop.f32.mrb[43].mxu1 }
0x1b01   : > { %v5919_v55 = vpop.f32.mrb[44].mxu1 }
0x1b02   : > { %v5920_v56 = vadd.f32 %v5919_v55, %v5876_v8  ;;  %v7199_v13 = vpop.f32.mrb[45].mxu1 }
0x1b03   : > { %v5922_v15 = vpop.f32.mrb[46].mxu1 }
0x1b04   : > { %v7200_v23 = vpop.f32.mrb[47].mxu1 }
0x1b05   : > { %v5968_v60 = vpop.f32.mrb[48].mxu1 }
0x1b06   : > { %v5974_v63 = vadd.f32 %v5968_v60, %v5920_v56  ;;  %v7205_v0 = vpop.f32.mrb[49].mxu1 }
0x1b07   : > { %v5971_v1 = vpop.f32.mrb[50].mxu1 }
0x1b08   : > { %v5985_v2 = vadd.f32 %v5984_v61, %v5974_v63  ;;  %v7206_v3 = vpop.f32.mrb[51].mxu1 }
0x1b0a   : > { %5986 = vst [vmem:[%s1416_s16] sm:$0x1] %v5985_v2 }
0x1b0b PF: > { %s9678_s28 = sld [smem:[#allocation65_spill]]  ;;  %s9679_s17 = sld [smem:[#allocation70_spill]] }
0x1b0c   : > { %p7377_p5 = scmp.ge.s32.totalorder %s7914_s0, 2 }
0x1b11   : > { %s6195_s11 = sand.u32 1, %s9678_s28   ;;  %p9680_p6 = scmp.ne.s32.totalorder %s9679_s17, 0 }
0x1b12   : > { %s6196_s1 = scalar_lea.sflag [#allocation7], %s6195_s11 }
0x1b13   : > { %p9392_p9 = pnand %p7377_p5, %p9680_p6 }
0x1b15   : > { %7881 = dma.done.wait (!%p9392_p9), %s6196_s1, 256  }
0x1b16   : > { %7883 = vsyncadd (!%p9392_p9), %s6196_s1, 4294967040  ;;  %s9682_s23 = sadd.s32 4294967294, %s7914_s0  }
0x1b17   : > { %s6204_s6 = sand.u32 1, %s9682_s23  }
0x1b18   : > { %s6205_s20 = scalar_lea.sflag [#allocation9], %s6204_s6 }
0x1b19   : > { %7885 = dma.done.wait (!%p9392_p9), %s6205_s20, 512  }
0x1b1a   : > { %7887 = vsyncadd (!%p9392_p9), %s6205_s20, 4294966784  ;;  %s6229_s18 = scalar_lea.sflag [#allocation12], %s6204_s6 }
0x1b1b   : > { %7889 = dma.done.wait (!%p9392_p9), %s6229_s18, 512  }
0x1b1c   : > { %7891 = vsyncadd (!%p9392_p9), %s6229_s18, 4294966784  ;;  %s6247_s7 = scalar_lea.sflag [#allocation15], %s6204_s6 }
0x1b1d   : > { %7893 = dma.done.wait (!%p9392_p9), %s6247_s7, 384  }
0x1b1e   : > { %7895 = vsyncadd (!%p9392_p9), %s6247_s7, 4294966912  ;;  %s6271_s0 = scalar_lea.sflag [#allocation18], %s6204_s6 }
0x1b1f   : > { %7897 = dma.done.wait (!%p9392_p9), %s6271_s0, 512  }
0x1b20   : > { %7899 = vsyncadd (!%p9392_p9), %s6271_s0, 4294966784  ;;  %s9683_s0 = sld [smem:[#allocation68_spill]]  ;;  %s9684_s14 = sld [smem:[#allocation66_spill]] }
0x1b21   : > { %s9685_s1 = sld [smem:[#allocation67_spill]]  ;;  %s9686_s2 = sld [smem:[#allocation69_spill]] }
0x1b26   : > { %p118_p10 = scmp.ge.s32.totalorder %s9683_s0, 4  }
0x1b28   :  { %120 = sbr.rel (!%p118_p10) target bundleno = 107 (0x6b), region = 396 }
0x1b2f   :  { %6291 = vsyncpa [#allocation7], 1 }
0x1b30   :  { %6293 = vsyncpa [#allocation7 + $0x1], 1 }
0x1b31   :  { %6294 = vsyncpa [#allocation9], 1 }
0x1b32   :  { %6296 = vsyncpa [#allocation9 + $0x1], 1 }
0x1b33   :  { %6297 = vsyncpa [#allocation12], 1 }
0x1b34   :  { %6299 = vsyncpa [#allocation12 + $0x1], 1 }
0x1b35   :  { %6300 = vsyncpa [#allocation15], 1 }
0x1b36   :  { %6302 = vsyncpa [#allocation15 + $0x1], 1 }
0x1b37   :  { %6303 = vsyncpa [#allocation18], 1 }
0x1b38   :  { %6305 = vsyncpa [#allocation18 + $0x1], 1 }

</bundles_post_ra>
